<compile_context>
chip_gen: v5e
topology: v5e:2x2
jax: 0.10.0
libtpu: 0.0.40
codegen_flags: <defaults>
</compile_context>

<pallas_src>
import functools
import math

import jax
import jax.numpy as jnp
from jax import lax
from jax.experimental import pallas as pl
from jax.experimental.pallas import tpu as pltpu


# --------------------------------------------------------------------------- #
# helpers
# --------------------------------------------------------------------------- #

def _row_tile(M):
    """Largest row tile (multiple of 8) dividing M that still yields >=2 grid steps."""
    for t in (256, 128, 64, 32, 16, 8):
        if M % t == 0 and M // t >= 2:
            return t
    return M


# --------------------------------------------------------------------------- #
# fused feed-forward kernel:  LN -> W1 -> GELU -> W2 -> +residual
# --------------------------------------------------------------------------- #

def _ff_kernel(x_ref, g_ref, b_ref, w1_ref, b1_ref, w2_ref, b2_ref, o_ref):
    x = x_ref[...].astype(jnp.float32)                           # (tm, D), f32 stats
    mu = jnp.mean(x, axis=-1, keepdims=True)
    var = jnp.mean(jnp.square(x - mu), axis=-1, keepdims=True)
    h = (x - mu) * lax.rsqrt(var + 1e-5) * g_ref[...] + b_ref[...]
    h = jnp.dot(h.astype(jnp.bfloat16), w1_ref[...],
                preferred_element_type=jnp.float32) + b1_ref[...]
    h = jax.nn.gelu(h, approximate=True)                         # tanh -> EUP
    h = jnp.dot(h.astype(jnp.bfloat16), w2_ref[...],
                preferred_element_type=jnp.float32) + b2_ref[...]
    o_ref[...] = (x + h).astype(o_ref.dtype)                     # fused residual


def ff_block(x, p):
    B, N, D = x.shape
    M = B * N
    ffh = p['w1'].shape[1]
    tm = _row_tile(M)
    out = pl.pallas_call(
        _ff_kernel,
        out_shape=jax.ShapeDtypeStruct((M, D), x.dtype),
        grid_spec=pltpu.PrefetchScalarGridSpec(
            num_scalar_prefetch=0,
            grid=(M // tm,),
            in_specs=[
                pl.BlockSpec((tm, D), lambda i: (i, 0)),
                pl.BlockSpec((1, D), lambda i: (0, 0)),
                pl.BlockSpec((1, D), lambda i: (0, 0)),
                pl.BlockSpec((D, ffh), lambda i: (0, 0)),
                pl.BlockSpec((1, ffh), lambda i: (0, 0)),
                pl.BlockSpec((ffh, D), lambda i: (0, 0)),
                pl.BlockSpec((1, D), lambda i: (0, 0)),
            ],
            out_specs=pl.BlockSpec((tm, D), lambda i: (i, 0)),
        ),
        compiler_params=pltpu.CompilerParams(dimension_semantics=("parallel",)),
        cost_estimate=pl.CostEstimate(
            flops=4 * M * D * ffh,
            transcendentals=M * ffh,
            bytes_accessed=4 * M * D + 4 * D * ffh,
        ),
    )(x.reshape(M, D), p['ln_g'], p['ln_b'], p['w1'], p['b1'], p['w2'], p['b2'])
    return out.reshape(B, N, D)


# --------------------------------------------------------------------------- #
# fused attention kernel:  LN -> per-head QKV -> softmax -> out proj -> +residual
# --------------------------------------------------------------------------- #

def _attn_kernel(x_ref, g_ref, b_ref,
                 wq_ref, bq_ref, wk_ref, bk_ref, wv_ref, bv_ref,
                 wo_ref, bo_ref, o_ref, *, heads, scale):
    x = x_ref[0].astype(jnp.float32)                             # (N, D)
    mu = jnp.mean(x, axis=-1, keepdims=True)
    var = jnp.mean(jnp.square(x - mu), axis=-1, keepdims=True)
    h = (x - mu) * lax.rsqrt(var + 1e-5) * g_ref[...] + b_ref[...]
    hb = h.astype(jnp.bfloat16)

    acc = jnp.zeros(x.shape, jnp.float32)
    for hh in range(heads):                                      # static unroll
        q = jnp.dot(hb, wq_ref[hh], preferred_element_type=jnp.float32) + bq_ref[hh]
        k = jnp.dot(hb, wk_ref[hh], preferred_element_type=jnp.float32) + bk_ref[hh]
        v = jnp.dot(hb, wv_ref[hh], preferred_element_type=jnp.float32) + bv_ref[hh]
        # scores: contract head dim of q with head dim of k (no explicit transpose)
        s = lax.dot_general(q.astype(jnp.bfloat16), k.astype(jnp.bfloat16),
                            (((1,), (1,)), ((), ())),
                            preferred_element_type=jnp.float32) * scale
        s = s - jnp.max(s, axis=-1, keepdims=True)               # f32 softmax stats
        p = jnp.exp(s)
        p = p * pl.reciprocal(jnp.sum(p, axis=-1, keepdims=True), approx=True)
        av = jnp.dot(p.astype(jnp.bfloat16), v.astype(jnp.bfloat16),
                     preferred_element_type=jnp.float32)
        acc = acc + jnp.dot(av.astype(jnp.bfloat16), wo_ref[hh],
                            preferred_element_type=jnp.float32)

    o_ref[0] = (x + acc + bo_ref[...]).astype(o_ref.dtype)       # fused residual


def attention_block(x, p, heads):
    B, N, D = x.shape
    dh = D // heads
    scale = dh ** -0.5
    kernel = functools.partial(_attn_kernel, heads=heads, scale=scale)
    flops = B * (2 * N * D * 3 * D + 4 * N * N * D + 2 * N * D * D)
    return pl.pallas_call(
        kernel,
        out_shape=jax.ShapeDtypeStruct((B, N, D), x.dtype),
        grid_spec=pltpu.PrefetchScalarGridSpec(
            num_scalar_prefetch=0,
            grid=(B,),
            in_specs=[
                pl.BlockSpec((1, N, D), lambda b: (b, 0, 0)),
                pl.BlockSpec((1, D), lambda b: (0, 0)),
                pl.BlockSpec((1, D), lambda b: (0, 0)),
                pl.BlockSpec((heads, D, dh), lambda b: (0, 0, 0)),
                pl.BlockSpec((heads, 1, dh), lambda b: (0, 0, 0)),
                pl.BlockSpec((heads, D, dh), lambda b: (0, 0, 0)),
                pl.BlockSpec((heads, 1, dh), lambda b: (0, 0, 0)),
                pl.BlockSpec((heads, D, dh), lambda b: (0, 0, 0)),
                pl.BlockSpec((heads, 1, dh), lambda b: (0, 0, 0)),
                pl.BlockSpec((heads, dh, D), lambda b: (0, 0, 0)),
                pl.BlockSpec((1, D), lambda b: (0, 0)),
            ],
            out_specs=pl.BlockSpec((1, N, D), lambda b: (b, 0, 0)),
        ),
        compiler_params=pltpu.CompilerParams(dimension_semantics=("parallel",)),
        cost_estimate=pl.CostEstimate(
            flops=flops,
            transcendentals=B * heads * N * N,
            bytes_accessed=4 * B * N * D + 8 * D * D,
        ),
    )(x, p['ln_g'], p['ln_b'],
      p['wq'], p['bq'], p['wk'], p['bk'], p['wv'], p['bv'],
      p['wo'], p['bo'])


# --------------------------------------------------------------------------- #
# gridded linear (LinearUpsample projection & final Linear)
# --------------------------------------------------------------------------- #

def _linear_kernel(x_ref, w_ref, b_ref, o_ref):
    o_ref[...] = (jnp.dot(x_ref[...], w_ref[...],
                          preferred_element_type=jnp.float32)
                  + b_ref[...]).astype(o_ref.dtype)


def matmul(x2, w, b, out_dtype):
    M, K = x2.shape
    N = w.shape[1]
    tm = _row_tile(M)
    return pl.pallas_call(
        _linear_kernel,
        out_shape=jax.ShapeDtypeStruct((M, N), out_dtype),
        grid_spec=pltpu.PrefetchScalarGridSpec(
            num_scalar_prefetch=0,
            grid=(M // tm,),
            in_specs=[
                pl.BlockSpec((tm, K), lambda i: (i, 0)),
                pl.BlockSpec((K, N), lambda i: (0, 0)),
                pl.BlockSpec((1, N), lambda i: (0, 0)),
            ],
            out_specs=pl.BlockSpec((tm, N), lambda i: (i, 0)),
        ),
        compiler_params=pltpu.CompilerParams(dimension_semantics=("parallel",)),
        cost_estimate=pl.CostEstimate(
            flops=2 * M * K * N,
            transcendentals=0,
            bytes_accessed=2 * M * K + 2 * K * N + 2 * M * N,
        ),
    )(x2, w, b)


# --------------------------------------------------------------------------- #
# full DecoderTransfomer forward (mask=None path)
# --------------------------------------------------------------------------- #

def decoder_forward(params, x, cfg):
    heads = cfg['heads']
    x = x.astype(jnp.bfloat16)                                   # bf16 activations in HBM
    for stage in params['stages']:
        # TransformerBlock: `depth` pre-LN (MHSA + FF) layers
        for layer in stage['layers']:
            x = attention_block(x, layer['attn'], heads)
            x = ff_block(x, layer['ff'])
        # LinearUpsample(dim, 2): proj to 2*dim, then 'b n (s d) -> b (n s) d'
        B, N, D = x.shape
        up = matmul(x.reshape(B * N, D), stage['up_w'], stage['up_b'],
                    out_dtype=jnp.bfloat16)
        x = up.reshape(B, 2 * N, D)                              # free row-major reshape
    # final nn.Linear(dim, input_dim)
    B, N, D = x.shape
    out = matmul(x.reshape(B * N, D), params['final_w'], params['final_b'],
                 out_dtype=jnp.float32)
    return out.reshape(B, N, params['final_b'].shape[-1])


# --------------------------------------------------------------------------- #
# parameter init
# --------------------------------------------------------------------------- #

def init_params(key, cfg):
    dim, heads, depth = cfg['dim'], cfg['heads'], cfg['depth']
    dh = dim // heads
    ffh = cfg['ff_mult'] * dim
    n_stages = int(math.log2(cfg['up_sampling_ratio']))
    keys = iter(jax.random.split(key, 256))

    def w(shape, scale=0.02):
        return (jax.random.normal(next(keys), shape, jnp.float32) * scale).astype(jnp.bfloat16)

    def layer_params():
        return {
            'attn': {
                'ln_g': jnp.ones((1, dim), jnp.float32),
                'ln_b': jnp.zeros((1, dim), jnp.float32),
                'wq': w((heads, dim, dh)), 'bq': jnp.zeros((heads, 1, dh), jnp.float32),
                'wk': w((heads, dim, dh)), 'bk': jnp.zeros((heads, 1, dh), jnp.float32),
                'wv': w((heads, dim, dh)), 'bv': jnp.zeros((heads, 1, dh), jnp.float32),
                'wo': w((heads, dh, dim)), 'bo': jnp.zeros((1, dim), jnp.float32),
            },
            'ff': {
                'ln_g': jnp.ones((1, dim), jnp.float32),
                'ln_b': jnp.zeros((1, dim), jnp.float32),
                'w1': w((dim, ffh)), 'b1': jnp.zeros((1, ffh), jnp.float32),
                'w2': w((ffh, dim)), 'b2': jnp.zeros((1, dim), jnp.float32),
            },
        }

    stages = []
    for _ in range(n_stages):
        stages.append({
            'layers': [layer_params() for _ in range(depth)],
            'up_w': w((dim, 2 * dim)),
            'up_b': jnp.zeros((1, 2 * dim), jnp.float32),
        })
    return {
        'stages': stages,
        'final_w': w((dim, cfg['input_dim'])),
        'final_b': jnp.zeros((1, cfg['input_dim']), jnp.float32),
    }


# --------------------------------------------------------------------------- #
# main
# --------------------------------------------------------------------------- #

if __name__ == "__main__":
    cfg = dict(dim=128, input_dim=256, up_sampling_ratio=4, depth=2, heads=4, ff_mult=4)

    key = jax.random.PRNGKey(0)
    pkey, dkey = jax.random.split(key)
    params = init_params(pkey, cfg)

    B, SEQ = 2, 8
    x = jax.random.normal(dkey, (B, SEQ, cfg['dim']), jnp.float32)

    fwd = jax.jit(functools.partial(decoder_forward, cfg=cfg))
    out = fwd(params, x)
    jax.block_until_ready(out)

    assert out.shape == (B, SEQ * cfg['up_sampling_ratio'], cfg['input_dim'])
    assert out.dtype == jnp.float32
    print("KERNEL_OK")
</pallas_src>

<mosaic_0001>
module attributes {stable_mosaic.version = 11 : i64} {
  func.func @_attn_kernel(%arg0: i32, %arg1: memref<1x8x128xbf16, #tpu.memory_space<vmem>>, %arg2: memref<1x128xf32, #tpu.memory_space<vmem>>, %arg3: memref<1x128xf32, #tpu.memory_space<vmem>>, %arg4: memref<4x128x32xbf16, #tpu.memory_space<vmem>>, %arg5: memref<4x1x32xf32, #tpu.memory_space<vmem>>, %arg6: memref<4x128x32xbf16, #tpu.memory_space<vmem>>, %arg7: memref<4x1x32xf32, #tpu.memory_space<vmem>>, %arg8: memref<4x128x32xbf16, #tpu.memory_space<vmem>>, %arg9: memref<4x1x32xf32, #tpu.memory_space<vmem>>, %arg10: memref<4x32x128xbf16, #tpu.memory_space<vmem>>, %arg11: memref<1x128xf32, #tpu.memory_space<vmem>>, %arg12: memref<1x8x128xbf16, #tpu.memory_space<vmem>>) attributes {dimension_semantics = [#tpu.dimension_semantics<parallel>], iteration_bounds = array<i64: 2>, scalar_prefetch = 0 : i64, scratch_operands = 0 : i64, tpu.core_type = #tpu.core_type<tc>, window_params = [{transform_indices = @transform_0, window_bounds = array<i64: 1, 8, 128>}, {pipeline_mode = #tpu.pipeline_mode<synchronous>, transform_indices = @transform_1, window_bounds = array<i64: 1, 128>}, {pipeline_mode = #tpu.pipeline_mode<synchronous>, transform_indices = @transform_2, window_bounds = array<i64: 1, 128>}, {pipeline_mode = #tpu.pipeline_mode<synchronous>, transform_indices = @transform_3, window_bounds = array<i64: 4, 128, 32>}, {pipeline_mode = #tpu.pipeline_mode<synchronous>, transform_indices = @transform_4, window_bounds = array<i64: 4, 1, 32>}, {pipeline_mode = #tpu.pipeline_mode<synchronous>, transform_indices = @transform_5, window_bounds = array<i64: 4, 128, 32>}, {pipeline_mode = #tpu.pipeline_mode<synchronous>, transform_indices = @transform_6, window_bounds = array<i64: 4, 1, 32>}, {pipeline_mode = #tpu.pipeline_mode<synchronous>, transform_indices = @transform_7, window_bounds = array<i64: 4, 128, 32>}, {pipeline_mode = #tpu.pipeline_mode<synchronous>, transform_indices = @transform_8, window_bounds = array<i64: 4, 1, 32>}, {pipeline_mode = #tpu.pipeline_mode<synchronous>, transform_indices = @transform_9, window_bounds = array<i64: 4, 32, 128>}, {pipeline_mode = #tpu.pipeline_mode<synchronous>, transform_indices = @transform_10, window_bounds = array<i64: 1, 128>}, {transform_indices = @transform_11, window_bounds = array<i64: 1, 8, 128>}]} {
    %c0 = arith.constant 0 : index
    %c0_0 = arith.constant 0 : index
    %c0_1 = arith.constant 0 : index
    %0 = vector.load %arg1[%c0, %c0_0, %c0_1] : memref<1x8x128xbf16, #tpu.memory_space<vmem>>, vector<1x8x128xbf16>
    %1 = vector.shape_cast %0 : vector<1x8x128xbf16> to vector<8x128xbf16>
    %2 = arith.extf %1 : vector<8x128xbf16> to vector<8x128xf32>
    %cst = arith.constant dense<0.000000e+00> : vector<8xf32>
    %3 = vector.multi_reduction <add>, %2, %cst [1] : vector<8x128xf32> to vector<8xf32>
    %4 = vector.shape_cast %3 : vector<8xf32> to vector<8x1xf32>
    %cst_2 = arith.constant 1.280000e+02 : f32
    %5 = vector.broadcast %cst_2 : f32 to vector<8x1xf32>
    %6 = arith.divf %4, %5 : vector<8x1xf32>
    %7 = vector.broadcast %6 : vector<8x1xf32> to vector<8x128xf32>
    %8 = arith.subf %2, %7 : vector<8x128xf32>
    %9 = arith.mulf %8, %8 : vector<8x128xf32>
    %cst_3 = arith.constant dense<0.000000e+00> : vector<8xf32>
    %10 = vector.multi_reduction <add>, %9, %cst_3 [1] : vector<8x128xf32> to vector<8xf32>
    %11 = vector.shape_cast %10 : vector<8xf32> to vector<8x1xf32>
    %cst_4 = arith.constant 1.280000e+02 : f32
    %12 = vector.broadcast %cst_4 : f32 to vector<8x1xf32>
    %13 = arith.divf %11, %12 : vector<8x1xf32>
    %14 = vector.broadcast %6 : vector<8x1xf32> to vector<8x128xf32>
    %15 = arith.subf %2, %14 : vector<8x128xf32>
    %cst_5 = arith.constant 9.99999974E-6 : f32
    %16 = vector.broadcast %cst_5 : f32 to vector<8x1xf32>
    %17 = arith.addf %13, %16 : vector<8x1xf32>
    %18 = math.rsqrt %17 : vector<8x1xf32>
    %19 = vector.broadcast %18 : vector<8x1xf32> to vector<8x128xf32>
    %20 = arith.mulf %15, %19 : vector<8x128xf32>
    %c0_6 = arith.constant 0 : index
    %c0_7 = arith.constant 0 : index
    %21 = vector.load %arg2[%c0_6, %c0_7] : memref<1x128xf32, #tpu.memory_space<vmem>>, vector<1x128xf32>
    %22 = vector.broadcast %21 : vector<1x128xf32> to vector<8x128xf32>
    %23 = arith.mulf %20, %22 : vector<8x128xf32>
    %c0_8 = arith.constant 0 : index
    %c0_9 = arith.constant 0 : index
    %24 = vector.load %arg3[%c0_8, %c0_9] : memref<1x128xf32, #tpu.memory_space<vmem>>, vector<1x128xf32>
    %25 = vector.broadcast %24 : vector<1x128xf32> to vector<8x128xf32>
    %26 = arith.addf %23, %25 : vector<8x128xf32>
    %27 = arith.truncf %26 : vector<8x128xf32> to vector<8x128xbf16>
    %cst_10 = arith.constant 0.000000e+00 : f32
    %28 = vector.broadcast %cst_10 : f32 to vector<8x128xf32>
    %c0_11 = arith.constant 0 : index
    %c0_12 = arith.constant 0 : index
    %c0_13 = arith.constant 0 : index
    %29 = vector.load %arg4[%c0_11, %c0_12, %c0_13] : memref<4x128x32xbf16, #tpu.memory_space<vmem>>, vector<1x128x32xbf16>
    %30 = vector.shape_cast %29 : vector<1x128x32xbf16> to vector<128x32xbf16>
    %cst_14 = arith.constant dense<0.000000e+00> : vector<8x32xf32>
    %31 = tpu.matmul %27, %30, %cst_14 {dimension_numbers = #tpu.dot_dimension_numbers<[1], [0], [0], [1], [0, 0, 1, 1], [], []>} : vector<8x128xbf16>, vector<128x32xbf16>, vector<8x32xf32> -> vector<8x32xf32>
    %c0_15 = arith.constant 0 : index
    %c0_16 = arith.constant 0 : index
    %c0_17 = arith.constant 0 : index
    %32 = vector.load %arg5[%c0_15, %c0_16, %c0_17] : memref<4x1x32xf32, #tpu.memory_space<vmem>>, vector<1x1x32xf32>
    %33 = vector.shape_cast %32 : vector<1x1x32xf32> to vector<1x32xf32>
    %34 = vector.broadcast %33 : vector<1x32xf32> to vector<8x32xf32>
    %35 = arith.addf %31, %34 : vector<8x32xf32>
    %c0_18 = arith.constant 0 : index
    %c0_19 = arith.constant 0 : index
    %c0_20 = arith.constant 0 : index
    %36 = vector.load %arg6[%c0_18, %c0_19, %c0_20] : memref<4x128x32xbf16, #tpu.memory_space<vmem>>, vector<1x128x32xbf16>
    %37 = vector.shape_cast %36 : vector<1x128x32xbf16> to vector<128x32xbf16>
    %cst_21 = arith.constant dense<0.000000e+00> : vector<8x32xf32>
    %38 = tpu.matmul %27, %37, %cst_21 {dimension_numbers = #tpu.dot_dimension_numbers<[1], [0], [0], [1], [0, 0, 1, 1], [], []>} : vector<8x128xbf16>, vector<128x32xbf16>, vector<8x32xf32> -> vector<8x32xf32>
    %c0_22 = arith.constant 0 : index
    %c0_23 = arith.constant 0 : index
    %c0_24 = arith.constant 0 : index
    %39 = vector.load %arg7[%c0_22, %c0_23, %c0_24] : memref<4x1x32xf32, #tpu.memory_space<vmem>>, vector<1x1x32xf32>
    %40 = vector.shape_cast %39 : vector<1x1x32xf32> to vector<1x32xf32>
    %41 = vector.broadcast %40 : vector<1x32xf32> to vector<8x32xf32>
    %42 = arith.addf %38, %41 : vector<8x32xf32>
    %c0_25 = arith.constant 0 : index
    %c0_26 = arith.constant 0 : index
    %c0_27 = arith.constant 0 : index
    %43 = vector.load %arg8[%c0_25, %c0_26, %c0_27] : memref<4x128x32xbf16, #tpu.memory_space<vmem>>, vector<1x128x32xbf16>
    %44 = vector.shape_cast %43 : vector<1x128x32xbf16> to vector<128x32xbf16>
    %cst_28 = arith.constant dense<0.000000e+00> : vector<8x32xf32>
    %45 = tpu.matmul %27, %44, %cst_28 {dimension_numbers = #tpu.dot_dimension_numbers<[1], [0], [0], [1], [0, 0, 1, 1], [], []>} : vector<8x128xbf16>, vector<128x32xbf16>, vector<8x32xf32> -> vector<8x32xf32>
    %c0_29 = arith.constant 0 : index
    %c0_30 = arith.constant 0 : index
    %c0_31 = arith.constant 0 : index
    %46 = vector.load %arg9[%c0_29, %c0_30, %c0_31] : memref<4x1x32xf32, #tpu.memory_space<vmem>>, vector<1x1x32xf32>
    %47 = vector.shape_cast %46 : vector<1x1x32xf32> to vector<1x32xf32>
    %48 = vector.broadcast %47 : vector<1x32xf32> to vector<8x32xf32>
    %49 = arith.addf %45, %48 : vector<8x32xf32>
    %50 = arith.truncf %35 : vector<8x32xf32> to vector<8x32xbf16>
    %51 = arith.truncf %42 : vector<8x32xf32> to vector<8x32xbf16>
    %cst_32 = arith.constant dense<0.000000e+00> : vector<8x8xf32>
    %52 = tpu.matmul %50, %51, %cst_32 {dimension_numbers = #tpu.dot_dimension_numbers<[1], [1], [0], [0], [0, 0, 1, 0], [], []>} : vector<8x32xbf16>, vector<8x32xbf16>, vector<8x8xf32> -> vector<8x8xf32>
    %cst_33 = arith.constant 0.176776692 : f32
    %53 = vector.broadcast %cst_33 : f32 to vector<8x8xf32>
    %54 = arith.mulf %52, %53 : vector<8x8xf32>
    %cst_34 = arith.constant dense<0xFF800000> : vector<8xf32>
    %55 = vector.multi_reduction <maximumf>, %54, %cst_34 [1] : vector<8x8xf32> to vector<8xf32>
    %56 = vector.shape_cast %55 : vector<8xf32> to vector<8x1xf32>
    %57 = vector.broadcast %56 : vector<8x1xf32> to vector<8x8xf32>
    %58 = arith.subf %54, %57 : vector<8x8xf32>
    %59 = math.exp %58 : vector<8x8xf32>
    %cst_35 = arith.constant dense<0.000000e+00> : vector<8xf32>
    %60 = vector.multi_reduction <add>, %59, %cst_35 [1] : vector<8x8xf32> to vector<8xf32>
    %61 = vector.shape_cast %60 : vector<8xf32> to vector<8x1xf32>
    %62 = tpu.reciprocal %61 {approx = true} : vector<8x1xf32> -> vector<8x1xf32>
    %63 = vector.broadcast %62 : vector<8x1xf32> to vector<8x8xf32>
    %64 = arith.mulf %59, %63 : vector<8x8xf32>
    %65 = arith.truncf %64 : vector<8x8xf32> to vector<8x8xbf16>
    %66 = arith.truncf %49 : vector<8x32xf32> to vector<8x32xbf16>
    %cst_36 = arith.constant dense<0.000000e+00> : vector<8x32xf32>
    %67 = tpu.matmul %65, %66, %cst_36 {dimension_numbers = #tpu.dot_dimension_numbers<[1], [0], [0], [1], [0, 0, 1, 1], [], []>} : vector<8x8xbf16>, vector<8x32xbf16>, vector<8x32xf32> -> vector<8x32xf32>
    %68 = arith.truncf %67 : vector<8x32xf32> to vector<8x32xbf16>
    %c0_37 = arith.constant 0 : index
    %c0_38 = arith.constant 0 : index
    %c0_39 = arith.constant 0 : index
    %69 = vector.load %arg10[%c0_37, %c0_38, %c0_39] : memref<4x32x128xbf16, #tpu.memory_space<vmem>>, vector<1x32x128xbf16>
    %70 = vector.shape_cast %69 : vector<1x32x128xbf16> to vector<32x128xbf16>
    %cst_40 = arith.constant dense<0.000000e+00> : vector<8x128xf32>
    %71 = tpu.matmul %68, %70, %cst_40 {dimension_numbers = #tpu.dot_dimension_numbers<[1], [0], [0], [1], [0, 0, 1, 1], [], []>} : vector<8x32xbf16>, vector<32x128xbf16>, vector<8x128xf32> -> vector<8x128xf32>
    %72 = arith.addf %28, %71 : vector<8x128xf32>
    %c1 = arith.constant 1 : index
    %c0_41 = arith.constant 0 : index
    %c0_42 = arith.constant 0 : index
    %73 = vector.load %arg4[%c1, %c0_41, %c0_42] : memref<4x128x32xbf16, #tpu.memory_space<vmem>>, vector<1x128x32xbf16>
    %74 = vector.shape_cast %73 : vector<1x128x32xbf16> to vector<128x32xbf16>
    %cst_43 = arith.constant dense<0.000000e+00> : vector<8x32xf32>
    %75 = tpu.matmul %27, %74, %cst_43 {dimension_numbers = #tpu.dot_dimension_numbers<[1], [0], [0], [1], [0, 0, 1, 1], [], []>} : vector<8x128xbf16>, vector<128x32xbf16>, vector<8x32xf32> -> vector<8x32xf32>
    %c1_44 = arith.constant 1 : index
    %c0_45 = arith.constant 0 : index
    %c0_46 = arith.constant 0 : index
    %76 = vector.load %arg5[%c1_44, %c0_45, %c0_46] : memref<4x1x32xf32, #tpu.memory_space<vmem>>, vector<1x1x32xf32>
    %77 = vector.shape_cast %76 : vector<1x1x32xf32> to vector<1x32xf32>
    %78 = vector.broadcast %77 : vector<1x32xf32> to vector<8x32xf32>
    %79 = arith.addf %75, %78 : vector<8x32xf32>
    %c1_47 = arith.constant 1 : index
    %c0_48 = arith.constant 0 : index
    %c0_49 = arith.constant 0 : index
    %80 = vector.load %arg6[%c1_47, %c0_48, %c0_49] : memref<4x128x32xbf16, #tpu.memory_space<vmem>>, vector<1x128x32xbf16>
    %81 = vector.shape_cast %80 : vector<1x128x32xbf16> to vector<128x32xbf16>
    %cst_50 = arith.constant dense<0.000000e+00> : vector<8x32xf32>
    %82 = tpu.matmul %27, %81, %cst_50 {dimension_numbers = #tpu.dot_dimension_numbers<[1], [0], [0], [1], [0, 0, 1, 1], [], []>} : vector<8x128xbf16>, vector<128x32xbf16>, vector<8x32xf32> -> vector<8x32xf32>
    %c1_51 = arith.constant 1 : index
    %c0_52 = arith.constant 0 : index
    %c0_53 = arith.constant 0 : index
    %83 = vector.load %arg7[%c1_51, %c0_52, %c0_53] : memref<4x1x32xf32, #tpu.memory_space<vmem>>, vector<1x1x32xf32>
    %84 = vector.shape_cast %83 : vector<1x1x32xf32> to vector<1x32xf32>
    %85 = vector.broadcast %84 : vector<1x32xf32> to vector<8x32xf32>
    %86 = arith.addf %82, %85 : vector<8x32xf32>
    %c1_54 = arith.constant 1 : index
    %c0_55 = arith.constant 0 : index
    %c0_56 = arith.constant 0 : index
    %87 = vector.load %arg8[%c1_54, %c0_55, %c0_56] : memref<4x128x32xbf16, #tpu.memory_space<vmem>>, vector<1x128x32xbf16>
    %88 = vector.shape_cast %87 : vector<1x128x32xbf16> to vector<128x32xbf16>
    %cst_57 = arith.constant dense<0.000000e+00> : vector<8x32xf32>
    %89 = tpu.matmul %27, %88, %cst_57 {dimension_numbers = #tpu.dot_dimension_numbers<[1], [0], [0], [1], [0, 0, 1, 1], [], []>} : vector<8x128xbf16>, vector<128x32xbf16>, vector<8x32xf32> -> vector<8x32xf32>
    %c1_58 = arith.constant 1 : index
    %c0_59 = arith.constant 0 : index
    %c0_60 = arith.constant 0 : index
    %90 = vector.load %arg9[%c1_58, %c0_59, %c0_60] : memref<4x1x32xf32, #tpu.memory_space<vmem>>, vector<1x1x32xf32>
    %91 = vector.shape_cast %90 : vector<1x1x32xf32> to vector<1x32xf32>
    %92 = vector.broadcast %91 : vector<1x32xf32> to vector<8x32xf32>
    %93 = arith.addf %89, %92 : vector<8x32xf32>
    %94 = arith.truncf %79 : vector<8x32xf32> to vector<8x32xbf16>
    %95 = arith.truncf %86 : vector<8x32xf32> to vector<8x32xbf16>
    %cst_61 = arith.constant dense<0.000000e+00> : vector<8x8xf32>
    %96 = tpu.matmul %94, %95, %cst_61 {dimension_numbers = #tpu.dot_dimension_numbers<[1], [1], [0], [0], [0, 0, 1, 0], [], []>} : vector<8x32xbf16>, vector<8x32xbf16>, vector<8x8xf32> -> vector<8x8xf32>
    %cst_62 = arith.constant 0.176776692 : f32
    %97 = vector.broadcast %cst_62 : f32 to vector<8x8xf32>
    %98 = arith.mulf %96, %97 : vector<8x8xf32>
    %cst_63 = arith.constant dense<0xFF800000> : vector<8xf32>
    %99 = vector.multi_reduction <maximumf>, %98, %cst_63 [1] : vector<8x8xf32> to vector<8xf32>
    %100 = vector.shape_cast %99 : vector<8xf32> to vector<8x1xf32>
    %101 = vector.broadcast %100 : vector<8x1xf32> to vector<8x8xf32>
    %102 = arith.subf %98, %101 : vector<8x8xf32>
    %103 = math.exp %102 : vector<8x8xf32>
    %cst_64 = arith.constant dense<0.000000e+00> : vector<8xf32>
    %104 = vector.multi_reduction <add>, %103, %cst_64 [1] : vector<8x8xf32> to vector<8xf32>
    %105 = vector.shape_cast %104 : vector<8xf32> to vector<8x1xf32>
    %106 = tpu.reciprocal %105 {approx = true} : vector<8x1xf32> -> vector<8x1xf32>
    %107 = vector.broadcast %106 : vector<8x1xf32> to vector<8x8xf32>
    %108 = arith.mulf %103, %107 : vector<8x8xf32>
    %109 = arith.truncf %108 : vector<8x8xf32> to vector<8x8xbf16>
    %110 = arith.truncf %93 : vector<8x32xf32> to vector<8x32xbf16>
    %cst_65 = arith.constant dense<0.000000e+00> : vector<8x32xf32>
    %111 = tpu.matmul %109, %110, %cst_65 {dimension_numbers = #tpu.dot_dimension_numbers<[1], [0], [0], [1], [0, 0, 1, 1], [], []>} : vector<8x8xbf16>, vector<8x32xbf16>, vector<8x32xf32> -> vector<8x32xf32>
    %112 = arith.truncf %111 : vector<8x32xf32> to vector<8x32xbf16>
    %c1_66 = arith.constant 1 : index
    %c0_67 = arith.constant 0 : index
    %c0_68 = arith.constant 0 : index
    %113 = vector.load %arg10[%c1_66, %c0_67, %c0_68] : memref<4x32x128xbf16, #tpu.memory_space<vmem>>, vector<1x32x128xbf16>
    %114 = vector.shape_cast %113 : vector<1x32x128xbf16> to vector<32x128xbf16>
    %cst_69 = arith.constant dense<0.000000e+00> : vector<8x128xf32>
    %115 = tpu.matmul %112, %114, %cst_69 {dimension_numbers = #tpu.dot_dimension_numbers<[1], [0], [0], [1], [0, 0, 1, 1], [], []>} : vector<8x32xbf16>, vector<32x128xbf16>, vector<8x128xf32> -> vector<8x128xf32>
    %116 = arith.addf %72, %115 : vector<8x128xf32>
    %c2 = arith.constant 2 : index
    %c0_70 = arith.constant 0 : index
    %c0_71 = arith.constant 0 : index
    %117 = vector.load %arg4[%c2, %c0_70, %c0_71] : memref<4x128x32xbf16, #tpu.memory_space<vmem>>, vector<1x128x32xbf16>
    %118 = vector.shape_cast %117 : vector<1x128x32xbf16> to vector<128x32xbf16>
    %cst_72 = arith.constant dense<0.000000e+00> : vector<8x32xf32>
    %119 = tpu.matmul %27, %118, %cst_72 {dimension_numbers = #tpu.dot_dimension_numbers<[1], [0], [0], [1], [0, 0, 1, 1], [], []>} : vector<8x128xbf16>, vector<128x32xbf16>, vector<8x32xf32> -> vector<8x32xf32>
    %c2_73 = arith.constant 2 : index
    %c0_74 = arith.constant 0 : index
    %c0_75 = arith.constant 0 : index
    %120 = vector.load %arg5[%c2_73, %c0_74, %c0_75] : memref<4x1x32xf32, #tpu.memory_space<vmem>>, vector<1x1x32xf32>
    %121 = vector.shape_cast %120 : vector<1x1x32xf32> to vector<1x32xf32>
    %122 = vector.broadcast %121 : vector<1x32xf32> to vector<8x32xf32>
    %123 = arith.addf %119, %122 : vector<8x32xf32>
    %c2_76 = arith.constant 2 : index
    %c0_77 = arith.constant 0 : index
    %c0_78 = arith.constant 0 : index
    %124 = vector.load %arg6[%c2_76, %c0_77, %c0_78] : memref<4x128x32xbf16, #tpu.memory_space<vmem>>, vector<1x128x32xbf16>
    %125 = vector.shape_cast %124 : vector<1x128x32xbf16> to vector<128x32xbf16>
    %cst_79 = arith.constant dense<0.000000e+00> : vector<8x32xf32>
    %126 = tpu.matmul %27, %125, %cst_79 {dimension_numbers = #tpu.dot_dimension_numbers<[1], [0], [0], [1], [0, 0, 1, 1], [], []>} : vector<8x128xbf16>, vector<128x32xbf16>, vector<8x32xf32> -> vector<8x32xf32>
    %c2_80 = arith.constant 2 : index
    %c0_81 = arith.constant 0 : index
    %c0_82 = arith.constant 0 : index
    %127 = vector.load %arg7[%c2_80, %c0_81, %c0_82] : memref<4x1x32xf32, #tpu.memory_space<vmem>>, vector<1x1x32xf32>
    %128 = vector.shape_cast %127 : vector<1x1x32xf32> to vector<1x32xf32>
    %129 = vector.broadcast %128 : vector<1x32xf32> to vector<8x32xf32>
    %130 = arith.addf %126, %129 : vector<8x32xf32>
    %c2_83 = arith.constant 2 : index
    %c0_84 = arith.constant 0 : index
    %c0_85 = arith.constant 0 : index
    %131 = vector.load %arg8[%c2_83, %c0_84, %c0_85] : memref<4x128x32xbf16, #tpu.memory_space<vmem>>, vector<1x128x32xbf16>
    %132 = vector.shape_cast %131 : vector<1x128x32xbf16> to vector<128x32xbf16>
    %cst_86 = arith.constant dense<0.000000e+00> : vector<8x32xf32>
    %133 = tpu.matmul %27, %132, %cst_86 {dimension_numbers = #tpu.dot_dimension_numbers<[1], [0], [0], [1], [0, 0, 1, 1], [], []>} : vector<8x128xbf16>, vector<128x32xbf16>, vector<8x32xf32> -> vector<8x32xf32>
    %c2_87 = arith.constant 2 : index
    %c0_88 = arith.constant 0 : index
    %c0_89 = arith.constant 0 : index
    %134 = vector.load %arg9[%c2_87, %c0_88, %c0_89] : memref<4x1x32xf32, #tpu.memory_space<vmem>>, vector<1x1x32xf32>
    %135 = vector.shape_cast %134 : vector<1x1x32xf32> to vector<1x32xf32>
    %136 = vector.broadcast %135 : vector<1x32xf32> to vector<8x32xf32>
    %137 = arith.addf %133, %136 : vector<8x32xf32>
    %138 = arith.truncf %123 : vector<8x32xf32> to vector<8x32xbf16>
    %139 = arith.truncf %130 : vector<8x32xf32> to vector<8x32xbf16>
    %cst_90 = arith.constant dense<0.000000e+00> : vector<8x8xf32>
    %140 = tpu.matmul %138, %139, %cst_90 {dimension_numbers = #tpu.dot_dimension_numbers<[1], [1], [0], [0], [0, 0, 1, 0], [], []>} : vector<8x32xbf16>, vector<8x32xbf16>, vector<8x8xf32> -> vector<8x8xf32>
    %cst_91 = arith.constant 0.176776692 : f32
    %141 = vector.broadcast %cst_91 : f32 to vector<8x8xf32>
    %142 = arith.mulf %140, %141 : vector<8x8xf32>
    %cst_92 = arith.constant dense<0xFF800000> : vector<8xf32>
    %143 = vector.multi_reduction <maximumf>, %142, %cst_92 [1] : vector<8x8xf32> to vector<8xf32>
    %144 = vector.shape_cast %143 : vector<8xf32> to vector<8x1xf32>
    %145 = vector.broadcast %144 : vector<8x1xf32> to vector<8x8xf32>
    %146 = arith.subf %142, %145 : vector<8x8xf32>
    %147 = math.exp %146 : vector<8x8xf32>
    %cst_93 = arith.constant dense<0.000000e+00> : vector<8xf32>
    %148 = vector.multi_reduction <add>, %147, %cst_93 [1] : vector<8x8xf32> to vector<8xf32>
    %149 = vector.shape_cast %148 : vector<8xf32> to vector<8x1xf32>
    %150 = tpu.reciprocal %149 {approx = true} : vector<8x1xf32> -> vector<8x1xf32>
    %151 = vector.broadcast %150 : vector<8x1xf32> to vector<8x8xf32>
    %152 = arith.mulf %147, %151 : vector<8x8xf32>
    %153 = arith.truncf %152 : vector<8x8xf32> to vector<8x8xbf16>
    %154 = arith.truncf %137 : vector<8x32xf32> to vector<8x32xbf16>
    %cst_94 = arith.constant dense<0.000000e+00> : vector<8x32xf32>
    %155 = tpu.matmul %153, %154, %cst_94 {dimension_numbers = #tpu.dot_dimension_numbers<[1], [0], [0], [1], [0, 0, 1, 1], [], []>} : vector<8x8xbf16>, vector<8x32xbf16>, vector<8x32xf32> -> vector<8x32xf32>
    %156 = arith.truncf %155 : vector<8x32xf32> to vector<8x32xbf16>
    %c2_95 = arith.constant 2 : index
    %c0_96 = arith.constant 0 : index
    %c0_97 = arith.constant 0 : index
    %157 = vector.load %arg10[%c2_95, %c0_96, %c0_97] : memref<4x32x128xbf16, #tpu.memory_space<vmem>>, vector<1x32x128xbf16>
    %158 = vector.shape_cast %157 : vector<1x32x128xbf16> to vector<32x128xbf16>
    %cst_98 = arith.constant dense<0.000000e+00> : vector<8x128xf32>
    %159 = tpu.matmul %156, %158, %cst_98 {dimension_numbers = #tpu.dot_dimension_numbers<[1], [0], [0], [1], [0, 0, 1, 1], [], []>} : vector<8x32xbf16>, vector<32x128xbf16>, vector<8x128xf32> -> vector<8x128xf32>
    %160 = arith.addf %116, %159 : vector<8x128xf32>
    %c3 = arith.constant 3 : index
    %c0_99 = arith.constant 0 : index
    %c0_100 = arith.constant 0 : index
    %161 = vector.load %arg4[%c3, %c0_99, %c0_100] : memref<4x128x32xbf16, #tpu.memory_space<vmem>>, vector<1x128x32xbf16>
    %162 = vector.shape_cast %161 : vector<1x128x32xbf16> to vector<128x32xbf16>
    %cst_101 = arith.constant dense<0.000000e+00> : vector<8x32xf32>
    %163 = tpu.matmul %27, %162, %cst_101 {dimension_numbers = #tpu.dot_dimension_numbers<[1], [0], [0], [1], [0, 0, 1, 1], [], []>} : vector<8x128xbf16>, vector<128x32xbf16>, vector<8x32xf32> -> vector<8x32xf32>
    %c3_102 = arith.constant 3 : index
    %c0_103 = arith.constant 0 : index
    %c0_104 = arith.constant 0 : index
    %164 = vector.load %arg5[%c3_102, %c0_103, %c0_104] : memref<4x1x32xf32, #tpu.memory_space<vmem>>, vector<1x1x32xf32>
    %165 = vector.shape_cast %164 : vector<1x1x32xf32> to vector<1x32xf32>
    %166 = vector.broadcast %165 : vector<1x32xf32> to vector<8x32xf32>
    %167 = arith.addf %163, %166 : vector<8x32xf32>
    %c3_105 = arith.constant 3 : index
    %c0_106 = arith.constant 0 : index
    %c0_107 = arith.constant 0 : index
    %168 = vector.load %arg6[%c3_105, %c0_106, %c0_107] : memref<4x128x32xbf16, #tpu.memory_space<vmem>>, vector<1x128x32xbf16>
    %169 = vector.shape_cast %168 : vector<1x128x32xbf16> to vector<128x32xbf16>
    %cst_108 = arith.constant dense<0.000000e+00> : vector<8x32xf32>
    %170 = tpu.matmul %27, %169, %cst_108 {dimension_numbers = #tpu.dot_dimension_numbers<[1], [0], [0], [1], [0, 0, 1, 1], [], []>} : vector<8x128xbf16>, vector<128x32xbf16>, vector<8x32xf32> -> vector<8x32xf32>
    %c3_109 = arith.constant 3 : index
    %c0_110 = arith.constant 0 : index
    %c0_111 = arith.constant 0 : index
    %171 = vector.load %arg7[%c3_109, %c0_110, %c0_111] : memref<4x1x32xf32, #tpu.memory_space<vmem>>, vector<1x1x32xf32>
    %172 = vector.shape_cast %171 : vector<1x1x32xf32> to vector<1x32xf32>
    %173 = vector.broadcast %172 : vector<1x32xf32> to vector<8x32xf32>
    %174 = arith.addf %170, %173 : vector<8x32xf32>
    %c3_112 = arith.constant 3 : index
    %c0_113 = arith.constant 0 : index
    %c0_114 = arith.constant 0 : index
    %175 = vector.load %arg8[%c3_112, %c0_113, %c0_114] : memref<4x128x32xbf16, #tpu.memory_space<vmem>>, vector<1x128x32xbf16>
    %176 = vector.shape_cast %175 : vector<1x128x32xbf16> to vector<128x32xbf16>
    %cst_115 = arith.constant dense<0.000000e+00> : vector<8x32xf32>
    %177 = tpu.matmul %27, %176, %cst_115 {dimension_numbers = #tpu.dot_dimension_numbers<[1], [0], [0], [1], [0, 0, 1, 1], [], []>} : vector<8x128xbf16>, vector<128x32xbf16>, vector<8x32xf32> -> vector<8x32xf32>
    %c3_116 = arith.constant 3 : index
    %c0_117 = arith.constant 0 : index
    %c0_118 = arith.constant 0 : index
    %178 = vector.load %arg9[%c3_116, %c0_117, %c0_118] : memref<4x1x32xf32, #tpu.memory_space<vmem>>, vector<1x1x32xf32>
    %179 = vector.shape_cast %178 : vector<1x1x32xf32> to vector<1x32xf32>
    %180 = vector.broadcast %179 : vector<1x32xf32> to vector<8x32xf32>
    %181 = arith.addf %177, %180 : vector<8x32xf32>
    %182 = arith.truncf %167 : vector<8x32xf32> to vector<8x32xbf16>
    %183 = arith.truncf %174 : vector<8x32xf32> to vector<8x32xbf16>
    %cst_119 = arith.constant dense<0.000000e+00> : vector<8x8xf32>
    %184 = tpu.matmul %182, %183, %cst_119 {dimension_numbers = #tpu.dot_dimension_numbers<[1], [1], [0], [0], [0, 0, 1, 0], [], []>} : vector<8x32xbf16>, vector<8x32xbf16>, vector<8x8xf32> -> vector<8x8xf32>
    %cst_120 = arith.constant 0.176776692 : f32
    %185 = vector.broadcast %cst_120 : f32 to vector<8x8xf32>
    %186 = arith.mulf %184, %185 : vector<8x8xf32>
    %cst_121 = arith.constant dense<0xFF800000> : vector<8xf32>
    %187 = vector.multi_reduction <maximumf>, %186, %cst_121 [1] : vector<8x8xf32> to vector<8xf32>
    %188 = vector.shape_cast %187 : vector<8xf32> to vector<8x1xf32>
    %189 = vector.broadcast %188 : vector<8x1xf32> to vector<8x8xf32>
    %190 = arith.subf %186, %189 : vector<8x8xf32>
    %191 = math.exp %190 : vector<8x8xf32>
    %cst_122 = arith.constant dense<0.000000e+00> : vector<8xf32>
    %192 = vector.multi_reduction <add>, %191, %cst_122 [1] : vector<8x8xf32> to vector<8xf32>
    %193 = vector.shape_cast %192 : vector<8xf32> to vector<8x1xf32>
    %194 = tpu.reciprocal %193 {approx = true} : vector<8x1xf32> -> vector<8x1xf32>
    %195 = vector.broadcast %194 : vector<8x1xf32> to vector<8x8xf32>
    %196 = arith.mulf %191, %195 : vector<8x8xf32>
    %197 = arith.truncf %196 : vector<8x8xf32> to vector<8x8xbf16>
    %198 = arith.truncf %181 : vector<8x32xf32> to vector<8x32xbf16>
    %cst_123 = arith.constant dense<0.000000e+00> : vector<8x32xf32>
    %199 = tpu.matmul %197, %198, %cst_123 {dimension_numbers = #tpu.dot_dimension_numbers<[1], [0], [0], [1], [0, 0, 1, 1], [], []>} : vector<8x8xbf16>, vector<8x32xbf16>, vector<8x32xf32> -> vector<8x32xf32>
    %200 = arith.truncf %199 : vector<8x32xf32> to vector<8x32xbf16>
    %c3_124 = arith.constant 3 : index
    %c0_125 = arith.constant 0 : index
    %c0_126 = arith.constant 0 : index
    %201 = vector.load %arg10[%c3_124, %c0_125, %c0_126] : memref<4x32x128xbf16, #tpu.memory_space<vmem>>, vector<1x32x128xbf16>
    %202 = vector.shape_cast %201 : vector<1x32x128xbf16> to vector<32x128xbf16>
    %cst_127 = arith.constant dense<0.000000e+00> : vector<8x128xf32>
    %203 = tpu.matmul %200, %202, %cst_127 {dimension_numbers = #tpu.dot_dimension_numbers<[1], [0], [0], [1], [0, 0, 1, 1], [], []>} : vector<8x32xbf16>, vector<32x128xbf16>, vector<8x128xf32> -> vector<8x128xf32>
    %204 = arith.addf %160, %203 : vector<8x128xf32>
    %205 = arith.addf %2, %204 : vector<8x128xf32>
    %c0_128 = arith.constant 0 : index
    %c0_129 = arith.constant 0 : index
    %206 = vector.load %arg11[%c0_128, %c0_129] : memref<1x128xf32, #tpu.memory_space<vmem>>, vector<1x128xf32>
    %207 = vector.broadcast %206 : vector<1x128xf32> to vector<8x128xf32>
    %208 = arith.addf %205, %207 : vector<8x128xf32>
    %209 = arith.truncf %208 : vector<8x128xf32> to vector<8x128xbf16>
    %c0_130 = arith.constant 0 : index
    %c0_131 = arith.constant 0 : index
    %c0_132 = arith.constant 0 : index
    %210 = vector.load %arg12[%c0_130, %c0_131, %c0_132] : memref<1x8x128xbf16, #tpu.memory_space<vmem>>, vector<1x8x128xbf16>
    %211 = vector.shape_cast %210 : vector<1x8x128xbf16> to vector<8x128xbf16>
    %212 = vector.shape_cast %209 : vector<8x128xbf16> to vector<1x8x128xbf16>
    tpu.vector_store %arg12[%c0_130, %c0_131, %c0_132], %212 {strides = array<i32>} : memref<1x8x128xbf16, #tpu.memory_space<vmem>>, vector<1x8x128xbf16>,
    return
  }
  func.func @transform_0(%arg0: i32) -> (i32, i32, i32) {
    %c0_i32 = arith.constant 0 : i32
    %c0_i32_0 = arith.constant 0 : i32
    %c0_i32_1 = arith.constant 0 : i32
    return %arg0, %c0_i32, %c0_i32_0 : i32, i32, i32
  }
  func.func @transform_1(%arg0: i32) -> (i32, i32) {
    %c0_i32 = arith.constant 0 : i32
    %c0_i32_0 = arith.constant 0 : i32
    %c0_i32_1 = arith.constant 0 : i32
    return %c0_i32, %c0_i32_0 : i32, i32
  }
  func.func @transform_2(%arg0: i32) -> (i32, i32) {
    %c0_i32 = arith.constant 0 : i32
    %c0_i32_0 = arith.constant 0 : i32
    %c0_i32_1 = arith.constant 0 : i32
    return %c0_i32, %c0_i32_0 : i32, i32
  }
  func.func @transform_3(%arg0: i32) -> (i32, i32, i32) {
    %c0_i32 = arith.constant 0 : i32
    %c0_i32_0 = arith.constant 0 : i32
    %c0_i32_1 = arith.constant 0 : i32
    %c0_i32_2 = arith.constant 0 : i32
    return %c0_i32, %c0_i32_0, %c0_i32_1 : i32, i32, i32
  }
  func.func @transform_4(%arg0: i32) -> (i32, i32, i32) {
    %c0_i32 = arith.constant 0 : i32
    %c0_i32_0 = arith.constant 0 : i32
    %c0_i32_1 = arith.constant 0 : i32
    %c0_i32_2 = arith.constant 0 : i32
    return %c0_i32, %c0_i32_0, %c0_i32_1 : i32, i32, i32
  }
  func.func @transform_5(%arg0: i32) -> (i32, i32, i32) {
    %c0_i32 = arith.constant 0 : i32
    %c0_i32_0 = arith.constant 0 : i32
    %c0_i32_1 = arith.constant 0 : i32
    %c0_i32_2 = arith.constant 0 : i32
    return %c0_i32, %c0_i32_0, %c0_i32_1 : i32, i32, i32
  }
  func.func @transform_6(%arg0: i32) -> (i32, i32, i32) {
    %c0_i32 = arith.constant 0 : i32
    %c0_i32_0 = arith.constant 0 : i32
    %c0_i32_1 = arith.constant 0 : i32
    %c0_i32_2 = arith.constant 0 : i32
    return %c0_i32, %c0_i32_0, %c0_i32_1 : i32, i32, i32
  }
  func.func @transform_7(%arg0: i32) -> (i32, i32, i32) {
    %c0_i32 = arith.constant 0 : i32
    %c0_i32_0 = arith.constant 0 : i32
    %c0_i32_1 = arith.constant 0 : i32
    %c0_i32_2 = arith.constant 0 : i32
    return %c0_i32, %c0_i32_0, %c0_i32_1 : i32, i32, i32
  }
  func.func @transform_8(%arg0: i32) -> (i32, i32, i32) {
    %c0_i32 = arith.constant 0 : i32
    %c0_i32_0 = arith.constant 0 : i32
    %c0_i32_1 = arith.constant 0 : i32
    %c0_i32_2 = arith.constant 0 : i32
    return %c0_i32, %c0_i32_0, %c0_i32_1 : i32, i32, i32
  }
  func.func @transform_9(%arg0: i32) -> (i32, i32, i32) {
    %c0_i32 = arith.constant 0 : i32
    %c0_i32_0 = arith.constant 0 : i32
    %c0_i32_1 = arith.constant 0 : i32
    %c0_i32_2 = arith.constant 0 : i32
    return %c0_i32, %c0_i32_0, %c0_i32_1 : i32, i32, i32
  }
  func.func @transform_10(%arg0: i32) -> (i32, i32) {
    %c0_i32 = arith.constant 0 : i32
    %c0_i32_0 = arith.constant 0 : i32
    %c0_i32_1 = arith.constant 0 : i32
    return %c0_i32, %c0_i32_0 : i32, i32
  }
  func.func @transform_11(%arg0: i32) -> (i32, i32, i32) {
    %c0_i32 = arith.constant 0 : i32
    %c0_i32_0 = arith.constant 0 : i32
    %c0_i32_1 = arith.constant 0 : i32
    return %arg0, %c0_i32, %c0_i32_0 : i32, i32, i32
  }
}

module attributes {stable_mosaic.version = 11 : i64} {
  func.func @_ff_kernel(%arg0: i32, %arg1: memref<8x128xbf16, #tpu.memory_space<vmem>>, %arg2: memref<1x128xf32, #tpu.memory_space<vmem>>, %arg3: memref<1x128xf32, #tpu.memory_space<vmem>>, %arg4: memref<128x512xbf16, #tpu.memory_space<vmem>>, %arg5: memref<1x512xf32, #tpu.memory_space<vmem>>, %arg6: memref<512x128xbf16, #tpu.memory_space<vmem>>, %arg7: memref<1x128xf32, #tpu.memory_space<vmem>>, %arg8: memref<8x128xbf16, #tpu.memory_space<vmem>>) attributes {dimension_semantics = [#tpu.dimension_semantics<parallel>], iteration_bounds = array<i64: 2>, scalar_prefetch = 0 : i64, scratch_operands = 0 : i64, tpu.core_type = #tpu.core_type<tc>, window_params = [{transform_indices = @transform_0, window_bounds = array<i64: 8, 128>}, {pipeline_mode = #tpu.pipeline_mode<synchronous>, transform_indices = @transform_1, window_bounds = array<i64: 1, 128>}, {pipeline_mode = #tpu.pipeline_mode<synchronous>, transform_indices = @transform_2, window_bounds = array<i64: 1, 128>}, {pipeline_mode = #tpu.pipeline_mode<synchronous>, transform_indices = @transform_3, window_bounds = array<i64: 128, 512>}, {pipeline_mode = #tpu.pipeline_mode<synchronous>, transform_indices = @transform_4, window_bounds = array<i64: 1, 512>}, {pipeline_mode = #tpu.pipeline_mode<synchronous>, transform_indices = @transform_5, window_bounds = array<i64: 512, 128>}, {pipeline_mode = #tpu.pipeline_mode<synchronous>, transform_indices = @transform_6, window_bounds = array<i64: 1, 128>}, {transform_indices = @transform_7, window_bounds = array<i64: 8, 128>}]} {
    %c0 = arith.constant 0 : index
    %c0_0 = arith.constant 0 : index
    %0 = vector.load %arg1[%c0, %c0_0] : memref<8x128xbf16, #tpu.memory_space<vmem>>, vector<8x128xbf16>
    %1 = arith.extf %0 : vector<8x128xbf16> to vector<8x128xf32>
    %cst = arith.constant dense<0.000000e+00> : vector<8xf32>
    %2 = vector.multi_reduction <add>, %1, %cst [1] : vector<8x128xf32> to vector<8xf32>
    %3 = vector.shape_cast %2 : vector<8xf32> to vector<8x1xf32>
    %cst_1 = arith.constant 1.280000e+02 : f32
    %4 = vector.broadcast %cst_1 : f32 to vector<8x1xf32>
    %5 = arith.divf %3, %4 : vector<8x1xf32>
    %6 = vector.broadcast %5 : vector<8x1xf32> to vector<8x128xf32>
    %7 = arith.subf %1, %6 : vector<8x128xf32>
    %8 = arith.mulf %7, %7 : vector<8x128xf32>
    %cst_2 = arith.constant dense<0.000000e+00> : vector<8xf32>
    %9 = vector.multi_reduction <add>, %8, %cst_2 [1] : vector<8x128xf32> to vector<8xf32>
    %10 = vector.shape_cast %9 : vector<8xf32> to vector<8x1xf32>
    %cst_3 = arith.constant 1.280000e+02 : f32
    %11 = vector.broadcast %cst_3 : f32 to vector<8x1xf32>
    %12 = arith.divf %10, %11 : vector<8x1xf32>
    %13 = vector.broadcast %5 : vector<8x1xf32> to vector<8x128xf32>
    %14 = arith.subf %1, %13 : vector<8x128xf32>
    %cst_4 = arith.constant 9.99999974E-6 : f32
    %15 = vector.broadcast %cst_4 : f32 to vector<8x1xf32>
    %16 = arith.addf %12, %15 : vector<8x1xf32>
    %17 = math.rsqrt %16 : vector<8x1xf32>
    %18 = vector.broadcast %17 : vector<8x1xf32> to vector<8x128xf32>
    %19 = arith.mulf %14, %18 : vector<8x128xf32>
    %c0_5 = arith.constant 0 : index
    %c0_6 = arith.constant 0 : index
    %20 = vector.load %arg2[%c0_5, %c0_6] : memref<1x128xf32, #tpu.memory_space<vmem>>, vector<1x128xf32>
    %21 = vector.broadcast %20 : vector<1x128xf32> to vector<8x128xf32>
    %22 = arith.mulf %19, %21 : vector<8x128xf32>
    %c0_7 = arith.constant 0 : index
    %c0_8 = arith.constant 0 : index
    %23 = vector.load %arg3[%c0_7, %c0_8] : memref<1x128xf32, #tpu.memory_space<vmem>>, vector<1x128xf32>
    %24 = vector.broadcast %23 : vector<1x128xf32> to vector<8x128xf32>
    %25 = arith.addf %22, %24 : vector<8x128xf32>
    %26 = arith.truncf %25 : vector<8x128xf32> to vector<8x128xbf16>
    %c0_9 = arith.constant 0 : index
    %c0_10 = arith.constant 0 : index
    %27 = vector.load %arg4[%c0_9, %c0_10] : memref<128x512xbf16, #tpu.memory_space<vmem>>, vector<128x512xbf16>
    %cst_11 = arith.constant dense<0.000000e+00> : vector<8x512xf32>
    %28 = tpu.matmul %26, %27, %cst_11 {dimension_numbers = #tpu.dot_dimension_numbers<[1], [0], [0], [1], [0, 0, 1, 1], [], []>} : vector<8x128xbf16>, vector<128x512xbf16>, vector<8x512xf32> -> vector<8x512xf32>
    %c0_12 = arith.constant 0 : index
    %c0_13 = arith.constant 0 : index
    %29 = vector.load %arg5[%c0_12, %c0_13] : memref<1x512xf32, #tpu.memory_space<vmem>>, vector<1x512xf32>
    %30 = vector.broadcast %29 : vector<1x512xf32> to vector<8x512xf32>
    %31 = arith.addf %28, %30 : vector<8x512xf32>
    %32 = arith.mulf %31, %31 : vector<8x512xf32>
    %33 = arith.mulf %31, %32 : vector<8x512xf32>
    %cst_14 = arith.constant 4.471500e-02 : f32
    %34 = vector.broadcast %cst_14 : f32 to vector<8x512xf32>
    %35 = arith.mulf %34, %33 : vector<8x512xf32>
    %36 = arith.addf %31, %35 : vector<8x512xf32>
    %cst_15 = arith.constant 0.797884583 : f32
    %37 = vector.broadcast %cst_15 : f32 to vector<8x512xf32>
    %38 = arith.mulf %37, %36 : vector<8x512xf32>
    %39 = math.tanh %38 : vector<8x512xf32>
    %cst_16 = arith.constant 1.000000e+00 : f32
    %40 = vector.broadcast %cst_16 : f32 to vector<8x512xf32>
    %41 = arith.addf %40, %39 : vector<8x512xf32>
    %cst_17 = arith.constant 5.000000e-01 : f32
    %42 = vector.broadcast %cst_17 : f32 to vector<8x512xf32>
    %43 = arith.mulf %42, %41 : vector<8x512xf32>
    %44 = arith.mulf %31, %43 : vector<8x512xf32>
    %45 = arith.truncf %44 : vector<8x512xf32> to vector<8x512xbf16>
    %c0_18 = arith.constant 0 : index
    %c0_19 = arith.constant 0 : index
    %46 = vector.load %arg6[%c0_18, %c0_19] : memref<512x128xbf16, #tpu.memory_space<vmem>>, vector<512x128xbf16>
    %cst_20 = arith.constant dense<0.000000e+00> : vector<8x128xf32>
    %47 = tpu.matmul %45, %46, %cst_20 {dimension_numbers = #tpu.dot_dimension_numbers<[1], [0], [0], [1], [0, 0, 1, 1], [], []>} : vector<8x512xbf16>, vector<512x128xbf16>, vector<8x128xf32> -> vector<8x128xf32>
    %c0_21 = arith.constant 0 : index
    %c0_22 = arith.constant 0 : index
    %48 = vector.load %arg7[%c0_21, %c0_22] : memref<1x128xf32, #tpu.memory_space<vmem>>, vector<1x128xf32>
    %49 = vector.broadcast %48 : vector<1x128xf32> to vector<8x128xf32>
    %50 = arith.addf %47, %49 : vector<8x128xf32>
    %51 = arith.addf %1, %50 : vector<8x128xf32>
    %52 = arith.truncf %51 : vector<8x128xf32> to vector<8x128xbf16>
    %c0_23 = arith.constant 0 : index
    %c0_24 = arith.constant 0 : index
    %53 = vector.load %arg8[%c0_23, %c0_24] : memref<8x128xbf16, #tpu.memory_space<vmem>>, vector<8x128xbf16>
    tpu.vector_store %arg8[%c0_23, %c0_24], %52 {strides = array<i32>} : memref<8x128xbf16, #tpu.memory_space<vmem>>, vector<8x128xbf16>,
    return
  }
  func.func @transform_0(%arg0: i32) -> (i32, i32) {
    %c0_i32 = arith.constant 0 : i32
    %c0_i32_0 = arith.constant 0 : i32
    return %arg0, %c0_i32 : i32, i32
  }
  func.func @transform_1(%arg0: i32) -> (i32, i32) {
    %c0_i32 = arith.constant 0 : i32
    %c0_i32_0 = arith.constant 0 : i32
    %c0_i32_1 = arith.constant 0 : i32
    return %c0_i32, %c0_i32_0 : i32, i32
  }
  func.func @transform_2(%arg0: i32) -> (i32, i32) {
    %c0_i32 = arith.constant 0 : i32
    %c0_i32_0 = arith.constant 0 : i32
    %c0_i32_1 = arith.constant 0 : i32
    return %c0_i32, %c0_i32_0 : i32, i32
  }
  func.func @transform_3(%arg0: i32) -> (i32, i32) {
    %c0_i32 = arith.constant 0 : i32
    %c0_i32_0 = arith.constant 0 : i32
    %c0_i32_1 = arith.constant 0 : i32
    return %c0_i32, %c0_i32_0 : i32, i32
  }
  func.func @transform_4(%arg0: i32) -> (i32, i32) {
    %c0_i32 = arith.constant 0 : i32
    %c0_i32_0 = arith.constant 0 : i32
    %c0_i32_1 = arith.constant 0 : i32
    return %c0_i32, %c0_i32_0 : i32, i32
  }
  func.func @transform_5(%arg0: i32) -> (i32, i32) {
    %c0_i32 = arith.constant 0 : i32
    %c0_i32_0 = arith.constant 0 : i32
    %c0_i32_1 = arith.constant 0 : i32
    return %c0_i32, %c0_i32_0 : i32, i32
  }
  func.func @transform_6(%arg0: i32) -> (i32, i32) {
    %c0_i32 = arith.constant 0 : i32
    %c0_i32_0 = arith.constant 0 : i32
    %c0_i32_1 = arith.constant 0 : i32
    return %c0_i32, %c0_i32_0 : i32, i32
  }
  func.func @transform_7(%arg0: i32) -> (i32, i32) {
    %c0_i32 = arith.constant 0 : i32
    %c0_i32_0 = arith.constant 0 : i32
    return %arg0, %c0_i32 : i32, i32
  }
}

module attributes {stable_mosaic.version = 11 : i64} {
  func.func @_linear_kernel(%arg0: i32, %arg1: memref<8x128xbf16, #tpu.memory_space<vmem>>, %arg2: memref<128x256xbf16, #tpu.memory_space<vmem>>, %arg3: memref<1x256xf32, #tpu.memory_space<vmem>>, %arg4: memref<8x256xbf16, #tpu.memory_space<vmem>>) attributes {dimension_semantics = [#tpu.dimension_semantics<parallel>], iteration_bounds = array<i64: 2>, scalar_prefetch = 0 : i64, scratch_operands = 0 : i64, tpu.core_type = #tpu.core_type<tc>, window_params = [{transform_indices = @transform_0, window_bounds = array<i64: 8, 128>}, {pipeline_mode = #tpu.pipeline_mode<synchronous>, transform_indices = @transform_1, window_bounds = array<i64: 128, 256>}, {pipeline_mode = #tpu.pipeline_mode<synchronous>, transform_indices = @transform_2, window_bounds = array<i64: 1, 256>}, {transform_indices = @transform_3, window_bounds = array<i64: 8, 256>}]} {
    %c0 = arith.constant 0 : index
    %c0_0 = arith.constant 0 : index
    %0 = vector.load %arg1[%c0, %c0_0] : memref<8x128xbf16, #tpu.memory_space<vmem>>, vector<8x128xbf16>
    %c0_1 = arith.constant 0 : index
    %c0_2 = arith.constant 0 : index
    %1 = vector.load %arg2[%c0_1, %c0_2] : memref<128x256xbf16, #tpu.memory_space<vmem>>, vector<128x256xbf16>
    %cst = arith.constant dense<0.000000e+00> : vector<8x256xf32>
    %2 = tpu.matmul %0, %1, %cst {dimension_numbers = #tpu.dot_dimension_numbers<[1], [0], [0], [1], [0, 0, 1, 1], [], []>} : vector<8x128xbf16>, vector<128x256xbf16>, vector<8x256xf32> -> vector<8x256xf32>
    %c0_3 = arith.constant 0 : index
    %c0_4 = arith.constant 0 : index
    %3 = vector.load %arg3[%c0_3, %c0_4] : memref<1x256xf32, #tpu.memory_space<vmem>>, vector<1x256xf32>
    %4 = vector.broadcast %3 : vector<1x256xf32> to vector<8x256xf32>
    %5 = arith.addf %2, %4 : vector<8x256xf32>
    %6 = arith.truncf %5 : vector<8x256xf32> to vector<8x256xbf16>
    %c0_5 = arith.constant 0 : index
    %c0_6 = arith.constant 0 : index
    %7 = vector.load %arg4[%c0_5, %c0_6] : memref<8x256xbf16, #tpu.memory_space<vmem>>, vector<8x256xbf16>
    tpu.vector_store %arg4[%c0_5, %c0_6], %6 {strides = array<i32>} : memref<8x256xbf16, #tpu.memory_space<vmem>>, vector<8x256xbf16>,
    return
  }
  func.func @transform_0(%arg0: i32) -> (i32, i32) {
    %c0_i32 = arith.constant 0 : i32
    %c0_i32_0 = arith.constant 0 : i32
    return %arg0, %c0_i32 : i32, i32
  }
  func.func @transform_1(%arg0: i32) -> (i32, i32) {
    %c0_i32 = arith.constant 0 : i32
    %c0_i32_0 = arith.constant 0 : i32
    %c0_i32_1 = arith.constant 0 : i32
    return %c0_i32, %c0_i32_0 : i32, i32
  }
  func.func @transform_2(%arg0: i32) -> (i32, i32) {
    %c0_i32 = arith.constant 0 : i32
    %c0_i32_0 = arith.constant 0 : i32
    %c0_i32_1 = arith.constant 0 : i32
    return %c0_i32, %c0_i32_0 : i32, i32
  }
  func.func @transform_3(%arg0: i32) -> (i32, i32) {
    %c0_i32 = arith.constant 0 : i32
    %c0_i32_0 = arith.constant 0 : i32
    return %arg0, %c0_i32 : i32, i32
  }
}

module attributes {stable_mosaic.version = 11 : i64} {
  func.func @_attn_kernel(%arg0: i32, %arg1: memref<1x16x128xbf16, #tpu.memory_space<vmem>>, %arg2: memref<1x128xf32, #tpu.memory_space<vmem>>, %arg3: memref<1x128xf32, #tpu.memory_space<vmem>>, %arg4: memref<4x128x32xbf16, #tpu.memory_space<vmem>>, %arg5: memref<4x1x32xf32, #tpu.memory_space<vmem>>, %arg6: memref<4x128x32xbf16, #tpu.memory_space<vmem>>, %arg7: memref<4x1x32xf32, #tpu.memory_space<vmem>>, %arg8: memref<4x128x32xbf16, #tpu.memory_space<vmem>>, %arg9: memref<4x1x32xf32, #tpu.memory_space<vmem>>, %arg10: memref<4x32x128xbf16, #tpu.memory_space<vmem>>, %arg11: memref<1x128xf32, #tpu.memory_space<vmem>>, %arg12: memref<1x16x128xbf16, #tpu.memory_space<vmem>>) attributes {dimension_semantics = [#tpu.dimension_semantics<parallel>], iteration_bounds = array<i64: 2>, scalar_prefetch = 0 : i64, scratch_operands = 0 : i64, tpu.core_type = #tpu.core_type<tc>, window_params = [{transform_indices = @transform_0, window_bounds = array<i64: 1, 16, 128>}, {pipeline_mode = #tpu.pipeline_mode<synchronous>, transform_indices = @transform_1, window_bounds = array<i64: 1, 128>}, {pipeline_mode = #tpu.pipeline_mode<synchronous>, transform_indices = @transform_2, window_bounds = array<i64: 1, 128>}, {pipeline_mode = #tpu.pipeline_mode<synchronous>, transform_indices = @transform_3, window_bounds = array<i64: 4, 128, 32>}, {pipeline_mode = #tpu.pipeline_mode<synchronous>, transform_indices = @transform_4, window_bounds = array<i64: 4, 1, 32>}, {pipeline_mode = #tpu.pipeline_mode<synchronous>, transform_indices = @transform_5, window_bounds = array<i64: 4, 128, 32>}, {pipeline_mode = #tpu.pipeline_mode<synchronous>, transform_indices = @transform_6, window_bounds = array<i64: 4, 1, 32>}, {pipeline_mode = #tpu.pipeline_mode<synchronous>, transform_indices = @transform_7, window_bounds = array<i64: 4, 128, 32>}, {pipeline_mode = #tpu.pipeline_mode<synchronous>, transform_indices = @transform_8, window_bounds = array<i64: 4, 1, 32>}, {pipeline_mode = #tpu.pipeline_mode<synchronous>, transform_indices = @transform_9, window_bounds = array<i64: 4, 32, 128>}, {pipeline_mode = #tpu.pipeline_mode<synchronous>, transform_indices = @transform_10, window_bounds = array<i64: 1, 128>}, {transform_indices = @transform_11, window_bounds = array<i64: 1, 16, 128>}]} {
    %c0 = arith.constant 0 : index
    %c0_0 = arith.constant 0 : index
    %c0_1 = arith.constant 0 : index
    %0 = vector.load %arg1[%c0, %c0_0, %c0_1] : memref<1x16x128xbf16, #tpu.memory_space<vmem>>, vector<1x16x128xbf16>
    %1 = vector.shape_cast %0 : vector<1x16x128xbf16> to vector<16x128xbf16>
    %2 = arith.extf %1 : vector<16x128xbf16> to vector<16x128xf32>
    %cst = arith.constant dense<0.000000e+00> : vector<16xf32>
    %3 = vector.multi_reduction <add>, %2, %cst [1] : vector<16x128xf32> to vector<16xf32>
    %4 = vector.shape_cast %3 : vector<16xf32> to vector<16x1xf32>
    %cst_2 = arith.constant 1.280000e+02 : f32
    %5 = vector.broadcast %cst_2 : f32 to vector<16x1xf32>
    %6 = arith.divf %4, %5 : vector<16x1xf32>
    %7 = vector.broadcast %6 : vector<16x1xf32> to vector<16x128xf32>
    %8 = arith.subf %2, %7 : vector<16x128xf32>
    %9 = arith.mulf %8, %8 : vector<16x128xf32>
    %cst_3 = arith.constant dense<0.000000e+00> : vector<16xf32>
    %10 = vector.multi_reduction <add>, %9, %cst_3 [1] : vector<16x128xf32> to vector<16xf32>
    %11 = vector.shape_cast %10 : vector<16xf32> to vector<16x1xf32>
    %cst_4 = arith.constant 1.280000e+02 : f32
    %12 = vector.broadcast %cst_4 : f32 to vector<16x1xf32>
    %13 = arith.divf %11, %12 : vector<16x1xf32>
    %14 = vector.broadcast %6 : vector<16x1xf32> to vector<16x128xf32>
    %15 = arith.subf %2, %14 : vector<16x128xf32>
    %cst_5 = arith.constant 9.99999974E-6 : f32
    %16 = vector.broadcast %cst_5 : f32 to vector<16x1xf32>
    %17 = arith.addf %13, %16 : vector<16x1xf32>
    %18 = math.rsqrt %17 : vector<16x1xf32>
    %19 = vector.broadcast %18 : vector<16x1xf32> to vector<16x128xf32>
    %20 = arith.mulf %15, %19 : vector<16x128xf32>
    %c0_6 = arith.constant 0 : index
    %c0_7 = arith.constant 0 : index
    %21 = vector.load %arg2[%c0_6, %c0_7] : memref<1x128xf32, #tpu.memory_space<vmem>>, vector<1x128xf32>
    %22 = vector.broadcast %21 : vector<1x128xf32> to vector<16x128xf32>
    %23 = arith.mulf %20, %22 : vector<16x128xf32>
    %c0_8 = arith.constant 0 : index
    %c0_9 = arith.constant 0 : index
    %24 = vector.load %arg3[%c0_8, %c0_9] : memref<1x128xf32, #tpu.memory_space<vmem>>, vector<1x128xf32>
    %25 = vector.broadcast %24 : vector<1x128xf32> to vector<16x128xf32>
    %26 = arith.addf %23, %25 : vector<16x128xf32>
    %27 = arith.truncf %26 : vector<16x128xf32> to vector<16x128xbf16>
    %cst_10 = arith.constant 0.000000e+00 : f32
    %28 = vector.broadcast %cst_10 : f32 to vector<16x128xf32>
    %c0_11 = arith.constant 0 : index
    %c0_12 = arith.constant 0 : index
    %c0_13 = arith.constant 0 : index
    %29 = vector.load %arg4[%c0_11, %c0_12, %c0_13] : memref<4x128x32xbf16, #tpu.memory_space<vmem>>, vector<1x128x32xbf16>
    %30 = vector.shape_cast %29 : vector<1x128x32xbf16> to vector<128x32xbf16>
    %cst_14 = arith.constant dense<0.000000e+00> : vector<16x32xf32>
    %31 = tpu.matmul %27, %30, %cst_14 {dimension_numbers = #tpu.dot_dimension_numbers<[1], [0], [0], [1], [0, 0, 1, 1], [], []>} : vector<16x128xbf16>, vector<128x32xbf16>, vector<16x32xf32> -> vector<16x32xf32>
    %c0_15 = arith.constant 0 : index
    %c0_16 = arith.constant 0 : index
    %c0_17 = arith.constant 0 : index
    %32 = vector.load %arg5[%c0_15, %c0_16, %c0_17] : memref<4x1x32xf32, #tpu.memory_space<vmem>>, vector<1x1x32xf32>
    %33 = vector.shape_cast %32 : vector<1x1x32xf32> to vector<1x32xf32>
    %34 = vector.broadcast %33 : vector<1x32xf32> to vector<16x32xf32>
    %35 = arith.addf %31, %34 : vector<16x32xf32>
    %c0_18 = arith.constant 0 : index
    %c0_19 = arith.constant 0 : index
    %c0_20 = arith.constant 0 : index
    %36 = vector.load %arg6[%c0_18, %c0_19, %c0_20] : memref<4x128x32xbf16, #tpu.memory_space<vmem>>, vector<1x128x32xbf16>
    %37 = vector.shape_cast %36 : vector<1x128x32xbf16> to vector<128x32xbf16>
    %cst_21 = arith.constant dense<0.000000e+00> : vector<16x32xf32>
    %38 = tpu.matmul %27, %37, %cst_21 {dimension_numbers = #tpu.dot_dimension_numbers<[1], [0], [0], [1], [0, 0, 1, 1], [], []>} : vector<16x128xbf16>, vector<128x32xbf16>, vector<16x32xf32> -> vector<16x32xf32>
    %c0_22 = arith.constant 0 : index
    %c0_23 = arith.constant 0 : index
    %c0_24 = arith.constant 0 : index
    %39 = vector.load %arg7[%c0_22, %c0_23, %c0_24] : memref<4x1x32xf32, #tpu.memory_space<vmem>>, vector<1x1x32xf32>
    %40 = vector.shape_cast %39 : vector<1x1x32xf32> to vector<1x32xf32>
    %41 = vector.broadcast %40 : vector<1x32xf32> to vector<16x32xf32>
    %42 = arith.addf %38, %41 : vector<16x32xf32>
    %c0_25 = arith.constant 0 : index
    %c0_26 = arith.constant 0 : index
    %c0_27 = arith.constant 0 : index
    %43 = vector.load %arg8[%c0_25, %c0_26, %c0_27] : memref<4x128x32xbf16, #tpu.memory_space<vmem>>, vector<1x128x32xbf16>
    %44 = vector.shape_cast %43 : vector<1x128x32xbf16> to vector<128x32xbf16>
    %cst_28 = arith.constant dense<0.000000e+00> : vector<16x32xf32>
    %45 = tpu.matmul %27, %44, %cst_28 {dimension_numbers = #tpu.dot_dimension_numbers<[1], [0], [0], [1], [0, 0, 1, 1], [], []>} : vector<16x128xbf16>, vector<128x32xbf16>, vector<16x32xf32> -> vector<16x32xf32>
    %c0_29 = arith.constant 0 : index
    %c0_30 = arith.constant 0 : index
    %c0_31 = arith.constant 0 : index
    %46 = vector.load %arg9[%c0_29, %c0_30, %c0_31] : memref<4x1x32xf32, #tpu.memory_space<vmem>>, vector<1x1x32xf32>
    %47 = vector.shape_cast %46 : vector<1x1x32xf32> to vector<1x32xf32>
    %48 = vector.broadcast %47 : vector<1x32xf32> to vector<16x32xf32>
    %49 = arith.addf %45, %48 : vector<16x32xf32>
    %50 = arith.truncf %35 : vector<16x32xf32> to vector<16x32xbf16>
    %51 = arith.truncf %42 : vector<16x32xf32> to vector<16x32xbf16>
    %cst_32 = arith.constant dense<0.000000e+00> : vector<16x16xf32>
    %52 = tpu.matmul %50, %51, %cst_32 {dimension_numbers = #tpu.dot_dimension_numbers<[1], [1], [0], [0], [0, 0, 1, 0], [], []>} : vector<16x32xbf16>, vector<16x32xbf16>, vector<16x16xf32> -> vector<16x16xf32>
    %cst_33 = arith.constant 0.176776692 : f32
    %53 = vector.broadcast %cst_33 : f32 to vector<16x16xf32>
    %54 = arith.mulf %52, %53 : vector<16x16xf32>
    %cst_34 = arith.constant dense<0xFF800000> : vector<16xf32>
    %55 = vector.multi_reduction <maximumf>, %54, %cst_34 [1] : vector<16x16xf32> to vector<16xf32>
    %56 = vector.shape_cast %55 : vector<16xf32> to vector<16x1xf32>
    %57 = vector.broadcast %56 : vector<16x1xf32> to vector<16x16xf32>
    %58 = arith.subf %54, %57 : vector<16x16xf32>
    %59 = math.exp %58 : vector<16x16xf32>
    %cst_35 = arith.constant dense<0.000000e+00> : vector<16xf32>
    %60 = vector.multi_reduction <add>, %59, %cst_35 [1] : vector<16x16xf32> to vector<16xf32>
    %61 = vector.shape_cast %60 : vector<16xf32> to vector<16x1xf32>
    %62 = tpu.reciprocal %61 {approx = true} : vector<16x1xf32> -> vector<16x1xf32>
    %63 = vector.broadcast %62 : vector<16x1xf32> to vector<16x16xf32>
    %64 = arith.mulf %59, %63 : vector<16x16xf32>
    %65 = arith.truncf %64 : vector<16x16xf32> to vector<16x16xbf16>
    %66 = arith.truncf %49 : vector<16x32xf32> to vector<16x32xbf16>
    %cst_36 = arith.constant dense<0.000000e+00> : vector<16x32xf32>
    %67 = tpu.matmul %65, %66, %cst_36 {dimension_numbers = #tpu.dot_dimension_numbers<[1], [0], [0], [1], [0, 0, 1, 1], [], []>} : vector<16x16xbf16>, vector<16x32xbf16>, vector<16x32xf32> -> vector<16x32xf32>
    %68 = arith.truncf %67 : vector<16x32xf32> to vector<16x32xbf16>
    %c0_37 = arith.constant 0 : index
    %c0_38 = arith.constant 0 : index
    %c0_39 = arith.constant 0 : index
    %69 = vector.load %arg10[%c0_37, %c0_38, %c0_39] : memref<4x32x128xbf16, #tpu.memory_space<vmem>>, vector<1x32x128xbf16>
    %70 = vector.shape_cast %69 : vector<1x32x128xbf16> to vector<32x128xbf16>
    %cst_40 = arith.constant dense<0.000000e+00> : vector<16x128xf32>
    %71 = tpu.matmul %68, %70, %cst_40 {dimension_numbers = #tpu.dot_dimension_numbers<[1], [0], [0], [1], [0, 0, 1, 1], [], []>} : vector<16x32xbf16>, vector<32x128xbf16>, vector<16x128xf32> -> vector<16x128xf32>
    %72 = arith.addf %28, %71 : vector<16x128xf32>
    %c1 = arith.constant 1 : index
    %c0_41 = arith.constant 0 : index
    %c0_42 = arith.constant 0 : index
    %73 = vector.load %arg4[%c1, %c0_41, %c0_42] : memref<4x128x32xbf16, #tpu.memory_space<vmem>>, vector<1x128x32xbf16>
    %74 = vector.shape_cast %73 : vector<1x128x32xbf16> to vector<128x32xbf16>
    %cst_43 = arith.constant dense<0.000000e+00> : vector<16x32xf32>
    %75 = tpu.matmul %27, %74, %cst_43 {dimension_numbers = #tpu.dot_dimension_numbers<[1], [0], [0], [1], [0, 0, 1, 1], [], []>} : vector<16x128xbf16>, vector<128x32xbf16>, vector<16x32xf32> -> vector<16x32xf32>
    %c1_44 = arith.constant 1 : index
    %c0_45 = arith.constant 0 : index
    %c0_46 = arith.constant 0 : index
    %76 = vector.load %arg5[%c1_44, %c0_45, %c0_46] : memref<4x1x32xf32, #tpu.memory_space<vmem>>, vector<1x1x32xf32>
    %77 = vector.shape_cast %76 : vector<1x1x32xf32> to vector<1x32xf32>
    %78 = vector.broadcast %77 : vector<1x32xf32> to vector<16x32xf32>
    %79 = arith.addf %75, %78 : vector<16x32xf32>
    %c1_47 = arith.constant 1 : index
    %c0_48 = arith.constant 0 : index
    %c0_49 = arith.constant 0 : index
    %80 = vector.load %arg6[%c1_47, %c0_48, %c0_49] : memref<4x128x32xbf16, #tpu.memory_space<vmem>>, vector<1x128x32xbf16>
    %81 = vector.shape_cast %80 : vector<1x128x32xbf16> to vector<128x32xbf16>
    %cst_50 = arith.constant dense<0.000000e+00> : vector<16x32xf32>
    %82 = tpu.matmul %27, %81, %cst_50 {dimension_numbers = #tpu.dot_dimension_numbers<[1], [0], [0], [1], [0, 0, 1, 1], [], []>} : vector<16x128xbf16>, vector<128x32xbf16>, vector<16x32xf32> -> vector<16x32xf32>
    %c1_51 = arith.constant 1 : index
    %c0_52 = arith.constant 0 : index
    %c0_53 = arith.constant 0 : index
    %83 = vector.load %arg7[%c1_51, %c0_52, %c0_53] : memref<4x1x32xf32, #tpu.memory_space<vmem>>, vector<1x1x32xf32>
    %84 = vector.shape_cast %83 : vector<1x1x32xf32> to vector<1x32xf32>
    %85 = vector.broadcast %84 : vector<1x32xf32> to vector<16x32xf32>
    %86 = arith.addf %82, %85 : vector<16x32xf32>
    %c1_54 = arith.constant 1 : index
    %c0_55 = arith.constant 0 : index
    %c0_56 = arith.constant 0 : index
    %87 = vector.load %arg8[%c1_54, %c0_55, %c0_56] : memref<4x128x32xbf16, #tpu.memory_space<vmem>>, vector<1x128x32xbf16>
    %88 = vector.shape_cast %87 : vector<1x128x32xbf16> to vector<128x32xbf16>
    %cst_57 = arith.constant dense<0.000000e+00> : vector<16x32xf32>
    %89 = tpu.matmul %27, %88, %cst_57 {dimension_numbers = #tpu.dot_dimension_numbers<[1], [0], [0], [1], [0, 0, 1, 1], [], []>} : vector<16x128xbf16>, vector<128x32xbf16>, vector<16x32xf32> -> vector<16x32xf32>
    %c1_58 = arith.constant 1 : index
    %c0_59 = arith.constant 0 : index
    %c0_60 = arith.constant 0 : index
    %90 = vector.load %arg9[%c1_58, %c0_59, %c0_60] : memref<4x1x32xf32, #tpu.memory_space<vmem>>, vector<1x1x32xf32>
    %91 = vector.shape_cast %90 : vector<1x1x32xf32> to vector<1x32xf32>
    %92 = vector.broadcast %91 : vector<1x32xf32> to vector<16x32xf32>
    %93 = arith.addf %89, %92 : vector<16x32xf32>
    %94 = arith.truncf %79 : vector<16x32xf32> to vector<16x32xbf16>
    %95 = arith.truncf %86 : vector<16x32xf32> to vector<16x32xbf16>
    %cst_61 = arith.constant dense<0.000000e+00> : vector<16x16xf32>
    %96 = tpu.matmul %94, %95, %cst_61 {dimension_numbers = #tpu.dot_dimension_numbers<[1], [1], [0], [0], [0, 0, 1, 0], [], []>} : vector<16x32xbf16>, vector<16x32xbf16>, vector<16x16xf32> -> vector<16x16xf32>
    %cst_62 = arith.constant 0.176776692 : f32
    %97 = vector.broadcast %cst_62 : f32 to vector<16x16xf32>
    %98 = arith.mulf %96, %97 : vector<16x16xf32>
    %cst_63 = arith.constant dense<0xFF800000> : vector<16xf32>
    %99 = vector.multi_reduction <maximumf>, %98, %cst_63 [1] : vector<16x16xf32> to vector<16xf32>
    %100 = vector.shape_cast %99 : vector<16xf32> to vector<16x1xf32>
    %101 = vector.broadcast %100 : vector<16x1xf32> to vector<16x16xf32>
    %102 = arith.subf %98, %101 : vector<16x16xf32>
    %103 = math.exp %102 : vector<16x16xf32>
    %cst_64 = arith.constant dense<0.000000e+00> : vector<16xf32>
    %104 = vector.multi_reduction <add>, %103, %cst_64 [1] : vector<16x16xf32> to vector<16xf32>
    %105 = vector.shape_cast %104 : vector<16xf32> to vector<16x1xf32>
    %106 = tpu.reciprocal %105 {approx = true} : vector<16x1xf32> -> vector<16x1xf32>
    %107 = vector.broadcast %106 : vector<16x1xf32> to vector<16x16xf32>
    %108 = arith.mulf %103, %107 : vector<16x16xf32>
    %109 = arith.truncf %108 : vector<16x16xf32> to vector<16x16xbf16>
    %110 = arith.truncf %93 : vector<16x32xf32> to vector<16x32xbf16>
    %cst_65 = arith.constant dense<0.000000e+00> : vector<16x32xf32>
    %111 = tpu.matmul %109, %110, %cst_65 {dimension_numbers = #tpu.dot_dimension_numbers<[1], [0], [0], [1], [0, 0, 1, 1], [], []>} : vector<16x16xbf16>, vector<16x32xbf16>, vector<16x32xf32> -> vector<16x32xf32>
    %112 = arith.truncf %111 : vector<16x32xf32> to vector<16x32xbf16>
    %c1_66 = arith.constant 1 : index
    %c0_67 = arith.constant 0 : index
    %c0_68 = arith.constant 0 : index
    %113 = vector.load %arg10[%c1_66, %c0_67, %c0_68] : memref<4x32x128xbf16, #tpu.memory_space<vmem>>, vector<1x32x128xbf16>
    %114 = vector.shape_cast %113 : vector<1x32x128xbf16> to vector<32x128xbf16>
    %cst_69 = arith.constant dense<0.000000e+00> : vector<16x128xf32>
    %115 = tpu.matmul %112, %114, %cst_69 {dimension_numbers = #tpu.dot_dimension_numbers<[1], [0], [0], [1], [0, 0, 1, 1], [], []>} : vector<16x32xbf16>, vector<32x128xbf16>, vector<16x128xf32> -> vector<16x128xf32>
    %116 = arith.addf %72, %115 : vector<16x128xf32>
    %c2 = arith.constant 2 : index
    %c0_70 = arith.constant 0 : index
    %c0_71 = arith.constant 0 : index
    %117 = vector.load %arg4[%c2, %c0_70, %c0_71] : memref<4x128x32xbf16, #tpu.memory_space<vmem>>, vector<1x128x32xbf16>
    %118 = vector.shape_cast %117 : vector<1x128x32xbf16> to vector<128x32xbf16>
    %cst_72 = arith.constant dense<0.000000e+00> : vector<16x32xf32>
    %119 = tpu.matmul %27, %118, %cst_72 {dimension_numbers = #tpu.dot_dimension_numbers<[1], [0], [0], [1], [0, 0, 1, 1], [], []>} : vector<16x128xbf16>, vector<128x32xbf16>, vector<16x32xf32> -> vector<16x32xf32>
    %c2_73 = arith.constant 2 : index
    %c0_74 = arith.constant 0 : index
    %c0_75 = arith.constant 0 : index
    %120 = vector.load %arg5[%c2_73, %c0_74, %c0_75] : memref<4x1x32xf32, #tpu.memory_space<vmem>>, vector<1x1x32xf32>
    %121 = vector.shape_cast %120 : vector<1x1x32xf32> to vector<1x32xf32>
    %122 = vector.broadcast %121 : vector<1x32xf32> to vector<16x32xf32>
    %123 = arith.addf %119, %122 : vector<16x32xf32>
    %c2_76 = arith.constant 2 : index
    %c0_77 = arith.constant 0 : index
    %c0_78 = arith.constant 0 : index
    %124 = vector.load %arg6[%c2_76, %c0_77, %c0_78] : memref<4x128x32xbf16, #tpu.memory_space<vmem>>, vector<1x128x32xbf16>
    %125 = vector.shape_cast %124 : vector<1x128x32xbf16> to vector<128x32xbf16>
    %cst_79 = arith.constant dense<0.000000e+00> : vector<16x32xf32>
    %126 = tpu.matmul %27, %125, %cst_79 {dimension_numbers = #tpu.dot_dimension_numbers<[1], [0], [0], [1], [0, 0, 1, 1], [], []>} : vector<16x128xbf16>, vector<128x32xbf16>, vector<16x32xf32> -> vector<16x32xf32>
    %c2_80 = arith.constant 2 : index
    %c0_81 = arith.constant 0 : index
    %c0_82 = arith.constant 0 : index
    %127 = vector.load %arg7[%c2_80, %c0_81, %c0_82] : memref<4x1x32xf32, #tpu.memory_space<vmem>>, vector<1x1x32xf32>
    %128 = vector.shape_cast %127 : vector<1x1x32xf32> to vector<1x32xf32>
    %129 = vector.broadcast %128 : vector<1x32xf32> to vector<16x32xf32>
    %130 = arith.addf %126, %129 : vector<16x32xf32>
    %c2_83 = arith.constant 2 : index
    %c0_84 = arith.constant 0 : index
    %c0_85 = arith.constant 0 : index
    %131 = vector.load %arg8[%c2_83, %c0_84, %c0_85] : memref<4x128x32xbf16, #tpu.memory_space<vmem>>, vector<1x128x32xbf16>
    %132 = vector.shape_cast %131 : vector<1x128x32xbf16> to vector<128x32xbf16>
    %cst_86 = arith.constant dense<0.000000e+00> : vector<16x32xf32>
    %133 = tpu.matmul %27, %132, %cst_86 {dimension_numbers = #tpu.dot_dimension_numbers<[1], [0], [0], [1], [0, 0, 1, 1], [], []>} : vector<16x128xbf16>, vector<128x32xbf16>, vector<16x32xf32> -> vector<16x32xf32>
    %c2_87 = arith.constant 2 : index
    %c0_88 = arith.constant 0 : index
    %c0_89 = arith.constant 0 : index
    %134 = vector.load %arg9[%c2_87, %c0_88, %c0_89] : memref<4x1x32xf32, #tpu.memory_space<vmem>>, vector<1x1x32xf32>
    %135 = vector.shape_cast %134 : vector<1x1x32xf32> to vector<1x32xf32>
    %136 = vector.broadcast %135 : vector<1x32xf32> to vector<16x32xf32>
    %137 = arith.addf %133, %136 : vector<16x32xf32>
    %138 = arith.truncf %123 : vector<16x32xf32> to vector<16x32xbf16>
    %139 = arith.truncf %130 : vector<16x32xf32> to vector<16x32xbf16>
    %cst_90 = arith.constant dense<0.000000e+00> : vector<16x16xf32>
    %140 = tpu.matmul %138, %139, %cst_90 {dimension_numbers = #tpu.dot_dimension_numbers<[1], [1], [0], [0], [0, 0, 1, 0], [], []>} : vector<16x32xbf16>, vector<16x32xbf16>, vector<16x16xf32> -> vector<16x16xf32>
    %cst_91 = arith.constant 0.176776692 : f32
    %141 = vector.broadcast %cst_91 : f32 to vector<16x16xf32>
    %142 = arith.mulf %140, %141 : vector<16x16xf32>
    %cst_92 = arith.constant dense<0xFF800000> : vector<16xf32>
    %143 = vector.multi_reduction <maximumf>, %142, %cst_92 [1] : vector<16x16xf32> to vector<16xf32>
    %144 = vector.shape_cast %143 : vector<16xf32> to vector<16x1xf32>
    %145 = vector.broadcast %144 : vector<16x1xf32> to vector<16x16xf32>
    %146 = arith.subf %142, %145 : vector<16x16xf32>
    %147 = math.exp %146 : vector<16x16xf32>
    %cst_93 = arith.constant dense<0.000000e+00> : vector<16xf32>
    %148 = vector.multi_reduction <add>, %147, %cst_93 [1] : vector<16x16xf32> to vector<16xf32>
    %149 = vector.shape_cast %148 : vector<16xf32> to vector<16x1xf32>
    %150 = tpu.reciprocal %149 {approx = true} : vector<16x1xf32> -> vector<16x1xf32>
    %151 = vector.broadcast %150 : vector<16x1xf32> to vector<16x16xf32>
    %152 = arith.mulf %147, %151 : vector<16x16xf32>
    %153 = arith.truncf %152 : vector<16x16xf32> to vector<16x16xbf16>
    %154 = arith.truncf %137 : vector<16x32xf32> to vector<16x32xbf16>
    %cst_94 = arith.constant dense<0.000000e+00> : vector<16x32xf32>
    %155 = tpu.matmul %153, %154, %cst_94 {dimension_numbers = #tpu.dot_dimension_numbers<[1], [0], [0], [1], [0, 0, 1, 1], [], []>} : vector<16x16xbf16>, vector<16x32xbf16>, vector<16x32xf32> -> vector<16x32xf32>
    %156 = arith.truncf %155 : vector<16x32xf32> to vector<16x32xbf16>
    %c2_95 = arith.constant 2 : index
    %c0_96 = arith.constant 0 : index
    %c0_97 = arith.constant 0 : index
    %157 = vector.load %arg10[%c2_95, %c0_96, %c0_97] : memref<4x32x128xbf16, #tpu.memory_space<vmem>>, vector<1x32x128xbf16>
    %158 = vector.shape_cast %157 : vector<1x32x128xbf16> to vector<32x128xbf16>
    %cst_98 = arith.constant dense<0.000000e+00> : vector<16x128xf32>
    %159 = tpu.matmul %156, %158, %cst_98 {dimension_numbers = #tpu.dot_dimension_numbers<[1], [0], [0], [1], [0, 0, 1, 1], [], []>} : vector<16x32xbf16>, vector<32x128xbf16>, vector<16x128xf32> -> vector<16x128xf32>
    %160 = arith.addf %116, %159 : vector<16x128xf32>
    %c3 = arith.constant 3 : index
    %c0_99 = arith.constant 0 : index
    %c0_100 = arith.constant 0 : index
    %161 = vector.load %arg4[%c3, %c0_99, %c0_100] : memref<4x128x32xbf16, #tpu.memory_space<vmem>>, vector<1x128x32xbf16>
    %162 = vector.shape_cast %161 : vector<1x128x32xbf16> to vector<128x32xbf16>
    %cst_101 = arith.constant dense<0.000000e+00> : vector<16x32xf32>
    %163 = tpu.matmul %27, %162, %cst_101 {dimension_numbers = #tpu.dot_dimension_numbers<[1], [0], [0], [1], [0, 0, 1, 1], [], []>} : vector<16x128xbf16>, vector<128x32xbf16>, vector<16x32xf32> -> vector<16x32xf32>
    %c3_102 = arith.constant 3 : index
    %c0_103 = arith.constant 0 : index
    %c0_104 = arith.constant 0 : index
    %164 = vector.load %arg5[%c3_102, %c0_103, %c0_104] : memref<4x1x32xf32, #tpu.memory_space<vmem>>, vector<1x1x32xf32>
    %165 = vector.shape_cast %164 : vector<1x1x32xf32> to vector<1x32xf32>
    %166 = vector.broadcast %165 : vector<1x32xf32> to vector<16x32xf32>
    %167 = arith.addf %163, %166 : vector<16x32xf32>
    %c3_105 = arith.constant 3 : index
    %c0_106 = arith.constant 0 : index
    %c0_107 = arith.constant 0 : index
    %168 = vector.load %arg6[%c3_105, %c0_106, %c0_107] : memref<4x128x32xbf16, #tpu.memory_space<vmem>>, vector<1x128x32xbf16>
    %169 = vector.shape_cast %168 : vector<1x128x32xbf16> to vector<128x32xbf16>
    %cst_108 = arith.constant dense<0.000000e+00> : vector<16x32xf32>
    %170 = tpu.matmul %27, %169, %cst_108 {dimension_numbers = #tpu.dot_dimension_numbers<[1], [0], [0], [1], [0, 0, 1, 1], [], []>} : vector<16x128xbf16>, vector<128x32xbf16>, vector<16x32xf32> -> vector<16x32xf32>
    %c3_109 = arith.constant 3 : index
    %c0_110 = arith.constant 0 : index
    %c0_111 = arith.constant 0 : index
    %171 = vector.load %arg7[%c3_109, %c0_110, %c0_111] : memref<4x1x32xf32, #tpu.memory_space<vmem>>, vector<1x1x32xf32>
    %172 = vector.shape_cast %171 : vector<1x1x32xf32> to vector<1x32xf32>
    %173 = vector.broadcast %172 : vector<1x32xf32> to vector<16x32xf32>
    %174 = arith.addf %170, %173 : vector<16x32xf32>
    %c3_112 = arith.constant 3 : index
    %c0_113 = arith.constant 0 : index
    %c0_114 = arith.constant 0 : index
    %175 = vector.load %arg8[%c3_112, %c0_113, %c0_114] : memref<4x128x32xbf16, #tpu.memory_space<vmem>>, vector<1x128x32xbf16>
    %176 = vector.shape_cast %175 : vector<1x128x32xbf16> to vector<128x32xbf16>
    %cst_115 = arith.constant dense<0.000000e+00> : vector<16x32xf32>
    %177 = tpu.matmul %27, %176, %cst_115 {dimension_numbers = #tpu.dot_dimension_numbers<[1], [0], [0], [1], [0, 0, 1, 1], [], []>} : vector<16x128xbf16>, vector<128x32xbf16>, vector<16x32xf32> -> vector<16x32xf32>
    %c3_116 = arith.constant 3 : index
    %c0_117 = arith.constant 0 : index
    %c0_118 = arith.constant 0 : index
    %178 = vector.load %arg9[%c3_116, %c0_117, %c0_118] : memref<4x1x32xf32, #tpu.memory_space<vmem>>, vector<1x1x32xf32>
    %179 = vector.shape_cast %178 : vector<1x1x32xf32> to vector<1x32xf32>
    %180 = vector.broadcast %179 : vector<1x32xf32> to vector<16x32xf32>
    %181 = arith.addf %177, %180 : vector<16x32xf32>
    %182 = arith.truncf %167 : vector<16x32xf32> to vector<16x32xbf16>
    %183 = arith.truncf %174 : vector<16x32xf32> to vector<16x32xbf16>
    %cst_119 = arith.constant dense<0.000000e+00> : vector<16x16xf32>
    %184 = tpu.matmul %182, %183, %cst_119 {dimension_numbers = #tpu.dot_dimension_numbers<[1], [1], [0], [0], [0, 0, 1, 0], [], []>} : vector<16x32xbf16>, vector<16x32xbf16>, vector<16x16xf32> -> vector<16x16xf32>
    %cst_120 = arith.constant 0.176776692 : f32
    %185 = vector.broadcast %cst_120 : f32 to vector<16x16xf32>
    %186 = arith.mulf %184, %185 : vector<16x16xf32>
    %cst_121 = arith.constant dense<0xFF800000> : vector<16xf32>
    %187 = vector.multi_reduction <maximumf>, %186, %cst_121 [1] : vector<16x16xf32> to vector<16xf32>
    %188 = vector.shape_cast %187 : vector<16xf32> to vector<16x1xf32>
    %189 = vector.broadcast %188 : vector<16x1xf32> to vector<16x16xf32>
    %190 = arith.subf %186, %189 : vector<16x16xf32>
    %191 = math.exp %190 : vector<16x16xf32>
    %cst_122 = arith.constant dense<0.000000e+00> : vector<16xf32>
    %192 = vector.multi_reduction <add>, %191, %cst_122 [1] : vector<16x16xf32> to vector<16xf32>
    %193 = vector.shape_cast %192 : vector<16xf32> to vector<16x1xf32>
    %194 = tpu.reciprocal %193 {approx = true} : vector<16x1xf32> -> vector<16x1xf32>
    %195 = vector.broadcast %194 : vector<16x1xf32> to vector<16x16xf32>
    %196 = arith.mulf %191, %195 : vector<16x16xf32>
    %197 = arith.truncf %196 : vector<16x16xf32> to vector<16x16xbf16>
    %198 = arith.truncf %181 : vector<16x32xf32> to vector<16x32xbf16>
    %cst_123 = arith.constant dense<0.000000e+00> : vector<16x32xf32>
    %199 = tpu.matmul %197, %198, %cst_123 {dimension_numbers = #tpu.dot_dimension_numbers<[1], [0], [0], [1], [0, 0, 1, 1], [], []>} : vector<16x16xbf16>, vector<16x32xbf16>, vector<16x32xf32> -> vector<16x32xf32>
    %200 = arith.truncf %199 : vector<16x32xf32> to vector<16x32xbf16>
    %c3_124 = arith.constant 3 : index
    %c0_125 = arith.constant 0 : index
    %c0_126 = arith.constant 0 : index
    %201 = vector.load %arg10[%c3_124, %c0_125, %c0_126] : memref<4x32x128xbf16, #tpu.memory_space<vmem>>, vector<1x32x128xbf16>
    %202 = vector.shape_cast %201 : vector<1x32x128xbf16> to vector<32x128xbf16>
    %cst_127 = arith.constant dense<0.000000e+00> : vector<16x128xf32>
    %203 = tpu.matmul %200, %202, %cst_127 {dimension_numbers = #tpu.dot_dimension_numbers<[1], [0], [0], [1], [0, 0, 1, 1], [], []>} : vector<16x32xbf16>, vector<32x128xbf16>, vector<16x128xf32> -> vector<16x128xf32>
    %204 = arith.addf %160, %203 : vector<16x128xf32>
    %205 = arith.addf %2, %204 : vector<16x128xf32>
    %c0_128 = arith.constant 0 : index
    %c0_129 = arith.constant 0 : index
    %206 = vector.load %arg11[%c0_128, %c0_129] : memref<1x128xf32, #tpu.memory_space<vmem>>, vector<1x128xf32>
    %207 = vector.broadcast %206 : vector<1x128xf32> to vector<16x128xf32>
    %208 = arith.addf %205, %207 : vector<16x128xf32>
    %209 = arith.truncf %208 : vector<16x128xf32> to vector<16x128xbf16>
    %c0_130 = arith.constant 0 : index
    %c0_131 = arith.constant 0 : index
    %c0_132 = arith.constant 0 : index
    %210 = vector.load %arg12[%c0_130, %c0_131, %c0_132] : memref<1x16x128xbf16, #tpu.memory_space<vmem>>, vector<1x16x128xbf16>
    %211 = vector.shape_cast %210 : vector<1x16x128xbf16> to vector<16x128xbf16>
    %212 = vector.shape_cast %209 : vector<16x128xbf16> to vector<1x16x128xbf16>
    tpu.vector_store %arg12[%c0_130, %c0_131, %c0_132], %212 {strides = array<i32>} : memref<1x16x128xbf16, #tpu.memory_space<vmem>>, vector<1x16x128xbf16>,
    return
  }
  func.func @transform_0(%arg0: i32) -> (i32, i32, i32) {
    %c0_i32 = arith.constant 0 : i32
    %c0_i32_0 = arith.constant 0 : i32
    %c0_i32_1 = arith.constant 0 : i32
    return %arg0, %c0_i32, %c0_i32_0 : i32, i32, i32
  }
  func.func @transform_1(%arg0: i32) -> (i32, i32) {
    %c0_i32 = arith.constant 0 : i32
    %c0_i32_0 = arith.constant 0 : i32
    %c0_i32_1 = arith.constant 0 : i32
    return %c0_i32, %c0_i32_0 : i32, i32
  }
  func.func @transform_2(%arg0: i32) -> (i32, i32) {
    %c0_i32 = arith.constant 0 : i32
    %c0_i32_0 = arith.constant 0 : i32
    %c0_i32_1 = arith.constant 0 : i32
    return %c0_i32, %c0_i32_0 : i32, i32
  }
  func.func @transform_3(%arg0: i32) -> (i32, i32, i32) {
    %c0_i32 = arith.constant 0 : i32
    %c0_i32_0 = arith.constant 0 : i32
    %c0_i32_1 = arith.constant 0 : i32
    %c0_i32_2 = arith.constant 0 : i32
    return %c0_i32, %c0_i32_0, %c0_i32_1 : i32, i32, i32
  }
  func.func @transform_4(%arg0: i32) -> (i32, i32, i32) {
    %c0_i32 = arith.constant 0 : i32
    %c0_i32_0 = arith.constant 0 : i32
    %c0_i32_1 = arith.constant 0 : i32
    %c0_i32_2 = arith.constant 0 : i32
    return %c0_i32, %c0_i32_0, %c0_i32_1 : i32, i32, i32
  }
  func.func @transform_5(%arg0: i32) -> (i32, i32, i32) {
    %c0_i32 = arith.constant 0 : i32
    %c0_i32_0 = arith.constant 0 : i32
    %c0_i32_1 = arith.constant 0 : i32
    %c0_i32_2 = arith.constant 0 : i32
    return %c0_i32, %c0_i32_0, %c0_i32_1 : i32, i32, i32
  }
  func.func @transform_6(%arg0: i32) -> (i32, i32, i32) {
    %c0_i32 = arith.constant 0 : i32
    %c0_i32_0 = arith.constant 0 : i32
    %c0_i32_1 = arith.constant 0 : i32
    %c0_i32_2 = arith.constant 0 : i32
    return %c0_i32, %c0_i32_0, %c0_i32_1 : i32, i32, i32
  }
  func.func @transform_7(%arg0: i32) -> (i32, i32, i32) {
    %c0_i32 = arith.constant 0 : i32
    %c0_i32_0 = arith.constant 0 : i32
    %c0_i32_1 = arith.constant 0 : i32
    %c0_i32_2 = arith.constant 0 : i32
    return %c0_i32, %c0_i32_0, %c0_i32_1 : i32, i32, i32
  }
  func.func @transform_8(%arg0: i32) -> (i32, i32, i32) {
    %c0_i32 = arith.constant 0 : i32
    %c0_i32_0 = arith.constant 0 : i32
    %c0_i32_1 = arith.constant 0 : i32
    %c0_i32_2 = arith.constant 0 : i32
    return %c0_i32, %c0_i32_0, %c0_i32_1 : i32, i32, i32
  }
  func.func @transform_9(%arg0: i32) -> (i32, i32, i32) {
    %c0_i32 = arith.constant 0 : i32
    %c0_i32_0 = arith.constant 0 : i32
    %c0_i32_1 = arith.constant 0 : i32
    %c0_i32_2 = arith.constant 0 : i32
    return %c0_i32, %c0_i32_0, %c0_i32_1 : i32, i32, i32
  }
  func.func @transform_10(%arg0: i32) -> (i32, i32) {
    %c0_i32 = arith.constant 0 : i32
    %c0_i32_0 = arith.constant 0 : i32
    %c0_i32_1 = arith.constant 0 : i32
    return %c0_i32, %c0_i32_0 : i32, i32
  }
  func.func @transform_11(%arg0: i32) -> (i32, i32, i32) {
    %c0_i32 = arith.constant 0 : i32
    %c0_i32_0 = arith.constant 0 : i32
    %c0_i32_1 = arith.constant 0 : i32
    return %arg0, %c0_i32, %c0_i32_0 : i32, i32, i32
  }
}

module attributes {stable_mosaic.version = 11 : i64} {
  func.func @_ff_kernel(%arg0: i32, %arg1: memref<16x128xbf16, #tpu.memory_space<vmem>>, %arg2: memref<1x128xf32, #tpu.memory_space<vmem>>, %arg3: memref<1x128xf32, #tpu.memory_space<vmem>>, %arg4: memref<128x512xbf16, #tpu.memory_space<vmem>>, %arg5: memref<1x512xf32, #tpu.memory_space<vmem>>, %arg6: memref<512x128xbf16, #tpu.memory_space<vmem>>, %arg7: memref<1x128xf32, #tpu.memory_space<vmem>>, %arg8: memref<16x128xbf16, #tpu.memory_space<vmem>>) attributes {dimension_semantics = [#tpu.dimension_semantics<parallel>], iteration_bounds = array<i64: 2>, scalar_prefetch = 0 : i64, scratch_operands = 0 : i64, tpu.core_type = #tpu.core_type<tc>, window_params = [{transform_indices = @transform_0, window_bounds = array<i64: 16, 128>}, {pipeline_mode = #tpu.pipeline_mode<synchronous>, transform_indices = @transform_1, window_bounds = array<i64: 1, 128>}, {pipeline_mode = #tpu.pipeline_mode<synchronous>, transform_indices = @transform_2, window_bounds = array<i64: 1, 128>}, {pipeline_mode = #tpu.pipeline_mode<synchronous>, transform_indices = @transform_3, window_bounds = array<i64: 128, 512>}, {pipeline_mode = #tpu.pipeline_mode<synchronous>, transform_indices = @transform_4, window_bounds = array<i64: 1, 512>}, {pipeline_mode = #tpu.pipeline_mode<synchronous>, transform_indices = @transform_5, window_bounds = array<i64: 512, 128>}, {pipeline_mode = #tpu.pipeline_mode<synchronous>, transform_indices = @transform_6, window_bounds = array<i64: 1, 128>}, {transform_indices = @transform_7, window_bounds = array<i64: 16, 128>}]} {
    %c0 = arith.constant 0 : index
    %c0_0 = arith.constant 0 : index
    %0 = vector.load %arg1[%c0, %c0_0] : memref<16x128xbf16, #tpu.memory_space<vmem>>, vector<16x128xbf16>
    %1 = arith.extf %0 : vector<16x128xbf16> to vector<16x128xf32>
    %cst = arith.constant dense<0.000000e+00> : vector<16xf32>
    %2 = vector.multi_reduction <add>, %1, %cst [1] : vector<16x128xf32> to vector<16xf32>
    %3 = vector.shape_cast %2 : vector<16xf32> to vector<16x1xf32>
    %cst_1 = arith.constant 1.280000e+02 : f32
    %4 = vector.broadcast %cst_1 : f32 to vector<16x1xf32>
    %5 = arith.divf %3, %4 : vector<16x1xf32>
    %6 = vector.broadcast %5 : vector<16x1xf32> to vector<16x128xf32>
    %7 = arith.subf %1, %6 : vector<16x128xf32>
    %8 = arith.mulf %7, %7 : vector<16x128xf32>
    %cst_2 = arith.constant dense<0.000000e+00> : vector<16xf32>
    %9 = vector.multi_reduction <add>, %8, %cst_2 [1] : vector<16x128xf32> to vector<16xf32>
    %10 = vector.shape_cast %9 : vector<16xf32> to vector<16x1xf32>
    %cst_3 = arith.constant 1.280000e+02 : f32
    %11 = vector.broadcast %cst_3 : f32 to vector<16x1xf32>
    %12 = arith.divf %10, %11 : vector<16x1xf32>
    %13 = vector.broadcast %5 : vector<16x1xf32> to vector<16x128xf32>
    %14 = arith.subf %1, %13 : vector<16x128xf32>
    %cst_4 = arith.constant 9.99999974E-6 : f32
    %15 = vector.broadcast %cst_4 : f32 to vector<16x1xf32>
    %16 = arith.addf %12, %15 : vector<16x1xf32>
    %17 = math.rsqrt %16 : vector<16x1xf32>
    %18 = vector.broadcast %17 : vector<16x1xf32> to vector<16x128xf32>
    %19 = arith.mulf %14, %18 : vector<16x128xf32>
    %c0_5 = arith.constant 0 : index
    %c0_6 = arith.constant 0 : index
    %20 = vector.load %arg2[%c0_5, %c0_6] : memref<1x128xf32, #tpu.memory_space<vmem>>, vector<1x128xf32>
    %21 = vector.broadcast %20 : vector<1x128xf32> to vector<16x128xf32>
    %22 = arith.mulf %19, %21 : vector<16x128xf32>
    %c0_7 = arith.constant 0 : index
    %c0_8 = arith.constant 0 : index
    %23 = vector.load %arg3[%c0_7, %c0_8] : memref<1x128xf32, #tpu.memory_space<vmem>>, vector<1x128xf32>
    %24 = vector.broadcast %23 : vector<1x128xf32> to vector<16x128xf32>
    %25 = arith.addf %22, %24 : vector<16x128xf32>
    %26 = arith.truncf %25 : vector<16x128xf32> to vector<16x128xbf16>
    %c0_9 = arith.constant 0 : index
    %c0_10 = arith.constant 0 : index
    %27 = vector.load %arg4[%c0_9, %c0_10] : memref<128x512xbf16, #tpu.memory_space<vmem>>, vector<128x512xbf16>
    %cst_11 = arith.constant dense<0.000000e+00> : vector<16x512xf32>
    %28 = tpu.matmul %26, %27, %cst_11 {dimension_numbers = #tpu.dot_dimension_numbers<[1], [0], [0], [1], [0, 0, 1, 1], [], []>} : vector<16x128xbf16>, vector<128x512xbf16>, vector<16x512xf32> -> vector<16x512xf32>
    %c0_12 = arith.constant 0 : index
    %c0_13 = arith.constant 0 : index
    %29 = vector.load %arg5[%c0_12, %c0_13] : memref<1x512xf32, #tpu.memory_space<vmem>>, vector<1x512xf32>
    %30 = vector.broadcast %29 : vector<1x512xf32> to vector<16x512xf32>
    %31 = arith.addf %28, %30 : vector<16x512xf32>
    %32 = arith.mulf %31, %31 : vector<16x512xf32>
    %33 = arith.mulf %31, %32 : vector<16x512xf32>
    %cst_14 = arith.constant 4.471500e-02 : f32
    %34 = vector.broadcast %cst_14 : f32 to vector<16x512xf32>
    %35 = arith.mulf %34, %33 : vector<16x512xf32>
    %36 = arith.addf %31, %35 : vector<16x512xf32>
    %cst_15 = arith.constant 0.797884583 : f32
    %37 = vector.broadcast %cst_15 : f32 to vector<16x512xf32>
    %38 = arith.mulf %37, %36 : vector<16x512xf32>
    %39 = math.tanh %38 : vector<16x512xf32>
    %cst_16 = arith.constant 1.000000e+00 : f32
    %40 = vector.broadcast %cst_16 : f32 to vector<16x512xf32>
    %41 = arith.addf %40, %39 : vector<16x512xf32>
    %cst_17 = arith.constant 5.000000e-01 : f32
    %42 = vector.broadcast %cst_17 : f32 to vector<16x512xf32>
    %43 = arith.mulf %42, %41 : vector<16x512xf32>
    %44 = arith.mulf %31, %43 : vector<16x512xf32>
    %45 = arith.truncf %44 : vector<16x512xf32> to vector<16x512xbf16>
    %c0_18 = arith.constant 0 : index
    %c0_19 = arith.constant 0 : index
    %46 = vector.load %arg6[%c0_18, %c0_19] : memref<512x128xbf16, #tpu.memory_space<vmem>>, vector<512x128xbf16>
    %cst_20 = arith.constant dense<0.000000e+00> : vector<16x128xf32>
    %47 = tpu.matmul %45, %46, %cst_20 {dimension_numbers = #tpu.dot_dimension_numbers<[1], [0], [0], [1], [0, 0, 1, 1], [], []>} : vector<16x512xbf16>, vector<512x128xbf16>, vector<16x128xf32> -> vector<16x128xf32>
    %c0_21 = arith.constant 0 : index
    %c0_22 = arith.constant 0 : index
    %48 = vector.load %arg7[%c0_21, %c0_22] : memref<1x128xf32, #tpu.memory_space<vmem>>, vector<1x128xf32>
    %49 = vector.broadcast %48 : vector<1x128xf32> to vector<16x128xf32>
    %50 = arith.addf %47, %49 : vector<16x128xf32>
    %51 = arith.addf %1, %50 : vector<16x128xf32>
    %52 = arith.truncf %51 : vector<16x128xf32> to vector<16x128xbf16>
    %c0_23 = arith.constant 0 : index
    %c0_24 = arith.constant 0 : index
    %53 = vector.load %arg8[%c0_23, %c0_24] : memref<16x128xbf16, #tpu.memory_space<vmem>>, vector<16x128xbf16>
    tpu.vector_store %arg8[%c0_23, %c0_24], %52 {strides = array<i32>} : memref<16x128xbf16, #tpu.memory_space<vmem>>, vector<16x128xbf16>,
    return
  }
  func.func @transform_0(%arg0: i32) -> (i32, i32) {
    %c0_i32 = arith.constant 0 : i32
    %c0_i32_0 = arith.constant 0 : i32
    return %arg0, %c0_i32 : i32, i32
  }
  func.func @transform_1(%arg0: i32) -> (i32, i32) {
    %c0_i32 = arith.constant 0 : i32
    %c0_i32_0 = arith.constant 0 : i32
    %c0_i32_1 = arith.constant 0 : i32
    return %c0_i32, %c0_i32_0 : i32, i32
  }
  func.func @transform_2(%arg0: i32) -> (i32, i32) {
    %c0_i32 = arith.constant 0 : i32
    %c0_i32_0 = arith.constant 0 : i32
    %c0_i32_1 = arith.constant 0 : i32
    return %c0_i32, %c0_i32_0 : i32, i32
  }
  func.func @transform_3(%arg0: i32) -> (i32, i32) {
    %c0_i32 = arith.constant 0 : i32
    %c0_i32_0 = arith.constant 0 : i32
    %c0_i32_1 = arith.constant 0 : i32
    return %c0_i32, %c0_i32_0 : i32, i32
  }
  func.func @transform_4(%arg0: i32) -> (i32, i32) {
    %c0_i32 = arith.constant 0 : i32
    %c0_i32_0 = arith.constant 0 : i32
    %c0_i32_1 = arith.constant 0 : i32
    return %c0_i32, %c0_i32_0 : i32, i32
  }
  func.func @transform_5(%arg0: i32) -> (i32, i32) {
    %c0_i32 = arith.constant 0 : i32
    %c0_i32_0 = arith.constant 0 : i32
    %c0_i32_1 = arith.constant 0 : i32
    return %c0_i32, %c0_i32_0 : i32, i32
  }
  func.func @transform_6(%arg0: i32) -> (i32, i32) {
    %c0_i32 = arith.constant 0 : i32
    %c0_i32_0 = arith.constant 0 : i32
    %c0_i32_1 = arith.constant 0 : i32
    return %c0_i32, %c0_i32_0 : i32, i32
  }
  func.func @transform_7(%arg0: i32) -> (i32, i32) {
    %c0_i32 = arith.constant 0 : i32
    %c0_i32_0 = arith.constant 0 : i32
    return %arg0, %c0_i32 : i32, i32
  }
}

module attributes {stable_mosaic.version = 11 : i64} {
  func.func @_linear_kernel(%arg0: i32, %arg1: memref<16x128xbf16, #tpu.memory_space<vmem>>, %arg2: memref<128x256xbf16, #tpu.memory_space<vmem>>, %arg3: memref<1x256xf32, #tpu.memory_space<vmem>>, %arg4: memref<16x256xbf16, #tpu.memory_space<vmem>>) attributes {dimension_semantics = [#tpu.dimension_semantics<parallel>], iteration_bounds = array<i64: 2>, scalar_prefetch = 0 : i64, scratch_operands = 0 : i64, tpu.core_type = #tpu.core_type<tc>, window_params = [{transform_indices = @transform_0, window_bounds = array<i64: 16, 128>}, {pipeline_mode = #tpu.pipeline_mode<synchronous>, transform_indices = @transform_1, window_bounds = array<i64: 128, 256>}, {pipeline_mode = #tpu.pipeline_mode<synchronous>, transform_indices = @transform_2, window_bounds = array<i64: 1, 256>}, {transform_indices = @transform_3, window_bounds = array<i64: 16, 256>}]} {
    %c0 = arith.constant 0 : index
    %c0_0 = arith.constant 0 : index
    %0 = vector.load %arg1[%c0, %c0_0] : memref<16x128xbf16, #tpu.memory_space<vmem>>, vector<16x128xbf16>
    %c0_1 = arith.constant 0 : index
    %c0_2 = arith.constant 0 : index
    %1 = vector.load %arg2[%c0_1, %c0_2] : memref<128x256xbf16, #tpu.memory_space<vmem>>, vector<128x256xbf16>
    %cst = arith.constant dense<0.000000e+00> : vector<16x256xf32>
    %2 = tpu.matmul %0, %1, %cst {dimension_numbers = #tpu.dot_dimension_numbers<[1], [0], [0], [1], [0, 0, 1, 1], [], []>} : vector<16x128xbf16>, vector<128x256xbf16>, vector<16x256xf32> -> vector<16x256xf32>
    %c0_3 = arith.constant 0 : index
    %c0_4 = arith.constant 0 : index
    %3 = vector.load %arg3[%c0_3, %c0_4] : memref<1x256xf32, #tpu.memory_space<vmem>>, vector<1x256xf32>
    %4 = vector.broadcast %3 : vector<1x256xf32> to vector<16x256xf32>
    %5 = arith.addf %2, %4 : vector<16x256xf32>
    %6 = arith.truncf %5 : vector<16x256xf32> to vector<16x256xbf16>
    %c0_5 = arith.constant 0 : index
    %c0_6 = arith.constant 0 : index
    %7 = vector.load %arg4[%c0_5, %c0_6] : memref<16x256xbf16, #tpu.memory_space<vmem>>, vector<16x256xbf16>
    tpu.vector_store %arg4[%c0_5, %c0_6], %6 {strides = array<i32>} : memref<16x256xbf16, #tpu.memory_space<vmem>>, vector<16x256xbf16>,
    return
  }
  func.func @transform_0(%arg0: i32) -> (i32, i32) {
    %c0_i32 = arith.constant 0 : i32
    %c0_i32_0 = arith.constant 0 : i32
    return %arg0, %c0_i32 : i32, i32
  }
  func.func @transform_1(%arg0: i32) -> (i32, i32) {
    %c0_i32 = arith.constant 0 : i32
    %c0_i32_0 = arith.constant 0 : i32
    %c0_i32_1 = arith.constant 0 : i32
    return %c0_i32, %c0_i32_0 : i32, i32
  }
  func.func @transform_2(%arg0: i32) -> (i32, i32) {
    %c0_i32 = arith.constant 0 : i32
    %c0_i32_0 = arith.constant 0 : i32
    %c0_i32_1 = arith.constant 0 : i32
    return %c0_i32, %c0_i32_0 : i32, i32
  }
  func.func @transform_3(%arg0: i32) -> (i32, i32) {
    %c0_i32 = arith.constant 0 : i32
    %c0_i32_0 = arith.constant 0 : i32
    return %arg0, %c0_i32 : i32, i32
  }
}

module attributes {stable_mosaic.version = 11 : i64} {
  func.func @_linear_kernel(%arg0: i32, %arg1: memref<32x128xbf16, #tpu.memory_space<vmem>>, %arg2: memref<128x256xbf16, #tpu.memory_space<vmem>>, %arg3: memref<1x256xf32, #tpu.memory_space<vmem>>, %arg4: memref<32x256xf32, #tpu.memory_space<vmem>>) attributes {dimension_semantics = [#tpu.dimension_semantics<parallel>], iteration_bounds = array<i64: 2>, scalar_prefetch = 0 : i64, scratch_operands = 0 : i64, tpu.core_type = #tpu.core_type<tc>, window_params = [{transform_indices = @transform_0, window_bounds = array<i64: 32, 128>}, {pipeline_mode = #tpu.pipeline_mode<synchronous>, transform_indices = @transform_1, window_bounds = array<i64: 128, 256>}, {pipeline_mode = #tpu.pipeline_mode<synchronous>, transform_indices = @transform_2, window_bounds = array<i64: 1, 256>}, {transform_indices = @transform_3, window_bounds = array<i64: 32, 256>}]} {
    %c0 = arith.constant 0 : index
    %c0_0 = arith.constant 0 : index
    %0 = vector.load %arg1[%c0, %c0_0] : memref<32x128xbf16, #tpu.memory_space<vmem>>, vector<32x128xbf16>
    %c0_1 = arith.constant 0 : index
    %c0_2 = arith.constant 0 : index
    %1 = vector.load %arg2[%c0_1, %c0_2] : memref<128x256xbf16, #tpu.memory_space<vmem>>, vector<128x256xbf16>
    %cst = arith.constant dense<0.000000e+00> : vector<32x256xf32>
    %2 = tpu.matmul %0, %1, %cst {dimension_numbers = #tpu.dot_dimension_numbers<[1], [0], [0], [1], [0, 0, 1, 1], [], []>} : vector<32x128xbf16>, vector<128x256xbf16>, vector<32x256xf32> -> vector<32x256xf32>
    %c0_3 = arith.constant 0 : index
    %c0_4 = arith.constant 0 : index
    %3 = vector.load %arg3[%c0_3, %c0_4] : memref<1x256xf32, #tpu.memory_space<vmem>>, vector<1x256xf32>
    %4 = vector.broadcast %3 : vector<1x256xf32> to vector<32x256xf32>
    %5 = arith.addf %2, %4 : vector<32x256xf32>
    %c0_5 = arith.constant 0 : index
    %c0_6 = arith.constant 0 : index
    %6 = vector.load %arg4[%c0_5, %c0_6] : memref<32x256xf32, #tpu.memory_space<vmem>>, vector<32x256xf32>
    tpu.vector_store %arg4[%c0_5, %c0_6], %5 {strides = array<i32>} : memref<32x256xf32, #tpu.memory_space<vmem>>, vector<32x256xf32>,
    return
  }
  func.func @transform_0(%arg0: i32) -> (i32, i32) {
    %c0_i32 = arith.constant 0 : i32
    %c0_i32_0 = arith.constant 0 : i32
    return %arg0, %c0_i32 : i32, i32
  }
  func.func @transform_1(%arg0: i32) -> (i32, i32) {
    %c0_i32 = arith.constant 0 : i32
    %c0_i32_0 = arith.constant 0 : i32
    %c0_i32_1 = arith.constant 0 : i32
    return %c0_i32, %c0_i32_0 : i32, i32
  }
  func.func @transform_2(%arg0: i32) -> (i32, i32) {
    %c0_i32 = arith.constant 0 : i32
    %c0_i32_0 = arith.constant 0 : i32
    %c0_i32_1 = arith.constant 0 : i32
    return %c0_i32, %c0_i32_0 : i32, i32
  }
  func.func @transform_3(%arg0: i32) -> (i32, i32) {
    %c0_i32 = arith.constant 0 : i32
    %c0_i32_0 = arith.constant 0 : i32
    return %arg0, %c0_i32 : i32, i32
  }
}

</mosaic_0001>

<bundles_post_ra>
// kernel: decoder_forward.15
= control target key start
LH: loop header
LB: loop body
LE: loop exit
PB: predicated region body
PF: predicated region fallthrough
CT: control target
= control target key end

     0   :  { %s481_s12 = smov 0   ;;  %s605_s0 = inlined_call_operand.vmem [shape: bf16[16,128], index: 0, kind: input, shape index: {}]   ;;  %s606_s1 = inlined_call_operand.vmem [shape: bf16[128,256], index: 1, kind: input, shape index: {}]   ;;  %s607_s2 = inlined_call_operand.vmem [shape: f32[1,256], index: 2, kind: input, shape index: {}]   ;;  %s608_s3 = inlined_call_operand.vmem [shape: bf16[16,256], index: 3, kind: output, shape index: {}]  }
   0x1 LB: > { %s354_s13 = sadd.s32 4294967295, %s459_s12   ;;  %p358_p0 = scmp.ge.s32.totalorder %s459_s12, 1  ;;  %s459_s12 = sphi %s481_s12, %s13_s12  }
   0x2   : > { %p136_p1 = scmp.lt.s32.totalorder %s459_s12, 3 }
   0x4   : > { %p137_p2 = pnand %p358_p0, %p136_p1 }
   0x5   : > { %p159_p3 = scmp.lt.s32.totalorder (!%p137_p2), %s354_s13, 1 }
   0x6   : > { %140 = sbr.rel (%p137_p2) target bundleno = 180 (0xb4), region = 32 }
   0xb   : > { %v420_v0 = vld [vmem:[%s606_s1 + $0x70] sm:$0xf]  ;;  %v444_v1 = vld [vmem:[%s606_s1 + $0x74] sm:$0xf0]  ;;  %v443_v2 = vld [vmem:[%s606_s1 + $0x74] sm:$0xf] }
   0xc   : > { %v421_v3 = vor.u32 %v444_v1, %v420_v0  ;;  %v422_v4 = vld [vmem:[%s606_s1 + $0x78] sm:$0xf0]  ;;  %v412_v5 = vld [vmem:[%s606_s1 + $0x60] sm:$0xf]  ;;  %v442_v6 = vld [vmem:[%s606_s1 + $0x64] sm:$0xf0] }
   0xd   : > { %v425_v7 = vor.u32 %v443_v2, %v422_v4  ;;  %v441_v8 = vld [vmem:[%s606_s1 + $0x64] sm:$0xf]  ;;  %v414_v9 = vld [vmem:[%s606_s1 + $0x68] sm:$0xf0]  ;;  %v413_v10 = vor.u32 %v442_v6, %v412_v5  ;;  %v404_v12 = vld [vmem:[%s606_s1 + $0x50] sm:$0xf] }
   0xe   : > { %271 = vmatpush.bf16.msra.mxu0 %v421_v3  ;;  %v417_v11 = vor.u32 %v441_v8, %v414_v9  ;;  %v440_v13 = vld [vmem:[%s606_s1 + $0x54] sm:$0xf0]  ;;  %v439_v14 = vld [vmem:[%s606_s1 + $0x54] sm:$0xf]  ;;  %v406_v15 = vld [vmem:[%s606_s1 + $0x58] sm:$0xf0] }
   0xf   : > { %284 = vmatpush.bf16.msra.mxu1 %v425_v7  ;;  %v405_v16 = vor.u32 %v440_v13, %v404_v12  ;;  %v409_v17 = vor.u32 %v439_v14, %v406_v15  ;;  %v396_v18 = vld [vmem:[%s606_s1 + $0x40] sm:$0xf]  ;;  %v438_v19 = vld [vmem:[%s606_s1 + $0x44] sm:$0xf0]  ;;  %v437_v20 = vld [vmem:[%s606_s1 + $0x44] sm:$0xf] }
  0x10   : > { %v398_v21 = vld [vmem:[%s606_s1 + $0x48] sm:$0xf0]  ;;  %v397_v22 = vor.u32 %v438_v19, %v396_v18  ;;  %v388_v24 = vld [vmem:[%s606_s1 + $0x30] sm:$0xf]  ;;  %v436_v25 = vld [vmem:[%s606_s1 + $0x34] sm:$0xf0] }
  0x11   : > { %v401_v23 = vor.u32 %v437_v20, %v398_v21  ;;  %v435_v26 = vld [vmem:[%s606_s1 + $0x34] sm:$0xf]  ;;  %v390_v27 = vld [vmem:[%s606_s1 + $0x38] sm:$0xf0]  ;;  %v389_v28 = vor.u32 %v436_v25, %v388_v24  ;;  %v380_v30 = vld [vmem:[%s606_s1 + $0x20] sm:$0xf] }
  0x12   : > { %272 = vmatpush.bf16.msra.mxu0 %v413_v10  ;;  %v393_v29 = vor.u32 %v435_v26, %v390_v27  ;;  %v434_v31 = vld [vmem:[%s606_s1 + $0x24] sm:$0xf0]  ;;  %v433_v32 = vld [vmem:[%s606_s1 + $0x24] sm:$0xf]  ;;  %v382_v33 = vld [vmem:[%s606_s1 + $0x28] sm:$0xf0] }
  0x13   : > { %285 = vmatpush.bf16.msra.mxu1 %v417_v11  ;;  %v381_v34 = vor.u32 %v434_v31, %v380_v30  ;;  %v385_v35 = vor.u32 %v433_v32, %v382_v33  ;;  %v372_v36 = vld [vmem:[%s606_s1 + $0x10] sm:$0xf]  ;;  %v432_v37 = vld [vmem:[%s606_s1 + $0x14] sm:$0xf0]  ;;  %v431_v38 = vld [vmem:[%s606_s1 + $0x14] sm:$0xf] }
  0x14   : > { %v374_v39 = vld [vmem:[%s606_s1 + $0x18] sm:$0xf0]  ;;  %s610_s13 = smov (!%p159_p3, %s354_s13), 1  ;;  %v373_v40 = vor.u32 %v432_v37, %v372_v36  ;;  %v364_v42 = vld [vmem:[%s606_s1] sm:$0xf] }
  0x15   : > { %v377_v41 = vor.u32 %v431_v38, %v374_v39  ;;  %v430_v43 = vld [vmem:[%s606_s1 + $0x4] sm:$0xf0]  ;;  %v429_v44 = vld [vmem:[%s606_s1 + $0x4] sm:$0xf]  ;;  %v366_v45 = vld [vmem:[%s606_s1 + $0x8] sm:$0xf0] }
  0x16   : > { %273 = vmatpush.bf16.msra.mxu0 %v405_v16  ;;  %s359_s28 = sshll.u32 %s610_s13, 2  ;;  %v365_v46 = vor.u32 %v430_v43, %v364_v42  ;;  %v369_v47 = vor.u32 %v429_v44, %v366_v45  ;;  %v185_v49 = vld [vmem:[%s607_s2] sm:$0x3]  ;;  %s428_s7 = sshll.u32 %s610_s13, 3 }
  0x17   : > { %286 = vmatpush.bf16.msra.mxu1 %v409_v17  ;;  %s162_s4 = scalar_lea.vmem %s605_s0, %s359_s28  ;;  %v187_v50 = vperm.slane %v185_v49, 0  ;;  %v188_v51 = vperm.slane %v185_v49, 1  ;;  %s167_s10 = scalar_lea.vmem %s608_s3, %s428_s7 }
  0x18   : > { %v168_v48 = vld [vmem:[%s162_s4] sm:$0xf] }
  0x1a   : > { %274 = vmatpush.bf16.msra.mxu0 %v397_v22 }
  0x1b   : > { %287 = vmatpush.bf16.msra.mxu1 %v401_v23 }
  0x1e   : > { %275 = vmatpush.bf16.msra.mxu0 %v389_v28 }
  0x1f   : > { %288 = vmatpush.bf16.msra.mxu1 %v393_v29 }
  0x22   : > { %276 = vmatpush.bf16.msra.mxu0 %v381_v34 }
  0x23   : > { %289 = vmatpush.bf16.msra.mxu1 %v385_v35 }
  0x26   : > { %277 = vmatpush.bf16.msra.mxu0 %v373_v40 }
  0x27   : > { %290 = vmatpush.bf16.msra.mxu1 %v377_v41 }
  0x2a   : > { %278 = vmatpush.bf16.msra.mxu0 %v365_v46 }
  0x2b   : > { %291 = vmatpush.bf16.msra.mxu1 %v369_v47 }
  0x2d   : > { %279 = vmatmul.bf16.vlgmr.msra.gmra.mxu0 %v168_v48 }
  0x2e   : > { %292 = vmatmul.bf16.vlgmr.msra.gmra.mxu1 %v168_v48 }
  0xaa   : > { %v280_v52 = vpop.f32.mrf.mxu0 }
  0xab   : > { %v281_v53 = vadd.f32 %v280_v52, %v187_v50  ;;  %v293_v54 = vpop.f32.mrf.mxu1 }
  0xac   : > { %v294_v55 = vadd.f32 %v293_v54, %v188_v51 }
  0xae   : > { %v297_v56 = vpack.c.bf16 %v294_v55, %v281_v53 }
  0xb0   : > { %298 = vst [vmem:[%s167_s10] sm:$0xff] %v297_v56 }
  0xb2   : > { %v282_v57 = vpop.f32.mrf.mxu0 }
  0xb3   : > { %v295_v58 = vpop.f32.mrf.mxu1 }
  0xb4 PF: > { %s13_s12 = sadd.s32 1, %s459_s12  }
  0xb5   : > { %p10_p4 = scmp.ge.s32.totalorder %s13_s12, 4  }
  0xb7   :  { %12 = sbr.rel (!%p10_p4) target bundleno = 1 (0x1), region = 62 }

// kernel: decoder_forward.12
= control target key start
LH: loop header
LB: loop body
LE: loop exit
PB: predicated region body
PF: predicated region fallthrough
CT: control target
= control target key end

     0   :  { %s1378_s24 = smov 0   ;;  %s1716_s0 = inlined_call_operand.vmem [shape: bf16[16,128], index: 0, kind: input, shape index: {}]   ;;  %s1717_s1 = inlined_call_operand.vmem [shape: f32[1,128], index: 1, kind: input, shape index: {}]   ;;  %s1718_s2 = inlined_call_operand.vmem [shape: f32[1,128], index: 2, kind: input, shape index: {}]   ;;  %s1719_s3 = inlined_call_operand.vmem [shape: bf16[128,512], index: 3, kind: input, shape index: {}]   ;;  %s1720_s4 = inlined_call_operand.vmem [shape: f32[1,512], index: 4, kind: input, shape index: {}]   ;;  %s1721_s5 = inlined_call_operand.vmem [shape: bf16[512,128], index: 5, kind: input, shape index: {}]   ;;  %s1722_s6 = inlined_call_operand.vmem [shape: f32[1,128], index: 6, kind: input, shape index: {}]   ;;  %s1723_s7 = inlined_call_operand.vmem [shape: bf16[16,128], index: 7, kind: output, shape index: {}]  }
   0x1 LB: > { %s976_s25 = sadd.s32 4294967295, %s1335_s24   ;;  %p980_p0 = scmp.ge.s32.totalorder %s1335_s24, 1  ;;  %s1335_s24 = sphi %s1378_s24, %s17_s24  }
   0x2   : > { %p236_p1 = scmp.lt.s32.totalorder %s1335_s24, 3 }
   0x4   : > { %p237_p2 = pnand %p980_p0, %p236_p1 }
   0x5   : > { %p266_p3 = scmp.lt.s32.totalorder (!%p237_p2), %s976_s25, 1 }
   0x6   : > { %240 = sbr.rel (%p237_p2) target bundleno = 586 (0x24a), region = 48 }
   0xb   : > { %s1725_s25 = smov (!%p266_p3, %s976_s25), 1  ;;  %v1337_v2 = vmov 128.0   ;;  %v1097_v3 = vld [vmem:[%s1719_s3 + $0xe0] sm:$0xf]  ;;  %v1271_v4 = vld [vmem:[%s1719_s3 + $0xec] sm:$0xf0] }
   0xc   : > { %s981_s26 = sshll.u32 %s1725_s25, 2  ;;  %1317 = vrcp.f32 %v1337_v2  ;;  %v1269_v5 = vld [vmem:[%s1719_s3 + $0xe4] sm:$0xf]  ;;  %v1098_v6 = vor.u32 %v1271_v4, %v1097_v3  ;;  %v1099_v7 = vld [vmem:[%s1719_s3 + $0xf0] sm:$0xf0] }
   0xd   : > { %s269_s29 = scalar_lea.vmem %s1716_s0, %s981_s26  ;;  %v1105_v8 = vld [vmem:[%s1719_s3 + $0xe8] sm:$0xf]  ;;  %v1272_v9 = vld [vmem:[%s1719_s3 + $0xf4] sm:$0xf0]  ;;  %v1102_v10 = vor.u32 %v1269_v5, %v1099_v7  ;;  %v1270_v12 = vld [vmem:[%s1719_s3 + $0xec] sm:$0xf]  ;;  %s273_s9 = scalar_lea.vmem %s1723_s7, %s981_s26 }
   0xe   : > { %v274_v0 = vld [vmem:[%s269_s29] sm:$0xf]  ;;  %v1106_v11 = vor.u32 %v1272_v9, %v1105_v8  ;;  %v1107_v13 = vld [vmem:[%s1719_s3 + $0xf8] sm:$0xf0]  ;;  %516 = vmatpush.bf16.msra.mxu0 %v1098_v6  ;;  %v1267_v26 = vld [vmem:[%s1719_s3 + $0xcc] sm:$0xf0] }
   0xf   : > { %v1394_v1 = vunpack.c.l.bf16 %v274_v0  ;;  %v1110_v14 = vor.u32 %v1270_v12, %v1107_v13  ;;  %529 = vmatpush.bf16.msra.mxu1 %v1102_v10  ;;  %v1081_v25 = vld [vmem:[%s1719_s3 + $0xc0] sm:$0xf]  ;;  %v1265_v27 = vld [vmem:[%s1719_s3 + $0xc4] sm:$0xf]  ;;  %v1083_v29 = vld [vmem:[%s1719_s3 + $0xd0] sm:$0xf0] }
  0x10   : > { %542 = vmatpush.bf16.msra.mxu2 %v1106_v11  ;;  %v1082_v28 = vor.u32 %v1267_v26, %v1081_v25  ;;  %v1089_v30 = vld [vmem:[%s1719_s3 + $0xc8] sm:$0xf]  ;;  %v1268_v31 = vld [vmem:[%s1719_s3 + $0xd4] sm:$0xf0]  ;;  %v1086_v32 = vor.u32 %v1265_v27, %v1083_v29  ;;  %v1266_v34 = vld [vmem:[%s1719_s3 + $0xcc] sm:$0xf] }
  0x11   : > { %276 = vadd.xlane.f32.xlu0 %v1394_v1  ;;  %555 = vmatpush.bf16.msra.mxu3 %v1110_v14  ;;  %v1090_v33 = vor.u32 %v1268_v31, %v1089_v30  ;;  %v1091_v35 = vld [vmem:[%s1719_s3 + $0xd8] sm:$0xf0]  ;;  %v1065_v37 = vld [vmem:[%s1719_s3 + $0xa0] sm:$0xf]  ;;  %v1263_v38 = vld [vmem:[%s1719_s3 + $0xac] sm:$0xf0] }
  0x12   : > { %v1318_v15 = vpop.eup %1317  ;;  %517 = vmatpush.bf16.msra.mxu0 %v1082_v28  ;;  %v1094_v36 = vor.u32 %v1266_v34, %v1091_v35  ;;  %v1261_v39 = vld [vmem:[%s1719_s3 + $0xa4] sm:$0xf]  ;;  %v1066_v40 = vor.u32 %v1263_v38, %v1065_v37  ;;  %v1067_v41 = vld [vmem:[%s1719_s3 + $0xb0] sm:$0xf0]  ;;  %v1073_v42 = vld [vmem:[%s1719_s3 + $0xa8] sm:$0xf] }
  0x13   : > { %v279_v16 = vmul.f32 128.0, %v1318_v15  ;;  %vm283_vm0 = vweird.f32 %v1318_v15  ;;  %530 = vmatpush.bf16.msra.mxu1 %v1086_v32  ;;  %v1264_v43 = vld [vmem:[%s1719_s3 + $0xb4] sm:$0xf0]  ;;  %v1070_v44 = vor.u32 %v1261_v39, %v1067_v41  ;;  %v1262_v46 = vld [vmem:[%s1719_s3 + $0xac] sm:$0xf] }
  0x14   : > { %543 = vmatpush.bf16.msra.mxu2 %v1090_v33  ;;  %v1074_v45 = vor.u32 %v1264_v43, %v1073_v42  ;;  %v1075_v47 = vld [vmem:[%s1719_s3 + $0xb8] sm:$0xf0]  ;;  %v1049_v49 = vld [vmem:[%s1719_s3 + $0x80] sm:$0xf]  ;;  %v1259_v50 = vld [vmem:[%s1719_s3 + $0x8c] sm:$0xf0] }
  0x15   : > { %v280_v17 = vsub.f32 1.0, %v279_v16  ;;  %556 = vmatpush.bf16.msra.mxu3 %v1094_v36  ;;  %v1078_v48 = vor.u32 %v1262_v46, %v1075_v47  ;;  %v1257_v51 = vld [vmem:[%s1719_s3 + $0x84] sm:$0xf]  ;;  %v1050_v52 = vor.u32 %v1259_v50, %v1049_v49  ;;  %v1051_v53 = vld [vmem:[%s1719_s3 + $0x90] sm:$0xf0]  ;;  %v1280_v49 = vld [vmem:[%s1721_s5 + $0x38] sm:$0xff] }
  0x16   : > { %518 = vmatpush.bf16.msra.mxu0 %v1066_v40  ;;  %v1057_v54 = vld [vmem:[%s1719_s3 + $0x88] sm:$0xf]  ;;  %v1260_v55 = vld [vmem:[%s1719_s3 + $0x94] sm:$0xf0]  ;;  %v1054_v56 = vor.u32 %v1257_v51, %v1051_v53  ;;  %v1258_v58 = vld [vmem:[%s1719_s3 + $0x8c] sm:$0xf] }
  0x17   : > { %v281_v18 = vmul.f32 %v1318_v15, %v280_v17  ;;  %531 = vmatpush.bf16.msra.mxu1 %v1070_v44  ;;  %v1058_v57 = vor.u32 %v1260_v55, %v1057_v54  ;;  %v1059_v59 = vld [vmem:[%s1719_s3 + $0x98] sm:$0xf0]  ;;  %v1033_v61 = vld [vmem:[%s1719_s3 + $0x60] sm:$0xf]  ;;  %v1255_v62 = vld [vmem:[%s1719_s3 + $0x6c] sm:$0xf0] }
  0x18   : > { %544 = vmatpush.bf16.msra.mxu2 %v1074_v45  ;;  %v1062_v60 = vor.u32 %v1258_v58, %v1059_v59  ;;  %v1253_v63 = vld [vmem:[%s1719_s3 + $0x64] sm:$0xf]  ;;  %v1034_v0 = vor.u32 %v1255_v62, %v1033_v61  ;;  %v1035_v2 = vld [vmem:[%s1719_s3 + $0x70] sm:$0xf0]  ;;  %v1041_v3 = vld [vmem:[%s1719_s3 + $0x68] sm:$0xf] }
  0x19   : > { %v282_v19 = vadd.f32 %v1318_v15, %v281_v18  ;;  %557 = vmatpush.bf16.msra.mxu3 %v1078_v48  ;;  %v1256_v4 = vld [vmem:[%s1719_s3 + $0x74] sm:$0xf0]  ;;  %v1038_v5 = vor.u32 %v1253_v63, %v1035_v2  ;;  %v1254_v7 = vld [vmem:[%s1719_s3 + $0x6c] sm:$0xf]  ;;  %v1043_v8 = vld [vmem:[%s1719_s3 + $0x78] sm:$0xf0] }
  0x1a   : > { %519 = vmatpush.bf16.msra.mxu0 %v1050_v52  ;;  %v1042_v6 = vor.u32 %v1256_v4, %v1041_v3  ;;  %v1046_v9 = vor.u32 %v1254_v7, %v1043_v8  ;;  %v1017_v10 = vld [vmem:[%s1719_s3 + $0x40] sm:$0xf]  ;;  %v1251_v11 = vld [vmem:[%s1719_s3 + $0x4c] sm:$0xf0]  ;;  %v1249_v12 = vld [vmem:[%s1719_s3 + $0x44] sm:$0xf] }
  0x1b   : > { %v1421_v20 = vsel %vm283_vm0, %v1318_v15, %v282_v19  ;;  %532 = vmatpush.bf16.msra.mxu1 %v1054_v56  ;;  %v1018_v13 = vor.u32 %v1251_v11, %v1017_v10  ;;  %v1019_v14 = vld [vmem:[%s1719_s3 + $0x50] sm:$0xf0]  ;;  %v1025_v15 = vld [vmem:[%s1719_s3 + $0x48] sm:$0xf]  ;;  %v1252_v16 = vld [vmem:[%s1719_s3 + $0x54] sm:$0xf0] }
  0x1c   : > { %545 = vmatpush.bf16.msra.mxu2 %v1058_v57  ;;  %v1022_v17 = vor.u32 %v1249_v12, %v1019_v14  ;;  %v1026_v18 = vor.u32 %v1252_v16, %v1025_v15  ;;  %v1250_v19 = vld [vmem:[%s1719_s3 + $0x4c] sm:$0xf]  ;;  %v1247_v25 = vld [vmem:[%s1719_s3 + $0x2c] sm:$0xf0]  ;;  %v1245_v26 = vld [vmem:[%s1719_s3 + $0x24] sm:$0xf] }
  0x1d   : > { %558 = vmatpush.bf16.msra.mxu3 %v1062_v60  ;;  %v1003_v28 = vld [vmem:[%s1719_s3 + $0x30] sm:$0xf0]  ;;  %v1009_v29 = vld [vmem:[%s1719_s3 + $0x28] sm:$0xf]  ;;  %v1248_v30 = vld [vmem:[%s1719_s3 + $0x34] sm:$0xf0] }
  0x1e   : > { %520 = vmatpush.bf16.msra.mxu0 %v1034_v0  ;;  %v1006_v31 = vor.u32 %v1245_v26, %v1003_v28  ;;  %v1010_v32 = vor.u32 %v1248_v30, %v1009_v29  ;;  %v1246_v33 = vld [vmem:[%s1719_s3 + $0x2c] sm:$0xf]  ;;  %v1011_v34 = vld [vmem:[%s1719_s3 + $0x38] sm:$0xf0]  ;;  %v985_v35 = vld [vmem:[%s1719_s3] sm:$0xf] }
  0x1f   : > { %533 = vmatpush.bf16.msra.mxu1 %v1038_v5  ;;  %v1014_v36 = vor.u32 %v1246_v33, %v1011_v34  ;;  %v1243_v37 = vld [vmem:[%s1719_s3 + $0xc] sm:$0xf0]  ;;  %v1241_v38 = vld [vmem:[%s1719_s3 + $0x4] sm:$0xf]  ;;  %v987_v39 = vld [vmem:[%s1719_s3 + $0x10] sm:$0xf0] }
  0x20   : > { %546 = vmatpush.bf16.msra.mxu2 %v1042_v6  ;;  %v986_v40 = vor.u32 %v1243_v37, %v985_v35  ;;  %v990_v41 = vor.u32 %v1241_v38, %v987_v39  ;;  %v993_v42 = vld [vmem:[%s1719_s3 + $0x8] sm:$0xf]  ;;  %v1244_v43 = vld [vmem:[%s1719_s3 + $0x14] sm:$0xf0]  ;;  %v1242_v44 = vld [vmem:[%s1719_s3 + $0xc] sm:$0xf] }
  0x21   : > { %559 = vmatpush.bf16.msra.mxu3 %v1046_v9  ;;  %v994_v45 = vor.u32 %v1244_v43, %v993_v42  ;;  %v995_v46 = vld [vmem:[%s1719_s3 + $0x18] sm:$0xf0]  ;;  %v1314_v59 = vld [vmem:[%s1717_s1] ss:$0 sm:$0xff]  ;;  %v1279_v2 = vld [vmem:[%s1721_s5 + $0x30] sm:$0xff] }
  0x22   : > { %521 = vmatpush.bf16.msra.mxu0 %v1018_v13  ;;  %v998_v47 = vor.u32 %v1242_v44, %v995_v46  ;;  %v1288_v50 = vld [vmem:[%s1721_s5 + $0x78] sm:$0xff]  ;;  %v1315_v61 = vld [vmem:[%s1718_s2] ss:$0 sm:$0xff]  ;;  %v1287_v3 = vld [vmem:[%s1721_s5 + $0x70] sm:$0xff] }
  0x23   : > { %534 = vmatpush.bf16.msra.mxu1 %v1022_v17  ;;  %v1304_v4 = vld [vmem:[%s1721_s5 + $0xf8] sm:$0xff]  ;;  %v1278_v5 = vld [vmem:[%s1721_s5 + $0x28] sm:$0xff]  ;;  %v1295_v7 = vld [vmem:[%s1721_s5 + $0xb0] sm:$0xff] }
  0x24   : > { %547 = vmatpush.bf16.msra.mxu2 %v1026_v18  ;;  %v1286_v6 = vld [vmem:[%s1721_s5 + $0x68] sm:$0xff]  ;;  %v1303_v8 = vld [vmem:[%s1721_s5 + $0xf0] sm:$0xff]  ;;  %v1277_v9 = vld [vmem:[%s1721_s5 + $0x20] sm:$0xff] }
  0x25   : > { %v1285_v10 = vld [vmem:[%s1721_s5 + $0x60] sm:$0xff]  ;;  %v1294_v11 = vld [vmem:[%s1721_s5 + $0xa8] sm:$0xff]  ;;  %v1276_v13 = vld [vmem:[%s1721_s5 + $0x18] sm:$0xff] }
  0x26   : > { %v1302_v12 = vld [vmem:[%s1721_s5 + $0xe8] sm:$0xff]  ;;  %v1284_v14 = vld [vmem:[%s1721_s5 + $0x58] sm:$0xff]  ;;  %v1293_v15 = vld [vmem:[%s1721_s5 + $0xa0] sm:$0xff] }
  0x27   : > { %535 = vmatpush.bf16.msra.mxu1 %v1006_v31  ;;  %v1301_v16 = vld [vmem:[%s1721_s5 + $0xe0] sm:$0xff]  ;;  %v1275_v17 = vld [vmem:[%s1721_s5 + $0x10] sm:$0xff]  ;;  %v1290_v29 = vld [vmem:[%s1721_s5 + $0x88] sm:$0xff] }
  0x28   : > { %548 = vmatpush.bf16.msra.mxu2 %v1010_v32  ;;  %v1283_v18 = vld [vmem:[%s1721_s5 + $0x50] sm:$0xff]  ;;  %v1281_v28 = vld [vmem:[%s1721_s5 + $0x40] sm:$0xff]  ;;  %v1298_v30 = vld [vmem:[%s1721_s5 + $0xc8] sm:$0xff] }
  0x29   : > { %v1299_v26 = vld [vmem:[%s1721_s5 + $0xd0] sm:$0xff]  ;;  %v346_v31 = vld [vmem:[%s1720_s4] sm:$0xf] }
  0x2a   : > { %v348_v32 = vperm.slane %v346_v31, 0  ;;  %v349_v33 = vperm.slane %v346_v31, 1  ;;  %v1289_v34 = vld [vmem:[%s1721_s5 + $0x80] sm:$0xff]  ;;  %v350_v42 = vperm.slane %v346_v31, 2  ;;  %v351_v43 = vperm.slane %v346_v31, 3 }
  0x2b   : > { %536 = vmatpush.bf16.msra.mxu1 %v990_v41  ;;  %v1297_v35 = vld [vmem:[%s1721_s5 + $0xc0] sm:$0xff] }
  0x2c   : > { %549 = vmatpush.bf16.msra.mxu2 %v994_v45 }
  0x2f   : > { %881 = vmatpush.bf16.msrb.mxu1 %v1288_v50 }
  0x33   : > { %882 = vmatpush.bf16.msrb.mxu1 %v1287_v3 }
  0x37   : > { %883 = vmatpush.bf16.msrb.mxu1 %v1286_v6 }
  0x3b   : > { %884 = vmatpush.bf16.msrb.mxu1 %v1285_v10 }
  0x3f   : > { %885 = vmatpush.bf16.msrb.mxu1 %v1284_v14 }
  0x43   : > { %886 = vmatpush.bf16.msrb.mxu1 %v1283_v18 }
  0x84   : > { %v277_v21 = vpop.xlane.xlu0 %276 }
  0x85   : > { %v285_v22 = vmul.f32 %v1421_v20, %v277_v21  ;;  %v1027_v21 = vld [vmem:[%s1719_s3 + $0x58] sm:$0xf0] }
  0x87   : > { %v1425_v23 = vsub.f32 %v1394_v1, %v285_v22  ;;  %v1030_v22 = vor.u32 %v1250_v19, %v1027_v21  ;;  %v1292_v19 = vld [vmem:[%s1721_s5 + $0x98] sm:$0xff] }
  0x88   : > { %v1300_v21 = vld [vmem:[%s1721_s5 + $0xd8] sm:$0xff] }
  0x89   : > { %v287_v24 = vmul.f32 %v1425_v23, %v1425_v23  ;;  %560 = vmatpush.bf16.msra.mxu3 %v1030_v22  ;;  %v1274_v22 = vld [vmem:[%s1721_s5 + $0x8] sm:$0xff] }
  0x8b   : > { %288 = vadd.xlane.f32.xlu0 %v287_v24  ;;  %v1001_v24 = vld [vmem:[%s1719_s3 + $0x20] sm:$0xf] }
  0x8c   : > { %v1002_v27 = vor.u32 %v1247_v25, %v1001_v24  ;;  %v1282_v24 = vld [vmem:[%s1721_s5 + $0x48] sm:$0xff]  ;;  %v1291_v25 = vld [vmem:[%s1721_s5 + $0x90] sm:$0xff] }
  0x8d   : > { %561 = vmatpush.bf16.msra.mxu3 %v1014_v36  ;;  %887 = vmatpush.bf16.msrb.mxu1 %v1282_v24 }
  0x8e   : > { %522 = vmatpush.bf16.msra.mxu0 %v1002_v27  ;;  %v1273_v27 = vld [vmem:[%s1721_s5] sm:$0xff] }
  0x91   : > { %562 = vmatpush.bf16.msra.mxu3 %v998_v47  ;;  %888 = vmatpush.bf16.msrb.mxu1 %v1281_v28 }
  0x92   : > { %523 = vmatpush.bf16.msra.mxu0 %v986_v40 }
  0x95   : > { %907 = vmatpush.bf16.msrb.mxu3 %v1304_v4 }
  0x96   : > { %868 = vmatpush.bf16.msrb.mxu0 %v1280_v49 }
  0x99   : > { %908 = vmatpush.bf16.msrb.mxu3 %v1303_v8 }
  0x9a   : > { %869 = vmatpush.bf16.msrb.mxu0 %v1279_v2 }
  0x9d   : > { %909 = vmatpush.bf16.msrb.mxu3 %v1302_v12 }
  0x9e   : > { %870 = vmatpush.bf16.msrb.mxu0 %v1278_v5 }
  0xa1   : > { %910 = vmatpush.bf16.msrb.mxu3 %v1301_v16 }
  0xa2   : > { %871 = vmatpush.bf16.msrb.mxu0 %v1277_v9 }
  0xa5   : > { %911 = vmatpush.bf16.msrb.mxu3 %v1300_v21 }
  0xa6   : > { %872 = vmatpush.bf16.msrb.mxu0 %v1276_v13 }
  0xa9   : > { %912 = vmatpush.bf16.msrb.mxu3 %v1299_v26 }
  0xaa   : > { %873 = vmatpush.bf16.msrb.mxu0 %v1275_v17 }
  0xad   : > { %913 = vmatpush.bf16.msrb.mxu3 %v1298_v30 }
  0xae   : > { %874 = vmatpush.bf16.msrb.mxu0 %v1274_v22 }
  0xb1   : > { %914 = vmatpush.bf16.msrb.mxu3 %v1297_v35 }
  0xb2   : > { %875 = vmatpush.bf16.msrb.mxu0 %v1273_v27 }
  0xfe   : > { %v289_v48 = vpop.xlane.xlu0 %288 }
  0xff   : > { %v290_v51 = vmul.f32 %v289_v48, %v1421_v20 }
 0x101   : > { %v291_v52 = vadd.f32 1e-05, %v290_v51 }
 0x103   : > { %1319 = vrsqrt.f32 %v291_v52  ;;  %vm298_vm2 = vweird.f32 %v291_v52 }
 0x109   : > { %v1320_v53 = vpop.eup %1319 }
 0x10a   : > { %v293_v54 = vmul.f32 %v1320_v53, %v291_v52  ;;  %vm299_vm1 = vweird.f32 %v1320_v53 }
 0x10b   : > { %vm300_vm3 = vmor %vm298_vm2, %vm299_vm1 }
 0x10c   : > { %v294_v55 = vmul.f32 %v1320_v53, %v293_v54 }
 0x10e   : > { %v295_v56 = vmul.f32 0.5, %v294_v55 }
 0x110   : > { %v296_v57 = vsub.f32 1.5, %v295_v56 }
 0x112   : > { %v297_v58 = vmul.f32 %v1320_v53, %v296_v57 }
 0x114   : > { %v301_v60 = vsel %vm300_vm3, %v1320_v53, %v297_v58 }
 0x115   : > { %v302_v20 = vmul.f32 %v301_v60, %v1425_v23  ;;  %v1296_v23 = vld [vmem:[%s1721_s5 + $0xb8] sm:$0xff] }
 0x116   : > { %894 = vmatpush.bf16.msrb.mxu2 %v1296_v23 }
 0x117   : > { %v307_v62 = vmul.f32 %v1314_v59, %v302_v20 }
 0x119   : > { %v312_v63 = vadd.f32 %v1315_v61, %v307_v62 }
 0x11a   : > { %895 = vmatpush.bf16.msrb.mxu2 %v1295_v7 }
 0x11b   : > { %v313_v0 = vpack.c.bf16 %v312_v63, %v312_v63 }
 0x11d   : > { %524 = vmatmul.bf16.vlgmr.msra.gmra.mxu0 %v313_v0  ;;  %537 = vmatmul.bf16.vlgmr.msra.gmra.mxu1 %v313_v0 }
 0x11e   : > { %550 = vmatmul.bf16.vlgmr.msra.gmra.mxu2 %v313_v0  ;;  %563 = vmatmul.bf16.vlgmr.msra.gmra.mxu3 %v313_v0 }
 0x11f   : > { %896 = vmatpush.bf16.msrb.mxu2 %v1294_v11 }
 0x123   : > { %897 = vmatpush.bf16.msrb.mxu2 %v1293_v15 }
 0x127   : > { %898 = vmatpush.bf16.msrb.mxu2 %v1292_v19 }
 0x12b   : > { %899 = vmatpush.bf16.msrb.mxu2 %v1291_v25 }
 0x12f   : > { %900 = vmatpush.bf16.msrb.mxu2 %v1290_v29  ;;  %v1316_v29 = vld [vmem:[%s1722_s6] ss:$0 sm:$0xff] }
 0x133   : > { %901 = vmatpush.bf16.msrb.mxu2 %v1289_v34 }
 0x19a   : > { %v525_v36 = vpop.f32.mrf.mxu0  ;;  %v538_v37 = vpop.f32.mrf.mxu1 }
 0x19b   : > { %v526_v38 = vadd.f32 %v525_v36, %v348_v32  ;;  %v539_v39 = vadd.f32 %v538_v37, %v349_v33 }
 0x19d   : > { %v568_v40 = vmul.f32 %v526_v38, %v526_v38  ;;  %v569_v41 = vmul.f32 %v539_v39, %v539_v39 }
 0x19f   : > { %v572_v44 = vmul.f32 %v568_v40, %v526_v38  ;;  %v573_v45 = vmul.f32 %v569_v41, %v539_v39 }
 0x1a1   : > { %v576_v46 = vmul.f32 0.044715, %v572_v44  ;;  %v577_v47 = vmul.f32 0.044715, %v573_v45  ;;  %v551_v48 = vpop.f32.mrf.mxu2  ;;  %v564_v49 = vpop.f32.mrf.mxu3 }
 0x1a2   : > { %v552_v50 = vadd.f32 %v551_v48, %v350_v42  ;;  %v565_v51 = vadd.f32 %v564_v49, %v351_v43  ;;  %v527_v52 = vpop.f32.mrf.mxu0  ;;  %v540_v53 = vpop.f32.mrf.mxu1 }
 0x1a3   : > { %v580_v54 = vadd.f32 %v576_v46, %v526_v38  ;;  %v581_v55 = vadd.f32 %v577_v47, %v539_v39 }
 0x1a4   : > { %v570_v56 = vmul.f32 %v552_v50, %v552_v50  ;;  %v571_v57 = vmul.f32 %v565_v51, %v565_v51 }
 0x1a5   : > { %v584_v58 = vmul.f32 0.7978846, %v580_v54  ;;  %v585_v59 = vmul.f32 0.7978846, %v581_v55 }
 0x1a6   : > { %v574_v60 = vmul.f32 %v570_v56, %v552_v50  ;;  %v575_v20 = vmul.f32 %v571_v57, %v565_v51 }
 0x1a7   : > { %1321 = vtanh.f32 %v584_v58 }
 0x1a8   : > { %v578_v61 = vmul.f32 0.044715, %v574_v60  ;;  %v579_v62 = vmul.f32 0.044715, %v575_v20  ;;  %1323 = vtanh.f32 %v585_v59 }
 0x1a9   : > { %v553_v63 = vpop.f32.mrf.mxu2  ;;  %v566_v0 = vpop.f32.mrf.mxu3 }
 0x1aa   : > { %v582_v2 = vadd.f32 %v578_v61, %v552_v50  ;;  %v583_v3 = vadd.f32 %v579_v62, %v565_v51 }
 0x1ac   : > { %v586_v23 = vmul.f32 0.7978846, %v582_v2  ;;  %v587_v4 = vmul.f32 0.7978846, %v583_v3 }
 0x1ad   : > { %v1322_v5 = vpop.eup %1321 }
 0x1ae   : > { %v1324_v6 = vpop.eup %1323  ;;  %v592_v7 = vadd.f32 1.0, %v1322_v5  ;;  %1325 = vtanh.f32 %v586_v23 }
 0x1af   : > { %v593_v8 = vadd.f32 1.0, %v1324_v6  ;;  %1327 = vtanh.f32 %v587_v4 }
 0x1b0   : > { %v596_v9 = vmul.f32 0.5, %v592_v7 }
 0x1b1   : > { %v597_v10 = vmul.f32 0.5, %v593_v8 }
 0x1b2   : > { %v600_v11 = vmul.f32 %v596_v9, %v526_v38 }
 0x1b3   : > { %v601_v12 = vmul.f32 %v597_v10, %v539_v39 }
 0x1b4   : > { %v1326_v13 = vpop.eup %1325  ;;  %v604_v14 = vpack.c.bf16 %v600_v11, %v600_v11 }
 0x1b5   : > { %v1328_v15 = vpop.eup %1327  ;;  %v605_v16 = vpack.c.bf16 %v601_v12, %v601_v12  ;;  %v594_v17 = vadd.f32 1.0, %v1326_v13 }
 0x1b6   : > { %876 = vmatmul.bf16.vlgmr.msrb.gmra.mxu0 %v604_v14  ;;  %v595_v18 = vadd.f32 1.0, %v1328_v15 }
 0x1b7   : > { %889 = vmatmul.bf16.vlgmr.msrb.gmra.mxu1 %v605_v16  ;;  %v598_v19 = vmul.f32 0.5, %v594_v17 }
 0x1b8   : > { %v599_v21 = vmul.f32 0.5, %v595_v18 }
 0x1b9   : > { %v602_v22 = vmul.f32 %v598_v19, %v552_v50 }
 0x1ba   : > { %v603_v24 = vmul.f32 %v599_v21, %v565_v51 }
 0x1bb   : > { %v606_v25 = vpack.c.bf16 %v602_v22, %v602_v22 }
 0x1bc   : > { %v607_v26 = vpack.c.bf16 %v603_v24, %v603_v24 }
 0x1bd   : > { %902 = vmatmul.bf16.vlgmr.msrb.gmra.mxu2 %v606_v25 }
 0x1be   : > { %915 = vmatmul.bf16.vlgmr.msrb.gmra.mxu3 %v607_v26 }
 0x233   : > { %v877_v27 = vpop.f32.mrf.mxu0 }
 0x234   : > { %v890_v28 = vpop.f32.mrf.mxu1  ;;  %v878_v30 = vadd.f32 %v1316_v29, %v877_v27 }
 0x236   : > { %v891_v33 = vadd.f32 %v890_v28, %v878_v30 }
 0x23b   : > { %v879_v31 = vpop.f32.mrf.mxu0 }
 0x23c   : > { %v892_v32 = vpop.f32.mrf.mxu1 }
 0x240   : > { %v903_v34 = vpop.f32.mrf.mxu2 }
 0x241   : > { %v904_v35 = vadd.f32 %v903_v34, %v891_v33  ;;  %v916_v36 = vpop.f32.mrf.mxu3 }
 0x243   : > { %v917_v37 = vadd.f32 %v916_v36, %v904_v35 }
 0x245   : > { %v920_v38 = vadd.f32 %v917_v37, %v1394_v1 }
 0x247   : > { %v921_v39 = vpack.c.bf16 %v920_v38, %v920_v38 }
 0x248   : > { %v905_v40 = vpop.f32.mrf.mxu2 }
 0x249   : > { %922 = vst [vmem:[%s273_s9] sm:$0xf] %v921_v39  ;;  %v918_v41 = vpop.f32.mrf.mxu3 }
 0x24a PF: > { %s17_s24 = sadd.s32 1, %s1335_s24  }
 0x24b   : > { %p14_p4 = scmp.ge.s32.totalorder %s17_s24, 4  }
 0x24d   :  { %16 = sbr.rel (!%p14_p4) target bundleno = 1 (0x1), region = 78 }

// kernel: decoder_forward.11
= control target key start
LH: loop header
LB: loop body
LE: loop exit
PB: predicated region body
PF: predicated region fallthrough
CT: control target
= control target key end

     0   :  { %s2649_s17 = smov 0   ;;  %s3094_s0 = inlined_call_operand.vmem [shape: bf16[2,8,128], index: 0, kind: input, shape index: {}]   ;;  %s3095_s1 = inlined_call_operand.vmem [shape: f32[1,128], index: 1, kind: input, shape index: {}]   ;;  %s3096_s2 = inlined_call_operand.vmem [shape: f32[1,128], index: 2, kind: input, shape index: {}]   ;;  %s3097_s3 = inlined_call_operand.vmem [shape: bf16[4,128,32], index: 3, kind: input, shape index: {}]   ;;  %s3098_s4 = inlined_call_operand.vmem [shape: f32[4,1,32], index: 4, kind: input, shape index: {}]   ;;  %s3099_s5 = inlined_call_operand.vmem [shape: bf16[4,128,32], index: 5, kind: input, shape index: {}]   ;;  %s3100_s6 = inlined_call_operand.vmem [shape: f32[4,1,32], index: 6, kind: input, shape index: {}]   ;;  %s3101_s7 = inlined_call_operand.vmem [shape: bf16[4,128,32], index: 7, kind: input, shape index: {}]   ;;  %s3102_s8 = inlined_call_operand.vmem [shape: f32[4,1,32], index: 8, kind: input, shape index: {}]   ;;  %s3103_s9 = inlined_call_operand.vmem [shape: bf16[4,32,128], index: 9, kind: input, shape index: {}]   ;;  %s3104_s10 = inlined_call_operand.vmem [shape: f32[1,128], index: 10, kind: input, shape index: {}]   ;;  %s3105_s11 = inlined_call_operand.vmem [shape: bf16[2,8,128], index: 11, kind: output, shape index: {}]  }
   0x1 LB: > { %s1830_s18 = sadd.s32 4294967295, %s2586_s17   ;;  %p1834_p0 = scmp.ge.s32.totalorder %s2586_s17, 1  ;;  %s2586_s17 = sphi %s2649_s17, %s21_s17  }
   0x2   : > { %p336_p1 = scmp.lt.s32.totalorder %s2586_s17, 3 }
   0x4   : > { %p337_p2 = pnand %p1834_p0, %p336_p1 }
   0x5   : > { %p374_p3 = scmp.lt.s32.totalorder (!%p337_p2), %s1830_s18, 1 }
   0x6   : > { %340 = sbr.rel (%p337_p2) target bundleno = 2696 (0xa88), region = 64 }
   0xb   : > { %s3107_s18 = smov (!%p374_p3, %s1830_s18), 1  ;;  %v2588_v2 = vmov 128.0   ;;  %v2447_v3 = vld [vmem:[%s3099_s5 + $0x38] sm:$0xff]  ;;  %v2446_v5 = vld [vmem:[%s3099_s5 + $0x30] sm:$0xff]  ;;  %v2445_v9 = vld [vmem:[%s3099_s5 + $0x28] sm:$0xff]  ;;  %vm668_vm4 = vcmask 261120  }
   0xc   : > { %s1835_s19 = sshll.u32 %s3107_s18, 2  ;;  %2560 = vrcp.f32 %v2588_v2  ;;  %v2439_v4 = vld [vmem:[%s3097_s3 + $0x38] sm:$0xff]  ;;  %572 = vmatpush.bf16.msra.mxu1 %v2447_v3  ;;  %v2438_v6 = vld [vmem:[%s3097_s3 + $0x30] sm:$0xff]  ;;  %v2437_v11 = vld [vmem:[%s3097_s3 + $0x28] sm:$0xff]  ;;  %vm706_vm5 = vcmask 1043456   ;;  %vm689_vm6 = vcmask 64512  }
   0xd   : > { %s377_s22 = scalar_lea.vmem %s3094_s0, %s1835_s19  ;;  %491 = vmatpush.bf16.msra.mxu0 %v2439_v4  ;;  %v2455_v7 = vld [vmem:[%s3101_s7 + $0x38] sm:$0xff]  ;;  %v2444_v12 = vld [vmem:[%s3099_s5 + $0x20] sm:$0xff]  ;;  %v2442_v17 = vld [vmem:[%s3099_s5 + $0x10] sm:$0xff]  ;;  %s381_s23 = scalar_lea.vmem %s3105_s11, %s1835_s19 }
   0xe   : > { %v383_v0 = vld [vmem:[%s377_s22] sm:$0xf]  ;;  %653 = vmatpush.bf16.msra.mxu2 %v2455_v7  ;;  %v2443_v15 = vld [vmem:[%s3099_s5 + $0x18] sm:$0xff]  ;;  %v2441_v19 = vld [vmem:[%s3099_s5 + $0x8] sm:$0xff] }
   0xf   : > { %v2665_v1 = vunpack.c.l.bf16 %v383_v0  ;;  %v2436_v14 = vld [vmem:[%s3097_s3 + $0x20] sm:$0xff]  ;;  %v2435_v26 = vld [vmem:[%s3097_s3 + $0x18] sm:$0xff]  ;;  %v2454_v28 = vld [vmem:[%s3101_s7 + $0x30] sm:$0xff] }
  0x10   : > { %573 = vmatpush.bf16.msra.mxu1 %v2446_v5  ;;  %v2440_v25 = vld [vmem:[%s3099_s5] sm:$0xff]  ;;  %v2481_v27 = vld [vmem:[%s3101_s7 + $0x78] sm:$0xff]  ;;  %v2434_v29 = vld [vmem:[%s3097_s3 + $0x10] sm:$0xff] }
  0x11   : > { %385 = vadd.xlane.f32.xlu0 %v2665_v1  ;;  %492 = vmatpush.bf16.msra.mxu0 %v2438_v6  ;;  %v2480_v30 = vld [vmem:[%s3101_s7 + $0x70] sm:$0xff]  ;;  %v2453_v31 = vld [vmem:[%s3101_s7 + $0x28] sm:$0xff]  ;;  %v2452_v34 = vld [vmem:[%s3101_s7 + $0x20] sm:$0xff] }
  0x12   : > { %v2561_v8 = vpop.eup %2560  ;;  %654 = vmatpush.bf16.msra.mxu2 %v2454_v28  ;;  %v2433_v32 = vld [vmem:[%s3097_s3 + $0x8] sm:$0xff]  ;;  %v2432_v35 = vld [vmem:[%s3097_s3] sm:$0xff]  ;;  %v2451_v37 = vld [vmem:[%s3101_s7 + $0x18] sm:$0xff] }
  0x13   : > { %v388_v10 = vmul.f32 128.0, %v2561_v8  ;;  %vm392_vm0 = vweird.f32 %v2561_v8  ;;  %v2479_v33 = vld [vmem:[%s3101_s7 + $0x68] sm:$0xff]  ;;  %v2478_v36 = vld [vmem:[%s3101_s7 + $0x60] sm:$0xff]  ;;  %v2473_v38 = vld [vmem:[%s3099_s5 + $0x78] sm:$0xff] }
  0x14   : > { %574 = vmatpush.bf16.msra.mxu1 %v2445_v9  ;;  %v2477_v39 = vld [vmem:[%s3101_s7 + $0x58] sm:$0xff]  ;;  %v2450_v40 = vld [vmem:[%s3101_s7 + $0x10] sm:$0xff]  ;;  %v2449_v43 = vld [vmem:[%s3101_s7 + $0x8] sm:$0xff] }
  0x15   : > { %v389_v13 = vsub.f32 1.0, %v388_v10  ;;  %493 = vmatpush.bf16.msra.mxu0 %v2437_v11  ;;  %v2472_v41 = vld [vmem:[%s3099_s5 + $0x70] sm:$0xff]  ;;  %v2471_v44 = vld [vmem:[%s3099_s5 + $0x68] sm:$0xff]  ;;  %v2448_v46 = vld [vmem:[%s3101_s7] sm:$0xff] }
  0x16   : > { %655 = vmatpush.bf16.msra.mxu2 %v2453_v31  ;;  %v2476_v42 = vld [vmem:[%s3101_s7 + $0x50] sm:$0xff]  ;;  %v2475_v45 = vld [vmem:[%s3101_s7 + $0x48] sm:$0xff]  ;;  %v2470_v47 = vld [vmem:[%s3099_s5 + $0x60] sm:$0xff] }
  0x17   : > { %v390_v16 = vmul.f32 %v2561_v8, %v389_v13  ;;  %v2474_v48 = vld [vmem:[%s3101_s7 + $0x40] sm:$0xff]  ;;  %v2469_v49 = vld [vmem:[%s3099_s5 + $0x58] sm:$0xff]  ;;  %v2468_v52 = vld [vmem:[%s3099_s5 + $0x50] sm:$0xff] }
  0x18   : > { %575 = vmatpush.bf16.msra.mxu1 %v2444_v12  ;;  %v2467_v54 = vld [vmem:[%s3099_s5 + $0x48] sm:$0xff]  ;;  %v2466_v55 = vld [vmem:[%s3099_s5 + $0x40] sm:$0xff]  ;;  %v2491_v5 = vld [vmem:[%s3097_s3 + $0xb8] sm:$0xff] }
  0x19   : > { %494 = vmatpush.bf16.msra.mxu0 %v2436_v14  ;;  %v391_v18 = vadd.f32 %v2561_v8, %v390_v16  ;;  %v2545_v62 = vld [vmem:[%s3095_s1] ss:$0 sm:$0xff]  ;;  %v2490_v7 = vld [vmem:[%s3097_s3 + $0xb0] sm:$0xff]  ;;  %v2487_v10 = vld [vmem:[%s3097_s3 + $0x98] sm:$0xff] }
  0x1a   : > { %656 = vmatpush.bf16.msra.mxu2 %v2452_v34  ;;  %v2546_v0 = vld [vmem:[%s3096_s2] ss:$0 sm:$0xff]  ;;  %v2486_v11 = vld [vmem:[%s3097_s3 + $0x90] sm:$0xff]  ;;  %v2485_v12 = vld [vmem:[%s3097_s3 + $0x88] sm:$0xff] }
  0x1b   : > { %v393_v20 = vsel %vm392_vm0, %v2561_v8, %v391_v18  ;;  %v2489_v8 = vld [vmem:[%s3097_s3 + $0xa8] sm:$0xff]  ;;  %v2488_v9 = vld [vmem:[%s3097_s3 + $0xa0] sm:$0xff] }
  0x1c   : > { %576 = vmatpush.bf16.msra.mxu1 %v2443_v15  ;;  %v2484_v13 = vld [vmem:[%s3097_s3 + $0x80] sm:$0xff] }
  0x1d   : > { %495 = vmatpush.bf16.msra.mxu0 %v2435_v26  ;;  %v2548_v14 = vld [vmem:[%s3100_s6] ss:$0 sm:$0xff]  ;;  %v2551_v31 = vld [vmem:[%s3102_s8 + $0x1] ss:$0 sm:$0xff] }
  0x1e   : > { %657 = vmatpush.bf16.msra.mxu2 %v2451_v37 }
  0x20   : > { %577 = vmatpush.bf16.msra.mxu1 %v2442_v17 }
  0x21   : > { %496 = vmatpush.bf16.msra.mxu0 %v2434_v29 }
  0x22   : > { %658 = vmatpush.bf16.msra.mxu2 %v2450_v40 }
  0x24   : > { %578 = vmatpush.bf16.msra.mxu1 %v2441_v19  ;;  %v2547_v19 = vld [vmem:[%s3098_s4] ss:$0 sm:$0xff] }
  0x25   : > { %497 = vmatpush.bf16.msra.mxu0 %v2433_v32 }
  0x26   : > { %659 = vmatpush.bf16.msra.mxu2 %v2449_v43 }
  0x28   : > { %579 = vmatpush.bf16.msra.mxu1 %v2440_v25 }
  0x29   : > { %498 = vmatpush.bf16.msra.mxu0 %v2432_v35 }
  0x2a   : > { %660 = vmatpush.bf16.msra.mxu2 %v2448_v46 }
  0x2c   : > { %964 = vmatpush.bf16.msrb.mxu1 %v2481_v27 }
  0x2d   : > { %881 = vmatpush.bf16.msrb.mxu0 %v2473_v38 }
  0x30   : > { %965 = vmatpush.bf16.msrb.mxu1 %v2480_v30  ;;  %v2550_v30 = vld [vmem:[%s3100_s6 + $0x1] ss:$0 sm:$0xff] }
  0x31   : > { %882 = vmatpush.bf16.msrb.mxu0 %v2472_v41 }
  0x34   : > { %966 = vmatpush.bf16.msrb.mxu1 %v2479_v33 }
  0x35   : > { %883 = vmatpush.bf16.msrb.mxu0 %v2471_v44 }
  0x38   : > { %967 = vmatpush.bf16.msrb.mxu1 %v2478_v36 }
  0x39   : > { %884 = vmatpush.bf16.msrb.mxu0 %v2470_v47 }
  0x3c   : > { %968 = vmatpush.bf16.msrb.mxu1 %v2477_v39 }
  0x3d   : > { %885 = vmatpush.bf16.msrb.mxu0 %v2469_v49  ;;  %v2465_v49 = vld [vmem:[%s3097_s3 + $0x78] sm:$0xff] }
  0x40   : > { %969 = vmatpush.bf16.msrb.mxu1 %v2476_v42 }
  0x41   : > { %886 = vmatpush.bf16.msrb.mxu0 %v2468_v52 }
  0x44   : > { %970 = vmatpush.bf16.msrb.mxu1 %v2475_v45 }
  0x45   : > { %887 = vmatpush.bf16.msrb.mxu0 %v2467_v54 }
  0x48   : > { %971 = vmatpush.bf16.msrb.mxu1 %v2474_v48 }
  0x49   : > { %888 = vmatpush.bf16.msrb.mxu0 %v2466_v55  ;;  %v2464_v55 = vld [vmem:[%s3097_s3 + $0x70] sm:$0xff] }
  0x84   : > { %v386_v21 = vpop.xlane.xlu0 %385 }
  0x85   : > { %v394_v22 = vmul.f32 %v393_v20, %v386_v21 }
  0x87   : > { %v2705_v23 = vsub.f32 %v2665_v1, %v394_v22 }
  0x89   : > { %v396_v24 = vmul.f32 %v2705_v23, %v2705_v23 }
  0x8b   : > { %397 = vadd.xlane.f32.xlu0 %v396_v24 }
  0xfe   : > { %v398_v50 = vpop.xlane.xlu0 %397 }
  0xff   : > { %v399_v51 = vmul.f32 %v398_v50, %v393_v20  ;;  %v2549_v20 = vld [vmem:[%s3102_s8] ss:$0 sm:$0xff] }
 0x101   : > { %v400_v53 = vadd.f32 1e-05, %v399_v51 }
 0x103   : > { %2562 = vrsqrt.f32 %v400_v53  ;;  %vm407_vm2 = vweird.f32 %v400_v53 }
 0x109   : > { %v2563_v56 = vpop.eup %2562 }
 0x10a   : > { %v402_v57 = vmul.f32 %v2563_v56, %v400_v53  ;;  %vm408_vm1 = vweird.f32 %v2563_v56 }
 0x10b   : > { %vm409_vm3 = vmor %vm407_vm2, %vm408_vm1 }
 0x10c   : > { %v403_v58 = vmul.f32 %v2563_v56, %v402_v57  ;;  %v2462_v57 = vld [vmem:[%s3097_s3 + $0x60] sm:$0xff] }
 0x10e   : > { %v404_v59 = vmul.f32 0.5, %v403_v58  ;;  %v2461_v58 = vld [vmem:[%s3097_s3 + $0x58] sm:$0xff] }
 0x110   : > { %v405_v60 = vsub.f32 1.5, %v404_v59  ;;  %v2460_v59 = vld [vmem:[%s3097_s3 + $0x50] sm:$0xff] }
 0x112   : > { %v406_v61 = vmul.f32 %v2563_v56, %v405_v60  ;;  %v2459_v60 = vld [vmem:[%s3097_s3 + $0x48] sm:$0xff] }
 0x114   : > { %v410_v63 = vsel %vm409_vm3, %v2563_v56, %v406_v61  ;;  %v2463_v56 = vld [vmem:[%s3097_s3 + $0x68] sm:$0xff]  ;;  %v2458_v61 = vld [vmem:[%s3097_s3 + $0x40] sm:$0xff] }
 0x115   : > { %v411_v2 = vmul.f32 %v410_v63, %v2705_v23 }
 0x117   : > { %v416_v3 = vmul.f32 %v2545_v62, %v411_v2  ;;  %v2457_v62 = vld [vmem:[%s3103_s9 + $0x8] sm:$0xff] }
 0x119   : > { %v421_v4 = vadd.f32 %v2546_v0, %v416_v3 }
 0x11b   : > { %v2803_v6 = vpack.c.bf16 %v421_v4, %v421_v4  ;;  %v2456_v4 = vld [vmem:[%s3103_s9] sm:$0xff] }
 0x11d   : > { %499 = vmatmul.bf16.vlgmr.msra.gmra.mxu0 %v2803_v6  ;;  %580 = vmatmul.bf16.vlgmr.msra.gmra.mxu1 %v2803_v6 }
 0x11e   : > { %661 = vmatmul.bf16.vlgmr.msra.gmra.mxu2 %v2803_v6  ;;  %1163 = vmatpush.bf16.msra.mxu1 %v2491_v5 }
 0x11f   : > { %1086 = vmatpush.bf16.msra.mxu0 %v2457_v62  ;;  %v2522_v62 = vld [vmem:[%s3099_s5 + $0xe0] sm:$0xff] }
 0x122   : > { %1164 = vmatpush.bf16.msra.mxu1 %v2490_v7 }
 0x123   : > { %1087 = vmatpush.bf16.msra.mxu0 %v2456_v4  ;;  %v2552_v4 = vld [vmem:[%s3098_s4 + $0x2] ss:$0 sm:$0xff] }
 0x126   : > { %1165 = vmatpush.bf16.msra.mxu1 %v2489_v8 }
 0x12a   : > { %1166 = vmatpush.bf16.msra.mxu1 %v2488_v9  ;;  %v2553_v9 = vld [vmem:[%s3098_s4 + $0x1] ss:$0 sm:$0xff] }
 0x12d   : > { %889 = vmatmul.bf16.vlgmr.msrb.gmra.mxu0 %v2803_v6  ;;  %972 = vmatmul.bf16.vlgmr.msrb.gmra.mxu1 %v2803_v6 }
 0x12e   : > { %1167 = vmatpush.bf16.msra.mxu1 %v2487_v10 }
 0x132   : > { %1168 = vmatpush.bf16.msra.mxu1 %v2486_v11 }
 0x136   : > { %1169 = vmatpush.bf16.msra.mxu1 %v2485_v12 }
 0x13a   : > { %1170 = vmatpush.bf16.msra.mxu1 %v2484_v13 }
 0x13d   : > { %1171 = vmatmul.bf16.vlgmr.msra.gmra.mxu1 %v2803_v6 }
 0x19a   : > { %v500_v15 = vpop.f32.mrf.mxu0  ;;  %v581_v16 = vpop.f32.mrf.mxu1 }
 0x19b   : > { %v582_v17 = vadd.f32 %v2548_v14, %v581_v16  ;;  %v501_v23 = vadd.f32 %v2547_v19, %v500_v15 }
 0x19d   : > { %v667_v18 = vpack.c.bf16 %v582_v17, %v582_v17  ;;  %v666_v28 = vpack.c.bf16 %v501_v23, %v501_v23  ;;  %v2496_v23 = vld [vmem:[%s3099_s5 + $0xa0] sm:$0xff] }
 0x19f   : > { %v673_v21 = vsel %vm668_vm4, %v667_v18, 0 }
 0x1a0   : > { %682 = vmatpush.bf16.xpose.msra.mxu3 %v673_v21  ;;  %v2498_v21 = vld [vmem:[%s3099_s5 + $0xb0] sm:$0xff] }
 0x1a1   : > { %v662_v22 = vpop.f32.mrf.mxu2 }
 0x1a2   : > { %v663_v24 = vadd.f32 %v2549_v20, %v662_v22  ;;  %v502_v25 = vpop.f32.mrf.mxu0  ;;  %v583_v26 = vpop.f32.mrf.mxu1  ;;  %v2499_v20 = vld [vmem:[%s3099_s5 + $0xb8] sm:$0xff]  ;;  %v2497_v22 = vld [vmem:[%s3099_s5 + $0xa8] sm:$0xff] }
 0x1a4   : > { %v702_v27 = vpack.c.bf16 %v663_v24, %v663_v24  ;;  %v2495_v24 = vld [vmem:[%s3099_s5 + $0x98] sm:$0xff] }
 0x1a6   : > { %v708_v29 = vsel %vm706_vm5, %v702_v27, 0 }
 0x1a7   : > { %1933 = vmatmul.msk.bf16.vlgmr.msra.gmra.mxu3 %vm668_vm4, %v666_v28 }
 0x1a8   : > { %717 = vmatpush.bf16.msrb.mxu3 %v708_v29 }
 0x1a9   : > { %v664_v32 = vpop.f32.mrf.mxu2 }
 0x1aa   : > { %v890_v33 = vpop.f32.mrf.mxu0  ;;  %v973_v34 = vpop.f32.mrf.mxu1  ;;  %v2492_v32 = vld [vmem:[%s3099_s5 + $0x80] sm:$0xff] }
 0x1ab   : > { %v891_v35 = vadd.f32 %v2550_v30, %v890_v33  ;;  %v974_v36 = vadd.f32 %v2551_v31, %v973_v34  ;;  %v2494_v30 = vld [vmem:[%s3099_s5 + $0x90] sm:$0xff]  ;;  %v2493_v31 = vld [vmem:[%s3099_s5 + $0x88] sm:$0xff] }
 0x1ac   : > { %798 = vmatpush.bf16.msra.mxu3 %v2465_v49  ;;  %v2512_v49 = vld [vmem:[%s3097_s3 + $0xd0] sm:$0xff] }
 0x1ad   : > { %v978_v37 = vpack.c.bf16 %v891_v35, %v891_v35  ;;  %v1011_v38 = vpack.c.bf16 %v974_v36, %v974_v36  ;;  %v2517_v36 = vld [vmem:[%s3097_s3 + $0xf8] sm:$0xff] }
 0x1af   : > { %v1016_v39 = vsel %vm706_vm5, %v1011_v38, 0  ;;  %v983_v40 = vsel %vm668_vm4, %v978_v37, 0  ;;  %v2483_v38 = vld [vmem:[%s3103_s9 + $0x18] sm:$0xff] }
 0x1b0   : > { %992 = vmatpush.bf16.xpose.msrb.mxu2 %v983_v40  ;;  %799 = vmatpush.bf16.msra.mxu3 %v2464_v55  ;;  %v2482_v40 = vld [vmem:[%s3103_s9 + $0x10] sm:$0xff]  ;;  %v2500_v55 = vld [vmem:[%s3101_s7 + $0x80] sm:$0xff] }
 0x1b2   : > { %v892_v41 = vpop.f32.mrf.mxu0  ;;  %v975_v42 = vpop.f32.mrf.mxu1 }
 0x1b3   : > { %v2507_v41 = vld [vmem:[%s3101_s7 + $0xb8] sm:$0xff]  ;;  %v2515_v42 = vld [vmem:[%s3097_s3 + $0xe8] sm:$0xff] }
 0x1b4   : > { %800 = vmatpush.bf16.msra.mxu3 %v2463_v56 }
 0x1b8   : > { %1025 = vmatpush.bf16.msra.mxu2 %v1016_v39  ;;  %801 = vmatpush.bf16.msra.mxu3 %v2462_v57  ;;  %v2516_v39 = vld [vmem:[%s3097_s3 + $0xf0] sm:$0xff]  ;;  %v2525_v57 = vld [vmem:[%s3099_s5 + $0xf8] sm:$0xff] }
 0x1ba   : > { %v2852_v43 = vpop.f32.mrf.mxu1 }
 0x1bc   : > { %802 = vmatpush.bf16.msra.mxu3 %v2461_v58 }
 0x1c0   : > { %803 = vmatpush.bf16.msra.mxu3 %v2460_v59  ;;  %v2524_v59 = vld [vmem:[%s3099_s5 + $0xf0] sm:$0xff] }
 0x1c2   : > { %v1174_v44 = vpop.f32.mrf.mxu1 }
 0x1c3   : > { %v2506_v44 = vld [vmem:[%s3101_s7 + $0xb0] sm:$0xff] }
 0x1c4   : > { %804 = vmatpush.bf16.msra.mxu3 %v2459_v60 }
 0x1c8   : > { %805 = vmatpush.bf16.msra.mxu3 %v2458_v61  ;;  %v2523_v61 = vld [vmem:[%s3099_s5 + $0xe8] sm:$0xff] }
 0x22a   : > { %v684_v45 = vpop.f32.mrf.mxu3 }
 0x22b   : > { %v688_v46 = vmul.f32 0.17677669, %v684_v45  ;;  %v2514_v45 = vld [vmem:[%s3097_s3 + $0xe0] sm:$0xff] }
 0x22d   : > { %v690_v47 = vsel %vm689_vm6, %v688_v46, -inf }
 0x22e   : > { %691 = vmax.xlane.f32.xlu1 %v690_v47  ;;  %v2513_v47 = vld [vmem:[%s3097_s3 + $0xd8] sm:$0xff] }
 0x232   : > { %v686_v48 = vpop.f32.mrf.mxu3 }
 0x233   : > { %v2504_v48 = vld [vmem:[%s3101_s7 + $0xa0] sm:$0xff] }
 0x2a1   : > { %v692_v50 = vpop.xlane.xlu1 %691 }
 0x2a2   : > { %v693_v51 = vsub.f32 %v688_v46, %v692_v50  ;;  %v2505_v46 = vld [vmem:[%s3101_s7 + $0xa8] sm:$0xff]  ;;  %v2503_v50 = vld [vmem:[%s3101_s7 + $0x98] sm:$0xff] }
 0x2a4   : > { %v694_v52 = vmul.f32 1.442695, %v693_v51  ;;  %v2511_v51 = vld [vmem:[%s3097_s3 + $0xc8] sm:$0xff] }
 0x2a6   : > { %2564 = vpow2.f32 %v694_v52  ;;  %v2502_v52 = vld [vmem:[%s3101_s7 + $0x90] sm:$0xff] }
 0x2ac   : > { %v2565_v53 = vpop.eup %2564 }
 0x2ad   : > { %v696_v54 = vsel %vm689_vm6, %v2565_v53, 0.0 }
 0x2ae   : > { %697 = vadd.xlane.f32.xlu1 %v696_v54  ;;  %v2501_v54 = vld [vmem:[%s3101_s7 + $0x88] sm:$0xff] }
 0x321   : > { %v698_v63 = vpop.xlane.xlu1 %697 }
 0x322   : > { %2566 = vrcp.f32 %v698_v63  ;;  %v2554_v63 = vld [vmem:[%s3100_s6 + $0x2] ss:$0 sm:$0xff] }
 0x328   : > { %v2567_v0 = vpop.eup %2566 }
 0x329   : > { %v700_v2 = vmul.f32 %v2567_v0, %v2565_v53  ;;  %v2510_v53 = vld [vmem:[%s3097_s3 + $0xc0] sm:$0xff] }
 0x32b   : > { %v701_v3 = vpack.c.bf16 %v700_v2, %v700_v2  ;;  %v2521_v2 = vld [vmem:[%s3099_s5 + $0xd8] sm:$0xff] }
 0x32d   : > { %1934 = vmatmul.msk.bf16.vlgmr.msrb.gmra.mxu3 %vm689_vm6, %v701_v3 }
 0x32e   : > { %1058 = vmatpush.bf16.msrb.mxu3 %v2483_v38 }
 0x332   : > { %1059 = vmatpush.bf16.msrb.mxu3 %v2482_v40 }
 0x33d   : > { %806 = vmatmul.bf16.vlgmr.msra.gmra.mxu3 %v2803_v6 }
 0x33e   : > { %1329 = vmatpush.bf16.msra.mxu3 %v2507_v41 }
 0x342   : > { %1330 = vmatpush.bf16.msra.mxu3 %v2506_v44  ;;  %v2531_v44 = vld [vmem:[%s3101_s7 + $0xe8] sm:$0xff] }
 0x346   : > { %1331 = vmatpush.bf16.msra.mxu3 %v2505_v46  ;;  %v2529_v46 = vld [vmem:[%s3101_s7 + $0xd8] sm:$0xff] }
 0x34a   : > { %1332 = vmatpush.bf16.msra.mxu3 %v2504_v48  ;;  %v2527_v48 = vld [vmem:[%s3101_s7 + $0xc8] sm:$0xff] }
 0x34e   : > { %1333 = vmatpush.bf16.msra.mxu3 %v2503_v50 }
 0x352   : > { %1334 = vmatpush.bf16.msra.mxu3 %v2502_v52 }
 0x356   : > { %1335 = vmatpush.bf16.msra.mxu3 %v2501_v54 }
 0x35a   : > { %1336 = vmatpush.bf16.msra.mxu3 %v2500_v55 }
 0x3b0   : > { %v719_v5 = vpop.f32.mrf.mxu3 }
 0x3b1   : > { %v723_v7 = vpack.c.bf16 %v719_v5, %v719_v5 }
 0x3b3   : > { %2105 = vmatmul.msk.bf16.vlgmr.msra.gmra.mxu0 %vm668_vm4, %v723_v7  ;;  %v2520_v7 = vld [vmem:[%s3099_s5 + $0xd0] sm:$0xff] }
 0x3b8   : > { %v721_v8 = vpop.f32.mrf.mxu3 }
 0x3c0   : > { %v807_v10 = vpop.f32.mrf.mxu3 }
 0x3c1   : > { %v808_v11 = vadd.f32 %v2553_v9, %v807_v10  ;;  %v1173_v9 = vadd.f32 %v2552_v4, %v2852_v43 }
 0x3c3   : > { %v977_v12 = vpack.c.bf16 %v808_v11, %v808_v11  ;;  %v2519_v11 = vld [vmem:[%s3099_s5 + $0xc8] sm:$0xff] }
 0x3c5   : > { %2082 = vmatmul.msk.bf16.vlgmr.msrb.gmra.mxu2 %vm668_vm4, %v977_v12  ;;  %v1342_v12 = vpack.c.bf16 %v1173_v9, %v1173_v9 }
 0x3c6   : > { %1246 = vmatpush.bf16.msrb.mxu2 %v2499_v20  ;;  %v2556_v20 = vld [vmem:[%s3102_s8 + $0x2] ss:$0 sm:$0xff] }
 0x3c8   : > { %v809_v13 = vpop.f32.mrf.mxu3 }
 0x3c9   : > { %v2518_v13 = vld [vmem:[%s3099_s5 + $0xc0] sm:$0xff] }
 0x3ca   : > { %1247 = vmatpush.bf16.msrb.mxu2 %v2498_v21 }
 0x3ce   : > { %1248 = vmatpush.bf16.msrb.mxu2 %v2497_v22 }
 0x3d2   : > { %1249 = vmatpush.bf16.msrb.mxu2 %v2496_v23 }
 0x3d6   : > { %1250 = vmatpush.bf16.msrb.mxu2 %v2495_v24 }
 0x3da   : > { %1251 = vmatpush.bf16.msrb.mxu2 %v2494_v30  ;;  %v2557_v30 = vld [vmem:[%s3100_s6 + $0x3] ss:$0 sm:$0xff] }
 0x3de   : > { %1252 = vmatpush.bf16.msrb.mxu2 %v2493_v31 }
 0x3e2   : > { %1253 = vmatpush.bf16.msrb.mxu2 %v2492_v32 }
 0x430   : > { %v2893_v14 = vpop.f32.mrf.mxu0 }
 0x438   : > { %v1091_v15 = vpop.f32.mrf.mxu0 }
 0x448   : > { %v994_v16 = vpop.f32.mrf.mxu2 }
 0x449   : > { %v998_v17 = vmul.f32 0.17677669, %v994_v16  ;;  %v2509_v16 = vld [vmem:[%s3103_s9 + $0x28] sm:$0xff] }
 0x44a   : > { %1423 = vmatpush.bf16.msrb.mxu1 %v2509_v16 }
 0x44b   : > { %v999_v18 = vsel %vm689_vm6, %v998_v17, -inf }
 0x44c   : > { %1000 = vmax.xlane.f32.xlu2 %v999_v18  ;;  %v2508_v18 = vld [vmem:[%s3103_s9 + $0x20] sm:$0xff] }
 0x44e   : > { %1424 = vmatpush.bf16.msrb.mxu1 %v2508_v18 }
 0x450   : > { %v996_v19 = vpop.f32.mrf.mxu2 }
 0x4bf   : > { %v1001_v25 = vpop.xlane.xlu2 %1000 }
 0x4c0   : > { %v1002_v26 = vsub.f32 %v998_v17, %v1001_v25 }
 0x4c2   : > { %v1003_v27 = vmul.f32 1.442695, %v1002_v26 }
 0x4c4   : > { %2568 = vpow2.f32 %v1003_v27 }
 0x4ca   : > { %v2569_v28 = vpop.eup %2568 }
 0x4cb   : > { %v1005_v29 = vsel %vm689_vm6, %v2569_v28, 0.0 }
 0x4cc   : > { %1006 = vadd.xlane.f32.xlu2 %v1005_v29 }
 0x53f   : > { %v1007_v33 = vpop.xlane.xlu2 %1006 }
 0x540   : > { %2570 = vrcp.f32 %v1007_v33 }
 0x546   : > { %v2571_v34 = vpop.eup %2570 }
 0x547   : > { %v1009_v35 = vmul.f32 %v2571_v34, %v2569_v28 }
 0x549   : > { %v1010_v37 = vpack.c.bf16 %v1009_v35, %v1009_v35 }
 0x54b   : > { %2083 = vmatmul.msk.bf16.vlgmr.msra.gmra.mxu2 %vm689_vm6, %v1010_v37 }
 0x54c   : > { %1501 = vmatpush.bf16.msra.mxu2 %v2517_v36  ;;  %v2533_v36 = vld [vmem:[%s3101_s7 + $0xf8] sm:$0xff] }
 0x550   : > { %1502 = vmatpush.bf16.msra.mxu2 %v2516_v39 }
 0x554   : > { %1503 = vmatpush.bf16.msra.mxu2 %v2515_v42  ;;  %v2532_v42 = vld [vmem:[%s3101_s7 + $0xf0] sm:$0xff] }
 0x558   : > { %1504 = vmatpush.bf16.msra.mxu2 %v2514_v45  ;;  %v2530_v45 = vld [vmem:[%s3101_s7 + $0xe0] sm:$0xff] }
 0x55b   : > { %1254 = vmatmul.bf16.vlgmr.msrb.gmra.mxu2 %v2803_v6 }
 0x55c   : > { %1505 = vmatpush.bf16.msra.mxu2 %v2513_v47  ;;  %v2528_v47 = vld [vmem:[%s3101_s7 + $0xd0] sm:$0xff] }
 0x560   : > { %1506 = vmatpush.bf16.msra.mxu2 %v2512_v49  ;;  %v2526_v49 = vld [vmem:[%s3101_s7 + $0xc0] sm:$0xff] }
 0x564   : > { %1507 = vmatpush.bf16.msra.mxu2 %v2511_v51 }
 0x568   : > { %1508 = vmatpush.bf16.msra.mxu2 %v2510_v53 }
 0x56b   : > { %1509 = vmatmul.bf16.vlgmr.msra.gmra.mxu2 %v2803_v6 }
 0x5ce   : > { %v1027_v56 = vpop.f32.mrf.mxu2 }
 0x5cf   : > { %v1031_v58 = vpack.c.bf16 %v1027_v56, %v1027_v56 }
 0x5d1   : > { %2096 = vmatmul.msk.bf16.vlgmr.msrb.gmra.mxu3 %vm668_vm4, %v1031_v58 }
 0x5d2   : > { %1584 = vmatpush.bf16.msrb.mxu3 %v2525_v57  ;;  %v2555_v57 = vld [vmem:[%s3098_s4 + $0x3] ss:$0 sm:$0xff] }
 0x5d6   : > { %v1029_v60 = vpop.f32.mrf.mxu2  ;;  %1585 = vmatpush.bf16.msrb.mxu3 %v2524_v59  ;;  %v2558_v59 = vld [vmem:[%s3102_s8 + $0x3] ss:$0 sm:$0xff] }
 0x5da   : > { %1586 = vmatpush.bf16.msrb.mxu3 %v2523_v61 }
 0x5de   : > { %v1255_v0 = vpop.f32.mrf.mxu2  ;;  %1587 = vmatpush.bf16.msrb.mxu3 %v2522_v62 }
 0x5df   : > { %v1256_v3 = vadd.f32 %v2554_v63, %v1255_v0 }
 0x5e1   : > { %v1343_v5 = vpack.c.bf16 %v1256_v3, %v1256_v3  ;;  %1337 = vmatmul.bf16.vlgmr.msra.gmra.mxu3 %v2803_v6 }
 0x5e2   : > { %1588 = vmatpush.bf16.msrb.mxu3 %v2521_v2 }
 0x5e3   : > { %v1348_v8 = vsel %vm668_vm4, %v1343_v5, 0 }
 0x5e4   : > { %1357 = vmatpush.bf16.xpose.msrb.mxu0 %v1348_v8 }
 0x5e6   : > { %v1257_v10 = vpop.f32.mrf.mxu2  ;;  %1589 = vmatpush.bf16.msrb.mxu3 %v2520_v7 }
 0x5ea   : > { %1590 = vmatpush.bf16.msrb.mxu3 %v2519_v11 }
 0x5eb   : > { %2253 = vmatmul.msk.bf16.vlgmr.msrb.gmra.mxu0 %vm668_vm4, %v1342_v12 }
 0x5ee   : > { %v3013_v15 = vpop.f32.mrf.mxu2  ;;  %1591 = vmatpush.bf16.msrb.mxu3 %v2518_v13 }
 0x5ef   : > { %v1511_v58 = vadd.f32 %v2555_v57, %v3013_v15 }
 0x5f1   : > { %1592 = vmatmul.bf16.vlgmr.msrb.gmra.mxu3 %v2803_v6  ;;  %v1680_v61 = vpack.c.bf16 %v1511_v58, %v1511_v58 }
 0x5f6   : > { %v1512_v43 = vpop.f32.mrf.mxu2 }
 0x654   : > { %v3019_v17 = vpop.f32.mrf.mxu3 }
 0x655   : > { %v1090_v2 = vadd.f32 %v2893_v14, %v3019_v17  ;;  %v2535_v14 = vld [vmem:[%s3103_s9 + $0x38] sm:$0xff] }
 0x656   : > { %1761 = vmatpush.bf16.msrb.mxu2 %v2535_v14 }
 0x65c   : > { %v1063_v19 = vpop.f32.mrf.mxu3 }
 0x664   : > { %v1338_v21 = vpop.f32.mrf.mxu3 }
 0x665   : > { %v1339_v22 = vadd.f32 %v2556_v20, %v1338_v21  ;;  %v2534_v20 = vld [vmem:[%s3103_s9 + $0x30] sm:$0xff] }
 0x666   : > { %1762 = vmatpush.bf16.msrb.mxu2 %v2534_v20 }
 0x667   : > { %v1376_v23 = vpack.c.bf16 %v1339_v22, %v1339_v22 }
 0x668   : > { %v1359_v24 = vpop.f32.mrf.mxu0 }
 0x669   : > { %v1381_v25 = vsel %vm706_vm5, %v1376_v23, 0  ;;  %v1363_v26 = vmul.f32 0.17677669, %v1359_v24 }
 0x66a   : > { %1390 = vmatpush.bf16.msra.mxu0 %v1381_v25 }
 0x66b   : > { %v1364_v27 = vsel %vm689_vm6, %v1363_v26, -inf }
 0x66c   : > { %v1340_v28 = vpop.f32.mrf.mxu3  ;;  %1365 = vmax.xlane.f32.xlu0 %v1364_v27 }
 0x66e   : > { %1667 = vmatpush.bf16.msrb.mxu0 %v2533_v36 }
 0x670   : > { %v1361_v29 = vpop.f32.mrf.mxu0 }
 0x672   : > { %1668 = vmatpush.bf16.msrb.mxu0 %v2532_v42 }
 0x674   : > { %v1593_v31 = vpop.f32.mrf.mxu3 }
 0x675   : > { %v1594_v32 = vadd.f32 %v2557_v30, %v1593_v31 }
 0x676   : > { %1669 = vmatpush.bf16.msrb.mxu0 %v2531_v44 }
 0x677   : > { %v1681_v33 = vpack.c.bf16 %v1594_v32, %v1594_v32 }
 0x679   : > { %v1686_v34 = vsel %vm668_vm4, %v1681_v33, 0 }
 0x67a   : > { %1695 = vmatpush.bf16.xpose.msra.mxu1 %v1686_v34  ;;  %1670 = vmatpush.bf16.msrb.mxu0 %v2530_v45 }
 0x67c   : > { %v1595_v35 = vpop.f32.mrf.mxu3 }
 0x67e   : > { %1671 = vmatpush.bf16.msrb.mxu0 %v2529_v46 }
 0x682   : > { %1672 = vmatpush.bf16.msrb.mxu0 %v2528_v47 }
 0x686   : > { %1673 = vmatpush.bf16.msrb.mxu0 %v2527_v48 }
 0x68a   : > { %1674 = vmatpush.bf16.msrb.mxu0 %v2526_v49 }
 0x6df   : > { %v1366_v37 = vpop.xlane.xlu0 %1365 }
 0x6e0   : > { %v1367_v38 = vsub.f32 %v1363_v26, %v1366_v37  ;;  %v2559_v26 = vld [vmem:[%s3104_s10] ss:$0 sm:$0xff] }
 0x6e2   : > { %v1368_v39 = vmul.f32 1.442695, %v1367_v38 }
 0x6e4   : > { %2572 = vpow2.f32 %v1368_v39 }
 0x6ea   : > { %v2573_v40 = vpop.eup %2572 }
 0x6eb   : > { %v1370_v41 = vsel %vm689_vm6, %v2573_v40, 0.0 }
 0x6ec   : > { %1371 = vadd.xlane.f32.xlu1 %v1370_v41 }
 0x75f   : > { %v1372_v50 = vpop.xlane.xlu1 %1371 }
 0x760   : > { %2574 = vrcp.f32 %v1372_v50 }
 0x766   : > { %v2575_v51 = vpop.eup %2574 }
 0x767   : > { %v1374_v52 = vmul.f32 %v2575_v51, %v2573_v40 }
 0x769   : > { %v1375_v53 = vpack.c.bf16 %v1374_v52, %v1374_v52 }
 0x76b   : > { %2254 = vmatmul.msk.bf16.vlgmr.msra.gmra.mxu0 %vm689_vm6, %v1375_v53 }
 0x77b   : > { %1675 = vmatmul.bf16.vlgmr.msrb.gmra.mxu0 %v2803_v6 }
 0x7e8   : > { %v1392_v54 = vpop.f32.mrf.mxu0 }
 0x7e9   : > { %v1396_v55 = vpack.c.bf16 %v1392_v54, %v1392_v54 }
 0x7eb   : > { %2267 = vmatmul.msk.bf16.vlgmr.msrb.gmra.mxu1 %vm668_vm4, %v1396_v55 }
 0x7f0   : > { %v1394_v56 = vpop.f32.mrf.mxu0 }
 0x7f8   : > { %v1676_v60 = vpop.f32.mrf.mxu0 }
 0x7f9   : > { %v1677_v62 = vadd.f32 %v2558_v59, %v1676_v60 }
 0x7fb   : > { %v1714_v63 = vpack.c.bf16 %v1677_v62, %v1677_v62  ;;  %2415 = vmatmul.msk.bf16.vlgmr.msra.gmra.mxu1 %vm668_vm4, %v1680_v61 }
 0x7fd   : > { %v1719_v6 = vsel %vm706_vm5, %v1714_v63, 0 }
 0x7fe   : > { %1728 = vmatpush.bf16.msrb.mxu1 %v1719_v6 }
 0x800   : > { %v1678_v0 = vpop.f32.mrf.mxu0 }
 0x868   : > { %v1426_v3 = vpop.f32.mrf.mxu1 }
 0x869   : > { %v1430_v4 = vadd.f32 %v1426_v3, %v1090_v2 }
 0x870   : > { %v1428_v5 = vpop.f32.mrf.mxu1 }
 0x878   : > { %v1697_v7 = vpop.f32.mrf.mxu1 }
 0x879   : > { %v1701_v8 = vmul.f32 0.17677669, %v1697_v7 }
 0x87b   : > { %v1702_v9 = vsel %vm689_vm6, %v1701_v8, -inf }
 0x87c   : > { %1703 = vmax.xlane.f32.xlu2 %v1702_v9 }
 0x880   : > { %v1699_v10 = vpop.f32.mrf.mxu1 }
 0x8ef   : > { %v1704_v11 = vpop.xlane.xlu2 %1703 }
 0x8f0   : > { %v1705_v12 = vsub.f32 %v1701_v8, %v1704_v11 }
 0x8f2   : > { %v1706_v13 = vmul.f32 1.442695, %v1705_v12 }
 0x8f4   : > { %2576 = vpow2.f32 %v1706_v13 }
 0x8fa   : > { %v2577_v15 = vpop.eup %2576 }
 0x8fb   : > { %v1708_v43 = vsel %vm689_vm6, %v2577_v15, 0.0 }
 0x8fc   : > { %1709 = vadd.xlane.f32.xlu0 %v1708_v43 }
 0x96f   : > { %v1710_v16 = vpop.xlane.xlu0 %1709 }
 0x970   : > { %2578 = vrcp.f32 %v1710_v16 }
 0x976   : > { %v2579_v17 = vpop.eup %2578 }
 0x977   : > { %v1712_v18 = vmul.f32 %v2579_v17, %v2577_v15 }
 0x979   : > { %v1713_v19 = vpack.c.bf16 %v1712_v18, %v1712_v18 }
 0x97b   : > { %2416 = vmatmul.msk.bf16.vlgmr.msrb.gmra.mxu1 %vm689_vm6, %v1713_v19 }
 0x9f8   : > { %v1730_v21 = vpop.f32.mrf.mxu1 }
 0x9f9   : > { %v1734_v22 = vpack.c.bf16 %v1730_v21, %v1730_v21 }
 0x9fb   : > { %2429 = vmatmul.msk.bf16.vlgmr.msrb.gmra.mxu2 %vm668_vm4, %v1734_v22 }
 0xa00   : > { %v1732_v23 = vpop.f32.mrf.mxu1 }
 0xa7e   : > { %v1764_v24 = vpop.f32.mrf.mxu2 }
 0xa7f   : > { %v1768_v25 = vadd.f32 %v1764_v24, %v1430_v4 }
 0xa81   : > { %v1769_v27 = vadd.f32 %v1768_v25, %v2665_v1 }
 0xa83   : > { %v1774_v28 = vadd.f32 %v2559_v26, %v1769_v27 }
 0xa85   : > { %v1775_v29 = vpack.c.bf16 %v1774_v28, %v1774_v28 }
 0xa86   : > { %v1766_v30 = vpop.f32.mrf.mxu2 }
 0xa87   : > { %1776 = vst [vmem:[%s381_s23] sm:$0xf] %v1775_v29 }
 0xa88 PF: > { %s21_s17 = sadd.s32 1, %s2586_s17  }
 0xa89   : > { %p18_p4 = scmp.ge.s32.totalorder %s21_s17, 4  }
 0xa8b   :  { %20 = sbr.rel (!%p18_p4) target bundleno = 1 (0x1), region = 115 }

// kernel: decoder_forward.17
= control target key start
LH: loop header
LB: loop body
LE: loop exit
PB: predicated region body
PF: predicated region fallthrough
CT: control target
= control target key end

     0   :  { %s1481_s24 = smov 0   ;;  %s1879_s0 = inlined_call_operand.vmem [shape: bf16[32,128], index: 0, kind: input, shape index: {}]   ;;  %s1880_s1 = inlined_call_operand.vmem [shape: f32[1,128], index: 1, kind: input, shape index: {}]   ;;  %s1881_s2 = inlined_call_operand.vmem [shape: f32[1,128], index: 2, kind: input, shape index: {}]   ;;  %s1882_s3 = inlined_call_operand.vmem [shape: bf16[128,512], index: 3, kind: input, shape index: {}]   ;;  %s1883_s4 = inlined_call_operand.vmem [shape: f32[1,512], index: 4, kind: input, shape index: {}]   ;;  %s1884_s5 = inlined_call_operand.vmem [shape: bf16[512,128], index: 5, kind: input, shape index: {}]   ;;  %s1885_s6 = inlined_call_operand.vmem [shape: f32[1,128], index: 6, kind: input, shape index: {}]   ;;  %s1886_s7 = inlined_call_operand.vmem [shape: bf16[32,128], index: 7, kind: output, shape index: {}]  }
   0x1 LB: > { %s1058_s25 = sadd.s32 4294967295, %s1438_s24   ;;  %p1062_p0 = scmp.ge.s32.totalorder %s1438_s24, 1  ;;  %s1438_s24 = sphi %s1481_s24, %s17_s24  }
   0x2   : > { %p238_p1 = scmp.lt.s32.totalorder %s1438_s24, 3 }
   0x4   : > { %p239_p2 = pnand %p1062_p0, %p238_p1 }
   0x5   : > { %s1063_s26 = sshll.u32 (!%p239_p2), %s1058_s25, 1 }
   0x6   : > { %242 = sbr.rel (%p239_p2) target bundleno = 610 (0x262), region = 48  ;;  %p271_p3 = scmp.lt.s32.totalorder (!%p239_p2), %s1063_s26, 3 }
   0xb   : > { %s1888_s26 = smov (!%p271_p3, %s1063_s26), 3  ;;  %v1440_v3 = vmov 128.0   ;;  %v1181_v18 = vld [vmem:[%s1882_s3 + $0xe0] sm:$0xf]  ;;  %v1355_v19 = vld [vmem:[%s1882_s3 + $0xec] sm:$0xf0] }
   0xc   : > { %s1064_s27 = sshll.u32 %s1888_s26, 2  ;;  %1410 = vrcp.f32 %v1440_v3  ;;  %v1353_v20 = vld [vmem:[%s1882_s3 + $0xe4] sm:$0xf]  ;;  %v1182_v21 = vor.u32 %v1355_v19, %v1181_v18  ;;  %v1183_v22 = vld [vmem:[%s1882_s3 + $0xf0] sm:$0xf0] }
   0xd   : > { %s274_s30 = scalar_lea.vmem %s1879_s0, %s1064_s27  ;;  %v1189_v23 = vld [vmem:[%s1882_s3 + $0xe8] sm:$0xf]  ;;  %v1356_v24 = vld [vmem:[%s1882_s3 + $0xf4] sm:$0xf0]  ;;  %v1186_v25 = vor.u32 %v1353_v20, %v1183_v22  ;;  %v1354_v27 = vld [vmem:[%s1882_s3 + $0xec] sm:$0xf]  ;;  %s280_s10 = scalar_lea.vmem %s1886_s7, %s1064_s27 }
   0xe   : > { %v1390_v0 = vld [vmem:[%s274_s30] sm:$0xff]   ;;  %v1190_v26 = vor.u32 %v1356_v24, %v1189_v23  ;;  %v1191_v28 = vld [vmem:[%s1882_s3 + $0xf8] sm:$0xf0]  ;;  %548 = vmatpush.bf16.msra.mxu0 %v1182_v21  ;;  %v1351_v31 = vld [vmem:[%s1882_s3 + $0xcc] sm:$0xf0] }
   0xf   : > { %v1497_v1 = vunpack.c.l.bf16 %v1390_v0  ;;  %v1500_v2 = vunpack.c.h.bf16 %v1390_v0  ;;  %v1194_v29 = vor.u32 %v1354_v27, %v1191_v28  ;;  %562 = vmatpush.bf16.msra.mxu1 %v1186_v25  ;;  %v1165_v30 = vld [vmem:[%s1882_s3 + $0xc0] sm:$0xf]  ;;  %v1349_v32 = vld [vmem:[%s1882_s3 + $0xc4] sm:$0xf]  ;;  %v1167_v34 = vld [vmem:[%s1882_s3 + $0xd0] sm:$0xf0] }
  0x10   : > { %576 = vmatpush.bf16.msra.mxu2 %v1190_v26  ;;  %v1166_v33 = vor.u32 %v1351_v31, %v1165_v30  ;;  %v1173_v35 = vld [vmem:[%s1882_s3 + $0xc8] sm:$0xf]  ;;  %v1352_v36 = vld [vmem:[%s1882_s3 + $0xd4] sm:$0xf0]  ;;  %v1170_v37 = vor.u32 %v1349_v32, %v1167_v34  ;;  %v1350_v39 = vld [vmem:[%s1882_s3 + $0xcc] sm:$0xf] }
  0x11   : > { %286 = vadd.xlane.f32.xlu0 %v1497_v1  ;;  %590 = vmatpush.bf16.msra.mxu3 %v1194_v29  ;;  %v1174_v38 = vor.u32 %v1352_v36, %v1173_v35  ;;  %v1175_v40 = vld [vmem:[%s1882_s3 + $0xd8] sm:$0xf0]  ;;  %v1149_v42 = vld [vmem:[%s1882_s3 + $0xa0] sm:$0xf]  ;;  %v1347_v43 = vld [vmem:[%s1882_s3 + $0xac] sm:$0xf0] }
  0x12   : > { %v1411_v4 = vpop.eup %1410  ;;  %549 = vmatpush.bf16.msra.mxu0 %v1166_v33  ;;  %v1178_v41 = vor.u32 %v1350_v39, %v1175_v40  ;;  %v1345_v44 = vld [vmem:[%s1882_s3 + $0xa4] sm:$0xf]  ;;  %v1150_v45 = vor.u32 %v1347_v43, %v1149_v42  ;;  %v1151_v46 = vld [vmem:[%s1882_s3 + $0xb0] sm:$0xf0]  ;;  %v1157_v47 = vld [vmem:[%s1882_s3 + $0xa8] sm:$0xf] }
  0x13   : > { %v291_v5 = vmul.f32 128.0, %v1411_v4  ;;  %vm295_vm0 = vweird.f32 %v1411_v4  ;;  %563 = vmatpush.bf16.msra.mxu1 %v1170_v37  ;;  %v1348_v48 = vld [vmem:[%s1882_s3 + $0xb4] sm:$0xf0]  ;;  %v1154_v49 = vor.u32 %v1345_v44, %v1151_v46  ;;  %v1346_v51 = vld [vmem:[%s1882_s3 + $0xac] sm:$0xf] }
  0x14   : > { %577 = vmatpush.bf16.msra.mxu2 %v1174_v38  ;;  %v1158_v50 = vor.u32 %v1348_v48, %v1157_v47  ;;  %v1159_v52 = vld [vmem:[%s1882_s3 + $0xb8] sm:$0xf0]  ;;  %v1133_v54 = vld [vmem:[%s1882_s3 + $0x80] sm:$0xf]  ;;  %v1343_v55 = vld [vmem:[%s1882_s3 + $0x8c] sm:$0xf0] }
  0x15   : > { %v292_v6 = vsub.f32 1.0, %v291_v5  ;;  %591 = vmatpush.bf16.msra.mxu3 %v1178_v41  ;;  %v1162_v53 = vor.u32 %v1346_v51, %v1159_v52  ;;  %v1341_v56 = vld [vmem:[%s1882_s3 + $0x84] sm:$0xf]  ;;  %v1134_v57 = vor.u32 %v1343_v55, %v1133_v54  ;;  %v1135_v58 = vld [vmem:[%s1882_s3 + $0x90] sm:$0xf0] }
  0x16   : > { %550 = vmatpush.bf16.msra.mxu0 %v1150_v45  ;;  %v1141_v59 = vld [vmem:[%s1882_s3 + $0x88] sm:$0xf]  ;;  %v1344_v60 = vld [vmem:[%s1882_s3 + $0x94] sm:$0xf0]  ;;  %v1138_v61 = vor.u32 %v1341_v56, %v1135_v58  ;;  %v1342_v63 = vld [vmem:[%s1882_s3 + $0x8c] sm:$0xf] }
  0x17   : > { %v293_v7 = vmul.f32 %v1411_v4, %v292_v6  ;;  %564 = vmatpush.bf16.msra.mxu1 %v1154_v49  ;;  %v1142_v62 = vor.u32 %v1344_v60, %v1141_v59  ;;  %v1143_v0 = vld [vmem:[%s1882_s3 + $0x98] sm:$0xf0]  ;;  %v1339_v5 = vld [vmem:[%s1882_s3 + $0x6c] sm:$0xf0]  ;;  %v1337_v6 = vld [vmem:[%s1882_s3 + $0x64] sm:$0xf] }
  0x18   : > { %578 = vmatpush.bf16.msra.mxu2 %v1158_v50  ;;  %v1146_v3 = vor.u32 %v1342_v63, %v1143_v0  ;;  %v1101_v19 = vld [vmem:[%s1882_s3 + $0x40] sm:$0xf]  ;;  %v1335_v20 = vld [vmem:[%s1882_s3 + $0x4c] sm:$0xf0]  ;;  %v1333_v21 = vld [vmem:[%s1882_s3 + $0x44] sm:$0xf] }
  0x19   : > { %288 = vadd.xlane.f32.xlu0 %v1500_v2  ;;  %v294_v8 = vadd.f32 %v1411_v4, %v293_v7  ;;  %592 = vmatpush.bf16.msra.mxu3 %v1162_v53  ;;  %v1102_v22 = vor.u32 %v1335_v20, %v1101_v19  ;;  %v1103_v23 = vld [vmem:[%s1882_s3 + $0x50] sm:$0xf0]  ;;  %v1109_v24 = vld [vmem:[%s1882_s3 + $0x48] sm:$0xf]  ;;  %v1336_v25 = vld [vmem:[%s1882_s3 + $0x54] sm:$0xf0] }
  0x1a   : > { %551 = vmatpush.bf16.msra.mxu0 %v1134_v57  ;;  %v1106_v26 = vor.u32 %v1333_v21, %v1103_v23  ;;  %v1110_v27 = vor.u32 %v1336_v25, %v1109_v24  ;;  %v1334_v28 = vld [vmem:[%s1882_s3 + $0x4c] sm:$0xf]  ;;  %v1111_v29 = vld [vmem:[%s1882_s3 + $0x58] sm:$0xf0]  ;;  %v1085_v31 = vld [vmem:[%s1882_s3 + $0x20] sm:$0xf] }
  0x1b   : > { %v1503_v9 = vsel %vm295_vm0, %v1411_v4, %v294_v8  ;;  %565 = vmatpush.bf16.msra.mxu1 %v1138_v61  ;;  %v1117_v4 = vld [vmem:[%s1882_s3 + $0x60] sm:$0xf]  ;;  %v1119_v8 = vld [vmem:[%s1882_s3 + $0x70] sm:$0xf0]  ;;  %v1114_v30 = vor.u32 %v1334_v28, %v1111_v29  ;;  %v1331_v32 = vld [vmem:[%s1882_s3 + $0x2c] sm:$0xf0] }
  0x1c   : > { %579 = vmatpush.bf16.msra.mxu2 %v1142_v62  ;;  %v1118_v7 = vor.u32 %v1339_v5, %v1117_v4  ;;  %v1329_v33 = vld [vmem:[%s1882_s3 + $0x24] sm:$0xf]  ;;  %v1086_v34 = vor.u32 %v1331_v32, %v1085_v31  ;;  %v1087_v35 = vld [vmem:[%s1882_s3 + $0x30] sm:$0xf0]  ;;  %v1093_v36 = vld [vmem:[%s1882_s3 + $0x28] sm:$0xf] }
  0x1d   : > { %593 = vmatpush.bf16.msra.mxu3 %v1146_v3  ;;  %v1332_v37 = vld [vmem:[%s1882_s3 + $0x34] sm:$0xf0]  ;;  %v1090_v38 = vor.u32 %v1329_v33, %v1087_v35  ;;  %v1330_v40 = vld [vmem:[%s1882_s3 + $0x2c] sm:$0xf]  ;;  %v1095_v41 = vld [vmem:[%s1882_s3 + $0x38] sm:$0xf0] }
  0x1e   : > { %552 = vmatpush.bf16.msra.mxu0 %v1118_v7  ;;  %v1094_v39 = vor.u32 %v1332_v37, %v1093_v36  ;;  %v1069_v42 = vld [vmem:[%s1882_s3] sm:$0xf]  ;;  %v1098_v44 = vor.u32 %v1330_v40, %v1095_v41  ;;  %v1327_v45 = vld [vmem:[%s1882_s3 + $0xc] sm:$0xf0]  ;;  %v1325_v46 = vld [vmem:[%s1882_s3 + $0x4] sm:$0xf] }
  0x1f   : > { %v1071_v47 = vld [vmem:[%s1882_s3 + $0x10] sm:$0xf0]  ;;  %v1070_v49 = vor.u32 %v1327_v45, %v1069_v42  ;;  %v1077_v51 = vld [vmem:[%s1882_s3 + $0x8] sm:$0xf]  ;;  %v1328_v52 = vld [vmem:[%s1882_s3 + $0x14] sm:$0xf0] }
  0x20   : > { %v1074_v50 = vor.u32 %v1325_v46, %v1071_v47  ;;  %v1326_v53 = vld [vmem:[%s1882_s3 + $0xc] sm:$0xf]  ;;  %v1078_v54 = vor.u32 %v1328_v52, %v1077_v51  ;;  %v1079_v55 = vld [vmem:[%s1882_s3 + $0x18] sm:$0xf0]  ;;  %v1408_v19 = vld [vmem:[%s1881_s2] ss:$0 sm:$0xff] }
  0x21   : > { %v1082_v57 = vor.u32 %v1326_v53, %v1079_v55  ;;  %v1363_v24 = vld [vmem:[%s1884_s5 + $0x30] sm:$0xff]  ;;  %v1362_v28 = vld [vmem:[%s1884_s5 + $0x28] sm:$0xff]  ;;  %v1361_v32 = vld [vmem:[%s1884_s5 + $0x20] sm:$0xff] }
  0x22   : > { %553 = vmatpush.bf16.msra.mxu0 %v1102_v22  ;;  %v1371_v25 = vld [vmem:[%s1884_s5 + $0x70] sm:$0xff]  ;;  %v1370_v29 = vld [vmem:[%s1884_s5 + $0x68] sm:$0xff]  ;;  %v1369_v33 = vld [vmem:[%s1884_s5 + $0x60] sm:$0xff] }
  0x23   : > { %v1387_v31 = vld [vmem:[%s1884_s5 + $0xf0] sm:$0xff]  ;;  %v1386_v35 = vld [vmem:[%s1884_s5 + $0xe8] sm:$0xff]  ;;  %v1360_v36 = vld [vmem:[%s1884_s5 + $0x18] sm:$0xff] }
  0x24   : > { %v1368_v37 = vld [vmem:[%s1884_s5 + $0x58] sm:$0xff]  ;;  %v1359_v40 = vld [vmem:[%s1884_s5 + $0x10] sm:$0xff]  ;;  %v1782_v42 = vld [vmem:[%s1883_s4] sm:$0xf] }
  0x25   : > { %v1367_v41 = vld [vmem:[%s1884_s5 + $0x50] sm:$0xff]  ;;  %v380_v45 = vperm.slane %v1782_v42, 0  ;;  %v381_v46 = vperm.slane %v1782_v42, 1  ;;  %v1358_v47 = vld [vmem:[%s1884_s5 + $0x8] sm:$0xff]  ;;  %v1357_v51 = vld [vmem:[%s1884_s5] sm:$0xff] }
  0x26   : > { %554 = vmatpush.bf16.msra.mxu0 %v1086_v34  ;;  %v1378_v34 = vld [vmem:[%s1884_s5 + $0xa8] sm:$0xff]  ;;  %v1365_v52 = vld [vmem:[%s1884_s5 + $0x40] sm:$0xff] }
  0x2a   : > { %555 = vmatpush.bf16.msra.mxu0 %v1070_v49  ;;  %v1375_v49 = vld [vmem:[%s1884_s5 + $0x90] sm:$0xff] }
  0x84   : > { %v287_v10 = vpop.xlane.xlu0 %286 }
  0x85   : > { %v297_v11 = vmul.f32 %v1503_v9, %v287_v10  ;;  %v1125_v10 = vld [vmem:[%s1882_s3 + $0x68] sm:$0xf] }
  0x87   : > { %v1507_v12 = vsub.f32 %v1497_v1, %v297_v11  ;;  %v1340_v11 = vld [vmem:[%s1882_s3 + $0x74] sm:$0xf0] }
  0x89   : > { %v301_v13 = vmul.f32 %v1507_v12, %v1507_v12 }
  0x8b   : > { %303 = vadd.xlane.f32.xlu1 %v301_v13  ;;  %v1122_v13 = vor.u32 %v1337_v6, %v1119_v8 }
  0x8c   : > { %v289_v14 = vpop.xlane.xlu0 %288 }
  0x8d   : > { %v298_v15 = vmul.f32 %v1503_v9, %v289_v14  ;;  %v1126_v14 = vor.u32 %v1340_v11, %v1125_v10  ;;  %566 = vmatpush.bf16.msra.mxu1 %v1122_v13  ;;  %v1407_v13 = vld [vmem:[%s1880_s1] ss:$0 sm:$0xff] }
  0x8f   : > { %v1513_v16 = vsub.f32 %v1500_v2, %v298_v15  ;;  %v1338_v15 = vld [vmem:[%s1882_s3 + $0x6c] sm:$0xf]  ;;  %580 = vmatpush.bf16.msra.mxu2 %v1126_v14 }
  0x91   : > { %v302_v17 = vmul.f32 %v1513_v16, %v1513_v16  ;;  %567 = vmatpush.bf16.msra.mxu1 %v1106_v26  ;;  %v1380_v26 = vld [vmem:[%s1884_s5 + $0xb8] sm:$0xff] }
  0x93   : > { %305 = vadd.xlane.f32.xlu1 %v302_v17  ;;  %v1127_v17 = vld [vmem:[%s1882_s3 + $0x78] sm:$0xf0]  ;;  %581 = vmatpush.bf16.msra.mxu2 %v1110_v27 }
  0x94   : > { %v1130_v18 = vor.u32 %v1338_v15, %v1127_v17  ;;  %v1388_v27 = vld [vmem:[%s1884_s5 + $0xf8] sm:$0xff] }
  0x95   : > { %568 = vmatpush.bf16.msra.mxu1 %v1090_v38  ;;  %v1377_v38 = vld [vmem:[%s1884_s5 + $0xa0] sm:$0xff] }
  0x96   : > { %594 = vmatpush.bf16.msra.mxu3 %v1130_v18 }
  0x97   : > { %582 = vmatpush.bf16.msra.mxu2 %v1094_v39  ;;  %v1385_v39 = vld [vmem:[%s1884_s5 + $0xe0] sm:$0xff] }
  0x99   : > { %569 = vmatpush.bf16.msra.mxu1 %v1074_v50  ;;  %v1383_v50 = vld [vmem:[%s1884_s5 + $0xd0] sm:$0xff] }
  0x9a   : > { %595 = vmatpush.bf16.msra.mxu3 %v1114_v30  ;;  %v1379_v30 = vld [vmem:[%s1884_s5 + $0xb0] sm:$0xff] }
  0x9b   : > { %583 = vmatpush.bf16.msra.mxu2 %v1078_v54 }
  0x9e   : > { %596 = vmatpush.bf16.msra.mxu3 %v1098_v44  ;;  %v1384_v44 = vld [vmem:[%s1884_s5 + $0xd8] sm:$0xff] }
  0x9f   : > { %968 = vmatpush.bf16.msrb.mxu2 %v1380_v26 }
  0xa2   : > { %597 = vmatpush.bf16.msra.mxu3 %v1082_v57  ;;  %v1374_v57 = vld [vmem:[%s1884_s5 + $0x88] sm:$0xff] }
  0xa3   : > { %969 = vmatpush.bf16.msrb.mxu2 %v1379_v30 }
  0xa6   : > { %982 = vmatpush.bf16.msrb.mxu3 %v1388_v27 }
  0xa7   : > { %970 = vmatpush.bf16.msrb.mxu2 %v1378_v34 }
  0xaa   : > { %983 = vmatpush.bf16.msrb.mxu3 %v1387_v31 }
  0xab   : > { %971 = vmatpush.bf16.msrb.mxu2 %v1377_v38 }
  0xae   : > { %984 = vmatpush.bf16.msrb.mxu3 %v1386_v35 }
  0xb2   : > { %985 = vmatpush.bf16.msrb.mxu3 %v1385_v39 }
  0xb6   : > { %986 = vmatpush.bf16.msrb.mxu3 %v1384_v44 }
  0xba   : > { %987 = vmatpush.bf16.msrb.mxu3 %v1383_v50 }
  0xfe   : > { %v304_v43 = vpop.xlane.xlu1 %303 }
  0xff   : > { %v307_v48 = vmul.f32 %v304_v43, %v1503_v9  ;;  %v1376_v43 = vld [vmem:[%s1884_s5 + $0x98] sm:$0xff] }
 0x100   : > { %972 = vmatpush.bf16.msrb.mxu2 %v1376_v43 }
 0x101   : > { %v309_v56 = vadd.f32 1e-05, %v307_v48  ;;  %v1366_v48 = vld [vmem:[%s1884_s5 + $0x48] sm:$0xff] }
 0x103   : > { %1412 = vrsqrt.f32 %v309_v56  ;;  %vm317_vm2 = vweird.f32 %v309_v56 }
 0x104   : > { %973 = vmatpush.bf16.msrb.mxu2 %v1375_v49 }
 0x106   : > { %v306_v58 = vpop.xlane.xlu1 %305 }
 0x107   : > { %v308_v59 = vmul.f32 %v306_v58, %v1503_v9  ;;  %v1382_v58 = vld [vmem:[%s1884_s5 + $0xc8] sm:$0xff] }
 0x108   : > { %974 = vmatpush.bf16.msrb.mxu2 %v1374_v57  ;;  %988 = vmatpush.bf16.msrb.mxu3 %v1382_v58 }
 0x109   : > { %v1413_v60 = vpop.eup %1412  ;;  %v310_v61 = vadd.f32 1e-05, %v308_v59 }
 0x10a   : > { %v312_v62 = vmul.f32 %v1413_v60, %v309_v56  ;;  %vm318_vm1 = vweird.f32 %v1413_v60 }
 0x10b   : > { %1414 = vrsqrt.f32 %v310_v61  ;;  %vm319_vm3 = vmor %vm317_vm2, %vm318_vm1  ;;  %vm327_vm5 = vweird.f32 %v310_v61 }
 0x10c   : > { %v313_v63 = vmul.f32 %v1413_v60, %v312_v62  ;;  %v383_v62 = vperm.slane %v1782_v42, 3 }
 0x10e   : > { %v314_v0 = vmul.f32 0.5, %v313_v63 }
 0x110   : > { %v315_v3 = vsub.f32 1.5, %v314_v0 }
 0x111   : > { %v1415_v4 = vpop.eup %1414 }
 0x112   : > { %v316_v5 = vmul.f32 %v1413_v60, %v315_v3  ;;  %v322_v6 = vmul.f32 %v1415_v4, %v310_v61  ;;  %vm328_vm4 = vweird.f32 %v1415_v4  ;;  %v382_v61 = vperm.slane %v1782_v42, 2  ;;  %v1373_v3 = vld [vmem:[%s1884_s5 + $0x80] sm:$0xff] }
 0x113   : > { %vm329_vm6 = vmor %vm327_vm5, %vm328_vm4  ;;  %975 = vmatpush.bf16.msrb.mxu2 %v1373_v3 }
 0x114   : > { %v323_v7 = vmul.f32 %v1415_v4, %v322_v6  ;;  %v320_v8 = vsel %vm319_vm3, %v1413_v60, %v316_v5 }
 0x115   : > { %v331_v9 = vmul.f32 %v320_v8, %v1507_v12  ;;  %v1364_v12 = vld [vmem:[%s1884_s5 + $0x38] sm:$0xff] }
 0x116   : > { %v324_v10 = vmul.f32 0.5, %v323_v7  ;;  %940 = vmatpush.bf16.msrb.mxu0 %v1364_v12 }
 0x117   : > { %v337_v18 = vmul.f32 %v1407_v13, %v331_v9 }
 0x118   : > { %v325_v11 = vsub.f32 1.5, %v324_v10 }
 0x119   : > { %v343_v21 = vadd.f32 %v1408_v19, %v337_v18 }
 0x11a   : > { %v326_v14 = vmul.f32 %v1415_v4, %v325_v11  ;;  %941 = vmatpush.bf16.msrb.mxu0 %v1363_v24 }
 0x11c   : > { %v330_v15 = vsel %vm329_vm6, %v1415_v4, %v326_v14  ;;  %v1381_v4 = vld [vmem:[%s1884_s5 + $0xc0] sm:$0xff] }
 0x11d   : > { %v332_v17 = vmul.f32 %v330_v15, %v1513_v16  ;;  %v1372_v16 = vld [vmem:[%s1884_s5 + $0x78] sm:$0xff]  ;;  %989 = vmatpush.bf16.msrb.mxu3 %v1381_v4 }
 0x11e   : > { %954 = vmatpush.bf16.msrb.mxu1 %v1372_v16  ;;  %942 = vmatpush.bf16.msrb.mxu0 %v1362_v28 }
 0x11f   : > { %v338_v20 = vmul.f32 %v1407_v13, %v332_v17 }
 0x121   : > { %v344_v22 = vadd.f32 %v1408_v19, %v338_v20 }
 0x122   : > { %955 = vmatpush.bf16.msrb.mxu1 %v1371_v25  ;;  %943 = vmatpush.bf16.msrb.mxu0 %v1361_v32 }
 0x123   : > { %v345_v23 = vpack.c.bf16 %v344_v22, %v343_v21 }
 0x125   : > { %556 = vmatmul.bf16.vlgmr.msra.gmra.mxu0 %v345_v23  ;;  %570 = vmatmul.bf16.vlgmr.msra.gmra.mxu1 %v345_v23 }
 0x126   : > { %584 = vmatmul.bf16.vlgmr.msra.gmra.mxu2 %v345_v23  ;;  %598 = vmatmul.bf16.vlgmr.msra.gmra.mxu3 %v345_v23 }
 0x127   : > { %956 = vmatpush.bf16.msrb.mxu1 %v1370_v29  ;;  %944 = vmatpush.bf16.msrb.mxu0 %v1360_v36 }
 0x12b   : > { %957 = vmatpush.bf16.msrb.mxu1 %v1369_v33  ;;  %945 = vmatpush.bf16.msrb.mxu0 %v1359_v40 }
 0x12f   : > { %958 = vmatpush.bf16.msrb.mxu1 %v1368_v37  ;;  %946 = vmatpush.bf16.msrb.mxu0 %v1358_v47 }
 0x133   : > { %959 = vmatpush.bf16.msrb.mxu1 %v1367_v41  ;;  %947 = vmatpush.bf16.msrb.mxu0 %v1357_v51 }
 0x137   : > { %960 = vmatpush.bf16.msrb.mxu1 %v1366_v48 }
 0x13b   : > { %961 = vmatpush.bf16.msrb.mxu1 %v1365_v52 }
 0x1a2   : > { %v557_v53 = vpop.f32.mrf.mxu0  ;;  %v571_v54 = vpop.f32.mrf.mxu1 }
 0x1a3   : > { %v1810_v55 = vadd.f32 %v557_v53, %v380_v45  ;;  %v1812_v56 = vadd.f32 %v571_v54, %v381_v46 }
 0x1a5   : > { %v604_v59 = vmul.f32 %v1810_v55, %v1810_v55  ;;  %v605_v60 = vmul.f32 %v1812_v56, %v1812_v56 }
 0x1a7   : > { %v612_v63 = vmul.f32 %v604_v59, %v1810_v55  ;;  %v613_v0 = vmul.f32 %v605_v60, %v1812_v56 }
 0x1a9   : > { %v620_v5 = vmul.f32 0.044715, %v612_v63  ;;  %v621_v6 = vmul.f32 0.044715, %v613_v0  ;;  %v585_v7 = vpop.f32.mrf.mxu2  ;;  %v599_v8 = vpop.f32.mrf.mxu3 }
 0x1aa   : > { %v1834_v10 = vadd.f32 %v585_v7, %v382_v61  ;;  %v1836_v11 = vadd.f32 %v599_v8, %v383_v62  ;;  %v559_v9 = vpop.f32.mrf.mxu0  ;;  %v573_v13 = vpop.f32.mrf.mxu1 }
 0x1ab   : > { %v628_v14 = vadd.f32 %v620_v5, %v1810_v55  ;;  %v629_v15 = vadd.f32 %v621_v6, %v1812_v56  ;;  %v1840_v17 = vadd.f32 %v559_v9, %v380_v45  ;;  %v1842_v18 = vadd.f32 %v573_v13, %v381_v46 }
 0x1ac   : > { %v606_v19 = vmul.f32 %v1834_v10, %v1834_v10  ;;  %v607_v20 = vmul.f32 %v1836_v11, %v1836_v11 }
 0x1ad   : > { %v636_v21 = vmul.f32 0.7978846, %v628_v14  ;;  %v608_v22 = vmul.f32 %v1840_v17, %v1840_v17  ;;  %v609_v23 = vmul.f32 %v1842_v18, %v1842_v18  ;;  %v637_v24 = vmul.f32 0.7978846, %v629_v15 }
 0x1ae   : > { %v614_v12 = vmul.f32 %v606_v19, %v1834_v10  ;;  %v615_v16 = vmul.f32 %v607_v20, %v1836_v11 }
 0x1af   : > { %v616_v25 = vmul.f32 %v608_v22, %v1840_v17  ;;  %v617_v26 = vmul.f32 %v609_v23, %v1842_v18  ;;  %1416 = vtanh.f32 %v636_v21 }
 0x1b0   : > { %v622_v27 = vmul.f32 0.044715, %v614_v12  ;;  %v623_v28 = vmul.f32 0.044715, %v615_v16  ;;  %1418 = vtanh.f32 %v637_v24 }
 0x1b1   : > { %v624_v29 = vmul.f32 0.044715, %v616_v25  ;;  %v625_v30 = vmul.f32 0.044715, %v617_v26  ;;  %v587_v31 = vpop.f32.mrf.mxu2  ;;  %v601_v32 = vpop.f32.mrf.mxu3 }
 0x1b2   : > { %v630_v33 = vadd.f32 %v622_v27, %v1834_v10  ;;  %v631_v34 = vadd.f32 %v623_v28, %v1836_v11  ;;  %v588_v35 = vadd.f32 %v587_v31, %v382_v61  ;;  %v602_v36 = vadd.f32 %v601_v32, %v383_v62 }
 0x1b3   : > { %v632_v37 = vadd.f32 %v624_v29, %v1840_v17  ;;  %v633_v38 = vadd.f32 %v625_v30, %v1842_v18  ;;  %v1409_v30 = vld [vmem:[%s1885_s6] ss:$0 sm:$0xff] }
 0x1b4   : > { %v638_v39 = vmul.f32 0.7978846, %v630_v33  ;;  %v639_v40 = vmul.f32 0.7978846, %v631_v34  ;;  %v610_v41 = vmul.f32 %v588_v35, %v588_v35  ;;  %v611_v42 = vmul.f32 %v602_v36, %v602_v36 }
 0x1b5   : > { %v640_v43 = vmul.f32 0.7978846, %v632_v37  ;;  %v641_v44 = vmul.f32 0.7978846, %v633_v38  ;;  %v1417_v47 = vpop.eup %1416 }
 0x1b6   : > { %1420 = vtanh.f32 %v638_v39  ;;  %v618_v45 = vmul.f32 %v610_v41, %v588_v35  ;;  %v619_v46 = vmul.f32 %v611_v42, %v602_v36  ;;  %v1419_v50 = vpop.eup %1418  ;;  %v652_v53 = vadd.f32 1.0, %v1417_v47 }
 0x1b7   : > { %1422 = vtanh.f32 %v639_v40  ;;  %v653_v59 = vadd.f32 1.0, %v1419_v50 }
 0x1b8   : > { %1424 = vtanh.f32 %v640_v43  ;;  %v626_v48 = vmul.f32 0.044715, %v618_v45  ;;  %v627_v49 = vmul.f32 0.044715, %v619_v46  ;;  %v660_v0 = vmul.f32 0.5, %v652_v53 }
 0x1b9   : > { %1426 = vtanh.f32 %v641_v44  ;;  %v661_v4 = vmul.f32 0.5, %v653_v59 }
 0x1ba   : > { %v634_v51 = vadd.f32 %v626_v48, %v588_v35  ;;  %v635_v52 = vadd.f32 %v627_v49, %v602_v36  ;;  %v668_v9 = vmul.f32 %v660_v0, %v1810_v55 }
 0x1bb   : > { %v669_v15 = vmul.f32 %v661_v4, %v1812_v56 }
 0x1bc   : > { %v1421_v54 = vpop.eup %1420  ;;  %v642_v57 = vmul.f32 0.7978846, %v634_v51  ;;  %v643_v58 = vmul.f32 0.7978846, %v635_v52 }
 0x1bd   : > { %v1423_v60 = vpop.eup %1422  ;;  %v654_v6 = vadd.f32 1.0, %v1421_v54 }
 0x1be   : > { %v1425_v61 = vpop.eup %1424  ;;  %1428 = vtanh.f32 %v642_v57  ;;  %v655_v8 = vadd.f32 1.0, %v1423_v60 }
 0x1bf   : > { %v1427_v62 = vpop.eup %1426  ;;  %1430 = vtanh.f32 %v643_v58  ;;  %v656_v63 = vadd.f32 1.0, %v1425_v61  ;;  %v662_v23 = vmul.f32 0.5, %v654_v6 }
 0x1c0   : > { %v657_v3 = vadd.f32 1.0, %v1427_v62  ;;  %v663_v24 = vmul.f32 0.5, %v655_v8 }
 0x1c1   : > { %v664_v5 = vmul.f32 0.5, %v656_v63  ;;  %v670_v55 = vmul.f32 %v662_v23, %v1834_v10 }
 0x1c2   : > { %v665_v7 = vmul.f32 0.5, %v657_v3 }
 0x1c3   : > { %v672_v13 = vmul.f32 %v664_v5, %v1840_v17  ;;  %v671_v17 = vmul.f32 %v663_v24, %v1836_v11 }
 0x1c4   : > { %v1429_v14 = vpop.eup %1428  ;;  %v673_v19 = vmul.f32 %v665_v7, %v1842_v18 }
 0x1c5   : > { %v1431_v20 = vpop.eup %1430  ;;  %v676_v21 = vpack.c.bf16 %v672_v13, %v668_v9  ;;  %v658_v22 = vadd.f32 1.0, %v1429_v14 }
 0x1c6   : > { %v677_v12 = vpack.c.bf16 %v673_v19, %v669_v15  ;;  %v659_v16 = vadd.f32 1.0, %v1431_v20 }
 0x1c7   : > { %948 = vmatmul.bf16.vlgmr.msrb.gmra.mxu0 %v676_v21  ;;  %v666_v25 = vmul.f32 0.5, %v658_v22 }
 0x1c8   : > { %962 = vmatmul.bf16.vlgmr.msrb.gmra.mxu1 %v677_v12  ;;  %v667_v26 = vmul.f32 0.5, %v659_v16 }
 0x1c9   : > { %v674_v27 = vmul.f32 %v666_v25, %v588_v35 }
 0x1ca   : > { %v675_v28 = vmul.f32 %v667_v26, %v602_v36 }
 0x1cb   : > { %v678_v56 = vpack.c.bf16 %v674_v27, %v670_v55 }
 0x1cc   : > { %v679_v29 = vpack.c.bf16 %v675_v28, %v671_v17 }
 0x1cd   : > { %976 = vmatmul.bf16.vlgmr.msrb.gmra.mxu2 %v678_v56 }
 0x1ce   : > { %990 = vmatmul.bf16.vlgmr.msrb.gmra.mxu3 %v679_v29 }
 0x244   : > { %v949_v18 = vpop.f32.mrf.mxu0 }
 0x245   : > { %v963_v31 = vpop.f32.mrf.mxu1  ;;  %v950_v32 = vadd.f32 %v1409_v30, %v949_v18 }
 0x247   : > { %v964_v10 = vadd.f32 %v963_v31, %v950_v32 }
 0x24c   : > { %v951_v33 = vpop.f32.mrf.mxu0 }
 0x24d   : > { %v952_v35 = vadd.f32 %v1409_v30, %v951_v33  ;;  %v965_v11 = vpop.f32.mrf.mxu1 }
 0x24f   : > { %v966_v36 = vadd.f32 %v965_v11, %v952_v35 }
 0x250   : > { %v977_v34 = vpop.f32.mrf.mxu2 }
 0x251   : > { %v991_v37 = vpop.f32.mrf.mxu3  ;;  %v978_v38 = vadd.f32 %v977_v34, %v964_v10 }
 0x253   : > { %v992_v40 = vadd.f32 %v991_v37, %v978_v38 }
 0x255   : > { %v996_v44 = vadd.f32 %v1497_v1, %v992_v40 }
 0x258   : > { %v979_v39 = vpop.f32.mrf.mxu2 }
 0x259   : > { %v980_v41 = vadd.f32 %v979_v39, %v966_v36  ;;  %v993_v42 = vpop.f32.mrf.mxu3 }
 0x25b   : > { %v994_v43 = vadd.f32 %v993_v42, %v980_v41 }
 0x25d   : > { %v997_v45 = vadd.f32 %v1500_v2, %v994_v43 }
 0x25f   : > { %v1396_v46 = vpack.c.bf16 %v997_v45, %v996_v44 }
 0x261   : > { %1397 = vst [vmem:[%s280_s10] sm:$0xff] %v1396_v46  }
 0x262 PF: > { %s17_s24 = sadd.s32 1, %s1438_s24  }
 0x263   : > { %p14_p4 = scmp.ge.s32.totalorder %s17_s24, 4  }
 0x265   :  { %16 = sbr.rel (!%p14_p4) target bundleno = 1 (0x1), region = 78 }

// kernel: decoder_forward.20
= control target key start
LH: loop header
LB: loop body
LE: loop exit
PB: predicated region body
PF: predicated region fallthrough
CT: control target
= control target key end

     0   :  { %s510_s12 = smov 0   ;;  %s632_s0 = inlined_call_operand.vmem [shape: bf16[32,128], index: 0, kind: input, shape index: {}]   ;;  %s633_s1 = inlined_call_operand.vmem [shape: bf16[128,256], index: 1, kind: input, shape index: {}]   ;;  %s634_s2 = inlined_call_operand.vmem [shape: f32[1,256], index: 2, kind: input, shape index: {}]   ;;  %s635_s3 = inlined_call_operand.vmem [shape: bf16[32,256], index: 3, kind: output, shape index: {}]  }
   0x1 LB: > { %s376_s13 = sadd.s32 4294967295, %s488_s12   ;;  %p380_p0 = scmp.ge.s32.totalorder %s488_s12, 1  ;;  %s488_s12 = sphi %s510_s12, %s13_s12  }
   0x2   : > { %p138_p1 = scmp.lt.s32.totalorder %s488_s12, 3 }
   0x4   : > { %p139_p2 = pnand %p380_p0, %p138_p1 }
   0x5   : > { %s381_s29 = sshll.u32 (!%p139_p2), %s376_s13, 1 }
   0x6   : > { %142 = sbr.rel (%p139_p2) target bundleno = 185 (0xb9), region = 32  ;;  %p164_p3 = scmp.lt.s32.totalorder (!%p139_p2), %s381_s29, 3 }
   0xb   : > { %v448_v0 = vld [vmem:[%s633_s1 + $0x70] sm:$0xf]  ;;  %v473_v1 = vld [vmem:[%s633_s1 + $0x74] sm:$0xf0]  ;;  %v472_v2 = vld [vmem:[%s633_s1 + $0x74] sm:$0xf] }
   0xc   : > { %v449_v3 = vor.u32 %v473_v1, %v448_v0  ;;  %v450_v4 = vld [vmem:[%s633_s1 + $0x78] sm:$0xf0]  ;;  %v440_v5 = vld [vmem:[%s633_s1 + $0x60] sm:$0xf]  ;;  %v471_v6 = vld [vmem:[%s633_s1 + $0x64] sm:$0xf0] }
   0xd   : > { %v453_v7 = vor.u32 %v472_v2, %v450_v4  ;;  %v470_v8 = vld [vmem:[%s633_s1 + $0x64] sm:$0xf]  ;;  %v442_v9 = vld [vmem:[%s633_s1 + $0x68] sm:$0xf0]  ;;  %v441_v10 = vor.u32 %v471_v6, %v440_v5  ;;  %v432_v12 = vld [vmem:[%s633_s1 + $0x50] sm:$0xf] }
   0xe   : > { %286 = vmatpush.bf16.msra.mxu0 %v449_v3  ;;  %v445_v11 = vor.u32 %v470_v8, %v442_v9  ;;  %v469_v13 = vld [vmem:[%s633_s1 + $0x54] sm:$0xf0]  ;;  %v468_v14 = vld [vmem:[%s633_s1 + $0x54] sm:$0xf]  ;;  %v434_v15 = vld [vmem:[%s633_s1 + $0x58] sm:$0xf0] }
   0xf   : > { %300 = vmatpush.bf16.msra.mxu1 %v453_v7  ;;  %v433_v16 = vor.u32 %v469_v13, %v432_v12  ;;  %v437_v17 = vor.u32 %v468_v14, %v434_v15  ;;  %v424_v18 = vld [vmem:[%s633_s1 + $0x40] sm:$0xf]  ;;  %v467_v19 = vld [vmem:[%s633_s1 + $0x44] sm:$0xf0]  ;;  %v466_v20 = vld [vmem:[%s633_s1 + $0x44] sm:$0xf] }
  0x10   : > { %v426_v21 = vld [vmem:[%s633_s1 + $0x48] sm:$0xf0]  ;;  %v425_v22 = vor.u32 %v467_v19, %v424_v18  ;;  %v416_v24 = vld [vmem:[%s633_s1 + $0x30] sm:$0xf]  ;;  %v465_v25 = vld [vmem:[%s633_s1 + $0x34] sm:$0xf0] }
  0x11   : > { %v429_v23 = vor.u32 %v466_v20, %v426_v21  ;;  %v464_v26 = vld [vmem:[%s633_s1 + $0x34] sm:$0xf]  ;;  %v418_v27 = vld [vmem:[%s633_s1 + $0x38] sm:$0xf0]  ;;  %v417_v28 = vor.u32 %v465_v25, %v416_v24  ;;  %v408_v30 = vld [vmem:[%s633_s1 + $0x20] sm:$0xf] }
  0x12   : > { %287 = vmatpush.bf16.msra.mxu0 %v441_v10  ;;  %v421_v29 = vor.u32 %v464_v26, %v418_v27  ;;  %v463_v31 = vld [vmem:[%s633_s1 + $0x24] sm:$0xf0]  ;;  %v462_v32 = vld [vmem:[%s633_s1 + $0x24] sm:$0xf]  ;;  %v410_v33 = vld [vmem:[%s633_s1 + $0x28] sm:$0xf0] }
  0x13   : > { %301 = vmatpush.bf16.msra.mxu1 %v445_v11  ;;  %v409_v34 = vor.u32 %v463_v31, %v408_v30  ;;  %v413_v35 = vor.u32 %v462_v32, %v410_v33  ;;  %v400_v36 = vld [vmem:[%s633_s1 + $0x10] sm:$0xf]  ;;  %v461_v37 = vld [vmem:[%s633_s1 + $0x14] sm:$0xf0]  ;;  %s637_s29 = smov (!%p164_p3, %s381_s29), 3 }
  0x14   : > { %v460_v38 = vld [vmem:[%s633_s1 + $0x14] sm:$0xf]  ;;  %v402_v39 = vld [vmem:[%s633_s1 + $0x18] sm:$0xf0]  ;;  %v401_v40 = vor.u32 %v461_v37, %v400_v36  ;;  %v392_v42 = vld [vmem:[%s633_s1] sm:$0xf] }
  0x15   : > { %v405_v41 = vor.u32 %v460_v38, %v402_v39  ;;  %v459_v43 = vld [vmem:[%s633_s1 + $0x4] sm:$0xf0]  ;;  %s382_s24 = sshll.u32 %s637_s29, 2  ;;  %v458_v44 = vld [vmem:[%s633_s1 + $0x4] sm:$0xf]  ;;  %s456_s8 = sshll.u32 %s637_s29, 3 }
  0x16   : > { %288 = vmatpush.bf16.msra.mxu0 %v433_v16  ;;  %v394_v45 = vld [vmem:[%s633_s1 + $0x8] sm:$0xf0]  ;;  %v393_v46 = vor.u32 %v459_v43, %v392_v42  ;;  %s167_s5 = scalar_lea.vmem %s632_s0, %s382_s24  ;;  %v194_v49 = vld [vmem:[%s634_s2] sm:$0x3]  ;;  %s174_s13 = scalar_lea.vmem %s635_s3, %s456_s8 }
  0x17   : > { %302 = vmatpush.bf16.msra.mxu1 %v437_v17  ;;  %v397_v47 = vor.u32 %v458_v44, %v394_v45  ;;  %v457_v48 = vld [vmem:[%s167_s5] sm:$0xff]  ;;  %v196_v50 = vperm.slane %v194_v49, 0  ;;  %v197_v51 = vperm.slane %v194_v49, 1 }
  0x1a   : > { %289 = vmatpush.bf16.msra.mxu0 %v425_v22 }
  0x1b   : > { %303 = vmatpush.bf16.msra.mxu1 %v429_v23 }
  0x1e   : > { %290 = vmatpush.bf16.msra.mxu0 %v417_v28 }
  0x1f   : > { %304 = vmatpush.bf16.msra.mxu1 %v421_v29 }
  0x22   : > { %291 = vmatpush.bf16.msra.mxu0 %v409_v34 }
  0x23   : > { %305 = vmatpush.bf16.msra.mxu1 %v413_v35 }
  0x26   : > { %292 = vmatpush.bf16.msra.mxu0 %v401_v40 }
  0x27   : > { %306 = vmatpush.bf16.msra.mxu1 %v405_v41 }
  0x2a   : > { %293 = vmatpush.bf16.msra.mxu0 %v393_v46 }
  0x2b   : > { %307 = vmatpush.bf16.msra.mxu1 %v397_v47 }
  0x2d   : > { %294 = vmatmul.bf16.vlgmr.msra.gmra.mxu0 %v457_v48 }
  0x2e   : > { %308 = vmatmul.bf16.vlgmr.msra.gmra.mxu1 %v457_v48 }
  0xaa   : > { %v295_v52 = vpop.f32.mrf.mxu0 }
  0xab   : > { %v296_v53 = vadd.f32 %v295_v52, %v196_v50  ;;  %v309_v54 = vpop.f32.mrf.mxu1 }
  0xac   : > { %v310_v55 = vadd.f32 %v309_v54, %v197_v51 }
  0xae   : > { %v314_v56 = vpack.c.bf16 %v310_v55, %v296_v53 }
  0xb0   : > { %316 = vst [vmem:[%s174_s13] sm:$0xff] %v314_v56 }
  0xb2   : > { %v297_v57 = vpop.f32.mrf.mxu0 }
  0xb3   : > { %v298_v58 = vadd.f32 %v297_v57, %v196_v50  ;;  %v311_v59 = vpop.f32.mrf.mxu1 }
  0xb4   : > { %v312_v60 = vadd.f32 %v311_v59, %v197_v51 }
  0xb6   : > { %v315_v61 = vpack.c.bf16 %v312_v60, %v298_v58 }
  0xb8   : > { %317 = vst [vmem:[%s174_s13 + $0x8] sm:$0xff] %v315_v61 }
  0xb9 PF: > { %s13_s12 = sadd.s32 1, %s488_s12  }
  0xba   : > { %p10_p4 = scmp.ge.s32.totalorder %s13_s12, 4  }
  0xbc   :  { %12 = sbr.rel (!%p10_p4) target bundleno = 1 (0x1), region = 62 }

// kernel: decoder_forward.16
= control target key start
LH: loop header
LB: loop body
LE: loop exit
PB: predicated region body
PF: predicated region fallthrough
CT: control target
= control target key end

     0   :  { %s2776_s17 = smov 0   ;;  %s3238_s0 = inlined_call_operand.vmem [shape: bf16[2,16,128], index: 0, kind: input, shape index: {}]   ;;  %s3239_s1 = inlined_call_operand.vmem [shape: f32[1,128], index: 1, kind: input, shape index: {}]   ;;  %s3240_s2 = inlined_call_operand.vmem [shape: f32[1,128], index: 2, kind: input, shape index: {}]   ;;  %s3241_s3 = inlined_call_operand.vmem [shape: bf16[4,128,32], index: 3, kind: input, shape index: {}]   ;;  %s3242_s4 = inlined_call_operand.vmem [shape: f32[4,1,32], index: 4, kind: input, shape index: {}]   ;;  %s3243_s5 = inlined_call_operand.vmem [shape: bf16[4,128,32], index: 5, kind: input, shape index: {}]   ;;  %s3244_s6 = inlined_call_operand.vmem [shape: f32[4,1,32], index: 6, kind: input, shape index: {}]   ;;  %s3245_s7 = inlined_call_operand.vmem [shape: bf16[4,128,32], index: 7, kind: input, shape index: {}]   ;;  %s3246_s8 = inlined_call_operand.vmem [shape: f32[4,1,32], index: 8, kind: input, shape index: {}]   ;;  %s3247_s9 = inlined_call_operand.vmem [shape: bf16[4,32,128], index: 9, kind: input, shape index: {}]   ;;  %s3248_s10 = inlined_call_operand.vmem [shape: f32[1,128], index: 10, kind: input, shape index: {}]   ;;  %s3249_s11 = inlined_call_operand.vmem [shape: bf16[2,16,128], index: 11, kind: output, shape index: {}]  }
   0x1 LB: > { %s1926_s18 = sadd.s32 4294967295, %s2713_s17   ;;  %p1930_p0 = scmp.ge.s32.totalorder %s2713_s17, 1  ;;  %s2713_s17 = sphi %s2776_s17, %s21_s17  }
   0x2   : > { %p337_p1 = scmp.lt.s32.totalorder %s2713_s17, 3 }
   0x4   : > { %p338_p2 = pnand %p1930_p0, %p337_p1 }
   0x5   : > { %p377_p3 = scmp.lt.s32.totalorder (!%p338_p2), %s1926_s18, 1 }
   0x6   : > { %341 = sbr.rel (%p338_p2) target bundleno = 2784 (0xae0), region = 64 }
   0xb   : > { %s3251_s18 = smov (!%p377_p3, %s1926_s18), 1  ;;  %v2715_v3 = vmov 128.0   ;;  %v2547_v6 = vld [vmem:[%s3243_s5 + $0x38] sm:$0xff]  ;;  %v2546_v8 = vld [vmem:[%s3243_s5 + $0x30] sm:$0xff]  ;;  %v2545_v11 = vld [vmem:[%s3243_s5 + $0x28] sm:$0xff]  ;;  %vm700_vm7 = vcmask 261120  }
   0xc   : > { %s2530_s19 = sshll.u32 %s3251_s18, 3  ;;  %2669 = vrcp.f32 %v2715_v3  ;;  %v2539_v7 = vld [vmem:[%s3241_s3 + $0x38] sm:$0xff]  ;;  %602 = vmatpush.bf16.msra.mxu1 %v2547_v6  ;;  %v2538_v10 = vld [vmem:[%s3241_s3 + $0x30] sm:$0xff]  ;;  %v2544_v13 = vld [vmem:[%s3243_s5 + $0x20] sm:$0xff]  ;;  %vm723_vm8 = vcmask 130048  }
   0xd   : > { %s381_s22 = scalar_lea.vmem %s3238_s0, %s2530_s19  ;;  %520 = vmatpush.bf16.msra.mxu0 %v2539_v7  ;;  %v2543_v15 = vld [vmem:[%s3243_s5 + $0x18] sm:$0xff]  ;;  %v2542_v25 = vld [vmem:[%s3243_s5 + $0x10] sm:$0xff]  ;;  %v2537_v26 = vld [vmem:[%s3241_s3 + $0x28] sm:$0xff]  ;;  %s386_s23 = scalar_lea.vmem %s3249_s11, %s2530_s19 }
   0xe   : > { %v2637_v0 = vld [vmem:[%s381_s22] sm:$0xff]   ;;  %v2541_v27 = vld [vmem:[%s3243_s5 + $0x8] sm:$0xff]  ;;  %v2555_v29 = vld [vmem:[%s3245_s7 + $0x38] sm:$0xff] }
   0xf   : > { %v2792_v1 = vunpack.c.l.bf16 %v2637_v0  ;;  %v2795_v2 = vunpack.c.h.bf16 %v2637_v0  ;;  %v2536_v28 = vld [vmem:[%s3241_s3 + $0x20] sm:$0xff]  ;;  %684 = vmatpush.bf16.msra.mxu2 %v2555_v29  ;;  %v2535_v31 = vld [vmem:[%s3241_s3 + $0x18] sm:$0xff]  ;;  %v2554_v33 = vld [vmem:[%s3245_s7 + $0x30] sm:$0xff] }
  0x10   : > { %603 = vmatpush.bf16.msra.mxu1 %v2546_v8  ;;  %v2540_v30 = vld [vmem:[%s3243_s5] sm:$0xff]  ;;  %v2581_v32 = vld [vmem:[%s3245_s7 + $0x78] sm:$0xff]  ;;  %v2534_v34 = vld [vmem:[%s3241_s3 + $0x10] sm:$0xff] }
  0x11   : > { %392 = vadd.xlane.f32.xlu0 %v2792_v1  ;;  %521 = vmatpush.bf16.msra.mxu0 %v2538_v10  ;;  %v2580_v35 = vld [vmem:[%s3245_s7 + $0x70] sm:$0xff]  ;;  %v2553_v36 = vld [vmem:[%s3245_s7 + $0x28] sm:$0xff]  ;;  %v2552_v39 = vld [vmem:[%s3245_s7 + $0x20] sm:$0xff] }
  0x12   : > { %v2670_v4 = vpop.eup %2669  ;;  %v2533_v37 = vld [vmem:[%s3241_s3 + $0x8] sm:$0xff]  ;;  %v2532_v40 = vld [vmem:[%s3241_s3] sm:$0xff]  ;;  %v2551_v42 = vld [vmem:[%s3245_s7 + $0x18] sm:$0xff] }
  0x13   : > { %v397_v5 = vmul.f32 128.0, %v2670_v4  ;;  %vm401_vm0 = vweird.f32 %v2670_v4  ;;  %685 = vmatpush.bf16.msra.mxu2 %v2554_v33  ;;  %v2579_v38 = vld [vmem:[%s3245_s7 + $0x68] sm:$0xff]  ;;  %v2578_v41 = vld [vmem:[%s3245_s7 + $0x60] sm:$0xff]  ;;  %v2573_v43 = vld [vmem:[%s3243_s5 + $0x78] sm:$0xff] }
  0x14   : > { %604 = vmatpush.bf16.msra.mxu1 %v2545_v11  ;;  %v2577_v44 = vld [vmem:[%s3245_s7 + $0x58] sm:$0xff]  ;;  %v2550_v45 = vld [vmem:[%s3245_s7 + $0x10] sm:$0xff]  ;;  %v2549_v48 = vld [vmem:[%s3245_s7 + $0x8] sm:$0xff] }
  0x15   : > { %v398_v9 = vsub.f32 1.0, %v397_v5  ;;  %522 = vmatpush.bf16.msra.mxu0 %v2537_v26  ;;  %v2572_v46 = vld [vmem:[%s3243_s5 + $0x70] sm:$0xff]  ;;  %v2571_v49 = vld [vmem:[%s3243_s5 + $0x68] sm:$0xff]  ;;  %v2548_v53 = vld [vmem:[%s3245_s7] sm:$0xff] }
  0x16   : > { %v2576_v47 = vld [vmem:[%s3245_s7 + $0x50] sm:$0xff]  ;;  %v2575_v52 = vld [vmem:[%s3245_s7 + $0x48] sm:$0xff]  ;;  %v2570_v54 = vld [vmem:[%s3243_s5 + $0x60] sm:$0xff] }
  0x17   : > { %v399_v12 = vmul.f32 %v2670_v4, %v398_v9  ;;  %686 = vmatpush.bf16.msra.mxu2 %v2553_v36  ;;  %v2574_v56 = vld [vmem:[%s3245_s7 + $0x40] sm:$0xff]  ;;  %v2569_v57 = vld [vmem:[%s3243_s5 + $0x58] sm:$0xff]  ;;  %v2568_v60 = vld [vmem:[%s3243_s5 + $0x50] sm:$0xff] }
  0x18   : > { %605 = vmatpush.bf16.msra.mxu1 %v2544_v13  ;;  %v2567_v0 = vld [vmem:[%s3243_s5 + $0x48] sm:$0xff]  ;;  %v2566_v5 = vld [vmem:[%s3243_s5 + $0x40] sm:$0xff]  ;;  %v2591_v26 = vld [vmem:[%s3241_s3 + $0xb8] sm:$0xff] }
  0x19   : > { %394 = vadd.xlane.f32.xlu0 %v2795_v2  ;;  %v400_v14 = vadd.f32 %v2670_v4, %v399_v12  ;;  %523 = vmatpush.bf16.msra.mxu0 %v2536_v28  ;;  %v2588_v28 = vld [vmem:[%s3241_s3 + $0xa0] sm:$0xff]  ;;  %v2587_v29 = vld [vmem:[%s3241_s3 + $0x98] sm:$0xff] }
  0x1b   : > { %v2819_v16 = vsel %vm401_vm0, %v2670_v4, %v400_v14  ;;  %687 = vmatpush.bf16.msra.mxu2 %v2552_v39  ;;  %v2654_v14 = vld [vmem:[%s3239_s1] ss:$0 sm:$0xff] }
  0x1c   : > { %606 = vmatpush.bf16.msra.mxu1 %v2543_v15 }
  0x1d   : > { %524 = vmatpush.bf16.msra.mxu0 %v2535_v31  ;;  %v2585_v31 = vld [vmem:[%s3241_s3 + $0x88] sm:$0xff] }
  0x1f   : > { %688 = vmatpush.bf16.msra.mxu2 %v2551_v42  ;;  %v2658_v42 = vld [vmem:[%s3246_s8] ss:$0 sm:$0xff] }
  0x20   : > { %607 = vmatpush.bf16.msra.mxu1 %v2542_v25 }
  0x21   : > { %525 = vmatpush.bf16.msra.mxu0 %v2534_v34 }
  0x23   : > { %689 = vmatpush.bf16.msra.mxu2 %v2550_v45 }
  0x24   : > { %608 = vmatpush.bf16.msra.mxu1 %v2541_v27 }
  0x25   : > { %526 = vmatpush.bf16.msra.mxu0 %v2533_v37 }
  0x27   : > { %690 = vmatpush.bf16.msra.mxu2 %v2549_v48 }
  0x28   : > { %609 = vmatpush.bf16.msra.mxu1 %v2540_v30  ;;  %v2586_v30 = vld [vmem:[%s3241_s3 + $0x90] sm:$0xff] }
  0x29   : > { %527 = vmatpush.bf16.msra.mxu0 %v2532_v40 }
  0x2b   : > { %691 = vmatpush.bf16.msra.mxu2 %v2548_v53 }
  0x2c   : > { %1008 = vmatpush.bf16.msrb.mxu1 %v2581_v32  ;;  %v2584_v32 = vld [vmem:[%s3241_s3 + $0x80] sm:$0xff] }
  0x2d   : > { %924 = vmatpush.bf16.msrb.mxu0 %v2573_v43  ;;  %v2656_v43 = vld [vmem:[%s3242_s4] ss:$0 sm:$0xff] }
  0x30   : > { %1009 = vmatpush.bf16.msrb.mxu1 %v2580_v35  ;;  %v2657_v35 = vld [vmem:[%s3244_s6] ss:$0 sm:$0xff] }
  0x31   : > { %925 = vmatpush.bf16.msrb.mxu0 %v2572_v46 }
  0x34   : > { %1010 = vmatpush.bf16.msrb.mxu1 %v2579_v38 }
  0x35   : > { %926 = vmatpush.bf16.msrb.mxu0 %v2571_v49 }
  0x38   : > { %1011 = vmatpush.bf16.msrb.mxu1 %v2578_v41 }
  0x39   : > { %927 = vmatpush.bf16.msrb.mxu0 %v2570_v54  ;;  %v2659_v54 = vld [vmem:[%s3244_s6 + $0x1] ss:$0 sm:$0xff] }
  0x3c   : > { %1012 = vmatpush.bf16.msrb.mxu1 %v2577_v44 }
  0x3d   : > { %928 = vmatpush.bf16.msrb.mxu0 %v2569_v57 }
  0x40   : > { %1013 = vmatpush.bf16.msrb.mxu1 %v2576_v47 }
  0x41   : > { %929 = vmatpush.bf16.msrb.mxu0 %v2568_v60 }
  0x44   : > { %1014 = vmatpush.bf16.msrb.mxu1 %v2575_v52 }
  0x45   : > { %930 = vmatpush.bf16.msrb.mxu0 %v2567_v0 }
  0x48   : > { %1015 = vmatpush.bf16.msrb.mxu1 %v2574_v56 }
  0x49   : > { %931 = vmatpush.bf16.msrb.mxu0 %v2566_v5 }
  0x84   : > { %v393_v17 = vpop.xlane.xlu0 %392 }
  0x85   : > { %v403_v18 = vmul.f32 %v2819_v16, %v393_v17 }
  0x87   : > { %v2823_v19 = vsub.f32 %v2792_v1, %v403_v18  ;;  %v2655_v18 = vld [vmem:[%s3240_s2] ss:$0 sm:$0xff] }
  0x89   : > { %v407_v20 = vmul.f32 %v2823_v19, %v2823_v19 }
  0x8b   : > { %409 = vadd.xlane.f32.xlu1 %v407_v20 }
  0x8c   : > { %v395_v21 = vpop.xlane.xlu0 %394 }
  0x8d   : > { %v404_v22 = vmul.f32 %v2819_v16, %v395_v21 }
  0x8f   : > { %v2829_v23 = vsub.f32 %v2795_v2, %v404_v22 }
  0x91   : > { %v408_v24 = vmul.f32 %v2829_v23, %v2829_v23 }
  0x93   : > { %411 = vadd.xlane.f32.xlu1 %v408_v24 }
  0xfe   : > { %v410_v50 = vpop.xlane.xlu1 %409 }
  0xff   : > { %v413_v51 = vmul.f32 %v410_v50, %v2819_v16 }
 0x101   : > { %v415_v55 = vadd.f32 1e-05, %v413_v51 }
 0x103   : > { %2671 = vrsqrt.f32 %v415_v55  ;;  %vm423_vm2 = vweird.f32 %v415_v55 }
 0x106   : > { %v412_v58 = vpop.xlane.xlu1 %411 }
 0x107   : > { %v414_v59 = vmul.f32 %v412_v58, %v2819_v16 }
 0x109   : > { %v2672_v61 = vpop.eup %2671  ;;  %v416_v62 = vadd.f32 1e-05, %v414_v59 }
 0x10a   : > { %v418_v63 = vmul.f32 %v2672_v61, %v415_v55  ;;  %vm424_vm1 = vweird.f32 %v2672_v61  ;;  %v2660_v55 = vld [vmem:[%s3246_s8 + $0x1] ss:$0 sm:$0xff] }
 0x10b   : > { %2673 = vrsqrt.f32 %v416_v62  ;;  %vm425_vm3 = vmor %vm423_vm2, %vm424_vm1  ;;  %vm433_vm5 = vweird.f32 %v416_v62 }
 0x10c   : > { %v419_v3 = vmul.f32 %v2672_v61, %v418_v63 }
 0x10e   : > { %v420_v4 = vmul.f32 0.5, %v419_v3 }
 0x110   : > { %v421_v6 = vsub.f32 1.5, %v420_v4 }
 0x111   : > { %v2674_v7 = vpop.eup %2673 }
 0x112   : > { %v422_v8 = vmul.f32 %v2672_v61, %v421_v6  ;;  %v428_v9 = vmul.f32 %v2674_v7, %v416_v62  ;;  %vm434_vm4 = vweird.f32 %v2674_v7 }
 0x113   : > { %vm435_vm6 = vmor %vm433_vm5, %vm434_vm4 }
 0x114   : > { %v429_v10 = vmul.f32 %v2674_v7, %v428_v9  ;;  %v426_v11 = vsel %vm425_vm3, %v2672_v61, %v422_v8 }
 0x115   : > { %v437_v15 = vmul.f32 %v426_v11, %v2823_v19  ;;  %v2590_v19 = vld [vmem:[%s3241_s3 + $0xb0] sm:$0xff] }
 0x116   : > { %v430_v12 = vmul.f32 0.5, %v429_v10 }
 0x117   : > { %v443_v20 = vmul.f32 %v2654_v14, %v437_v15 }
 0x118   : > { %v431_v13 = vsub.f32 1.5, %v430_v12 }
 0x119   : > { %v449_v24 = vadd.f32 %v2655_v18, %v443_v20  ;;  %v2565_v20 = vld [vmem:[%s3241_s3 + $0x78] sm:$0xff] }
 0x11a   : > { %v432_v16 = vmul.f32 %v2674_v7, %v431_v13 }
 0x11c   : > { %v436_v17 = vsel %vm435_vm6, %v2674_v7, %v432_v16 }
 0x11d   : > { %v438_v21 = vmul.f32 %v436_v17, %v2829_v23  ;;  %v2589_v23 = vld [vmem:[%s3241_s3 + $0xa8] sm:$0xff] }
 0x11f   : > { %v444_v22 = vmul.f32 %v2654_v14, %v438_v21  ;;  %v2564_v21 = vld [vmem:[%s3241_s3 + $0x70] sm:$0xff] }
 0x121   : > { %v450_v25 = vadd.f32 %v2655_v18, %v444_v22  ;;  %v2563_v22 = vld [vmem:[%s3241_s3 + $0x68] sm:$0xff] }
 0x123   : > { %v2945_v27 = vpack.c.bf16 %v450_v25, %v449_v24  ;;  %v2562_v24 = vld [vmem:[%s3241_s3 + $0x60] sm:$0xff]  ;;  %v2561_v25 = vld [vmem:[%s3241_s3 + $0x58] sm:$0xff] }
 0x125   : > { %528 = vmatmul.bf16.vlgmr.msra.gmra.mxu0 %v2945_v27  ;;  %610 = vmatmul.bf16.vlgmr.msra.gmra.mxu1 %v2945_v27 }
 0x126   : > { %692 = vmatmul.bf16.vlgmr.msra.gmra.mxu2 %v2945_v27  ;;  %1221 = vmatpush.bf16.msra.mxu1 %v2591_v26  ;;  %v2560_v26 = vld [vmem:[%s3241_s3 + $0x50] sm:$0xff] }
 0x12a   : > { %1222 = vmatpush.bf16.msra.mxu1 %v2590_v19  ;;  %v2559_v19 = vld [vmem:[%s3241_s3 + $0x48] sm:$0xff] }
 0x12e   : > { %1223 = vmatpush.bf16.msra.mxu1 %v2589_v23  ;;  %v2558_v23 = vld [vmem:[%s3241_s3 + $0x40] sm:$0xff] }
 0x132   : > { %1224 = vmatpush.bf16.msra.mxu1 %v2588_v28 }
 0x135   : > { %932 = vmatmul.bf16.vlgmr.msrb.gmra.mxu0 %v2945_v27  ;;  %1016 = vmatmul.bf16.vlgmr.msrb.gmra.mxu1 %v2945_v27 }
 0x136   : > { %1225 = vmatpush.bf16.msra.mxu1 %v2587_v29 }
 0x13a   : > { %1226 = vmatpush.bf16.msra.mxu1 %v2586_v30 }
 0x13e   : > { %1227 = vmatpush.bf16.msra.mxu1 %v2585_v31 }
 0x142   : > { %1228 = vmatpush.bf16.msra.mxu1 %v2584_v32 }
 0x145   : > { %1229 = vmatmul.bf16.vlgmr.msra.gmra.mxu1 %v2945_v27 }
 0x1a2   : > { %v529_v33 = vpop.f32.mrf.mxu0  ;;  %v611_v34 = vpop.f32.mrf.mxu1 }
 0x1a3   : > { %v612_v39 = vadd.f32 %v2657_v35, %v611_v34  ;;  %v530_v51 = vadd.f32 %v2656_v43, %v529_v33 }
 0x1a9   : > { %v693_v36 = vpop.f32.mrf.mxu2 }
 0x1aa   : > { %v531_v37 = vpop.f32.mrf.mxu0  ;;  %v613_v38 = vpop.f32.mrf.mxu1  ;;  %v694_v47 = vadd.f32 %v2658_v42, %v693_v36  ;;  %v2556_v36 = vld [vmem:[%s3247_s9] sm:$0xff] }
 0x1ab   : > { %v614_v40 = vadd.f32 %v2657_v35, %v613_v38  ;;  %v532_v45 = vadd.f32 %v2656_v43, %v531_v37  ;;  %v2557_v35 = vld [vmem:[%s3247_s9 + $0x8] sm:$0xff] }
 0x1ac   : > { %1143 = vmatpush.bf16.msra.mxu0 %v2557_v35 }
 0x1ad   : > { %v699_v41 = vpack.c.bf16 %v614_v40, %v612_v39  ;;  %v698_v53 = vpack.c.bf16 %v532_v45, %v530_v51 }
 0x1af   : > { %v705_v44 = vsel %vm700_vm7, %v699_v41, 0  ;;  %v2662_v41 = vld [vmem:[%s3242_s4 + $0x1] ss:$0 sm:$0xff] }
 0x1b0   : > { %714 = vmatpush.bf16.xpose.msra.mxu3 %v705_v44  ;;  %1144 = vmatpush.bf16.msra.mxu0 %v2556_v36  ;;  %v2625_v36 = vld [vmem:[%s3243_s5 + $0xf8] sm:$0xff] }
 0x1b1   : > { %v695_v46 = vpop.f32.mrf.mxu2 }
 0x1b2   : > { %v696_v48 = vadd.f32 %v2658_v42, %v695_v46  ;;  %v933_v49 = vpop.f32.mrf.mxu0  ;;  %v1017_v50 = vpop.f32.mrf.mxu1 }
 0x1b3   : > { %v934_v58 = vadd.f32 %v2659_v54, %v933_v49  ;;  %v1018_v61 = vadd.f32 %v2660_v55, %v1017_v50 }
 0x1b4   : > { %v747_v52 = vpack.c.bf16 %v696_v48, %v694_v47 }
 0x1b7   : > { %2031 = vmatmul.msk.bf16.vlgmr.msra.gmra.mxu3 %vm700_vm7, %v698_v53  ;;  %v2598_v53 = vld [vmem:[%s3243_s5 + $0xb0] sm:$0xff] }
 0x1b8   : > { %758 = vmatpush.bf16.msrb.mxu3 %v747_v52  ;;  %v2599_v52 = vld [vmem:[%s3243_s5 + $0xb8] sm:$0xff] }
 0x1ba   : > { %v935_v56 = vpop.f32.mrf.mxu0  ;;  %v1019_v57 = vpop.f32.mrf.mxu1 }
 0x1bb   : > { %v936_v59 = vadd.f32 %v2659_v54, %v935_v56  ;;  %v1020_v60 = vadd.f32 %v2660_v55, %v1019_v57  ;;  %v2597_v54 = vld [vmem:[%s3243_s5 + $0xa8] sm:$0xff] }
 0x1bc   : > { %840 = vmatpush.bf16.msra.mxu3 %v2565_v20  ;;  %v2607_v20 = vld [vmem:[%s3245_s7 + $0xb8] sm:$0xff] }
 0x1bd   : > { %v1023_v62 = vpack.c.bf16 %v936_v59, %v934_v58  ;;  %v1069_v63 = vpack.c.bf16 %v1020_v60, %v1018_v61 }
 0x1bf   : > { %v1028_v0 = vsel %vm700_vm7, %v1023_v62, 0 }
 0x1c0   : > { %1037 = vmatpush.bf16.xpose.msrb.mxu2 %v1028_v0  ;;  %841 = vmatpush.bf16.msra.mxu3 %v2564_v21  ;;  %v2615_v21 = vld [vmem:[%s3241_s3 + $0xe8] sm:$0xff] }
 0x1c4   : > { %842 = vmatpush.bf16.msra.mxu3 %v2563_v22  ;;  %v2606_v22 = vld [vmem:[%s3245_s7 + $0xb0] sm:$0xff] }
 0x1c8   : > { %1080 = vmatpush.bf16.msra.mxu2 %v1069_v63  ;;  %843 = vmatpush.bf16.msra.mxu3 %v2562_v24  ;;  %v2614_v24 = vld [vmem:[%s3241_s3 + $0xe0] sm:$0xff] }
 0x1cc   : > { %844 = vmatpush.bf16.msra.mxu3 %v2561_v25  ;;  %v2605_v25 = vld [vmem:[%s3245_s7 + $0xa8] sm:$0xff] }
 0x1d0   : > { %845 = vmatpush.bf16.msra.mxu3 %v2560_v26  ;;  %v2613_v26 = vld [vmem:[%s3241_s3 + $0xd8] sm:$0xff] }
 0x1d4   : > { %846 = vmatpush.bf16.msra.mxu3 %v2559_v19  ;;  %v2604_v19 = vld [vmem:[%s3245_s7 + $0xa0] sm:$0xff] }
 0x1d8   : > { %847 = vmatpush.bf16.msra.mxu3 %v2558_v23  ;;  %v2612_v23 = vld [vmem:[%s3241_s3 + $0xd0] sm:$0xff] }
 0x23a   : > { %v716_v3 = vpop.f32.mrf.mxu3 }
 0x23b   : > { %v721_v4 = vmul.f32 0.17677669, %v716_v3  ;;  %v2596_v3 = vld [vmem:[%s3243_s5 + $0xa0] sm:$0xff] }
 0x23d   : > { %v724_v5 = vsel %vm723_vm8, %v721_v4, -inf }
 0x23e   : > { %725 = vmax.xlane.f32.xlu2 %v724_v5  ;;  %v2594_v5 = vld [vmem:[%s3243_s5 + $0x90] sm:$0xff] }
 0x242   : > { %v718_v6 = vpop.f32.mrf.mxu3 }
 0x243   : > { %v722_v7 = vmul.f32 0.17677669, %v718_v6  ;;  %v2593_v6 = vld [vmem:[%s3243_s5 + $0x88] sm:$0xff] }
 0x245   : > { %v727_v8 = vsel %vm723_vm8, %v722_v7, -inf }
 0x246   : > { %728 = vmax.xlane.f32.xlu2 %v727_v8 }
 0x2b1   : > { %v726_v9 = vpop.xlane.xlu2 %725 }
 0x2b2   : > { %v730_v10 = vsub.f32 %v721_v4, %v726_v9  ;;  %v2595_v4 = vld [vmem:[%s3243_s5 + $0x98] sm:$0xff] }
 0x2b4   : > { %v732_v11 = vmul.f32 1.442695, %v730_v10 }
 0x2b6   : > { %2675 = vpow2.f32 %v732_v11 }
 0x2b9   : > { %v729_v12 = vpop.xlane.xlu2 %728 }
 0x2ba   : > { %v731_v13 = vsub.f32 %v722_v7, %v729_v12  ;;  %v2592_v7 = vld [vmem:[%s3243_s5 + $0x80] sm:$0xff] }
 0x2bc   : > { %v2676_v14 = vpop.eup %2675  ;;  %v734_v15 = vmul.f32 1.442695, %v731_v13 }
 0x2bd   : > { %v736_v16 = vsel %vm723_vm8, %v2676_v14, 0.0 }
 0x2be   : > { %2677 = vpow2.f32 %v734_v15  ;;  %737 = vadd.xlane.f32.xlu0 %v736_v16  ;;  %v2583_v16 = vld [vmem:[%s3247_s9 + $0x18] sm:$0xff] }
 0x2c4   : > { %v2678_v17 = vpop.eup %2677 }
 0x2c5   : > { %v739_v18 = vsel %vm723_vm8, %v2678_v17, 0.0 }
 0x2c6   : > { %740 = vadd.xlane.f32.xlu1 %v739_v18  ;;  %v2582_v18 = vld [vmem:[%s3247_s9 + $0x10] sm:$0xff] }
 0x331   : > { %v738_v28 = vpop.xlane.xlu0 %737 }
 0x332   : > { %2679 = vrcp.f32 %v738_v28  ;;  %v2603_v28 = vld [vmem:[%s3245_s7 + $0x98] sm:$0xff] }
 0x338   : > { %v2680_v30 = vpop.eup %2679 }
 0x339   : > { %v741_v29 = vpop.xlane.xlu1 %740  ;;  %v744_v32 = vmul.f32 %v2680_v30, %v2676_v14  ;;  %v2617_v14 = vld [vmem:[%s3241_s3 + $0xf8] sm:$0xff]  ;;  %v2610_v30 = vld [vmem:[%s3241_s3 + $0xc0] sm:$0xff] }
 0x33a   : > { %2681 = vrcp.f32 %v741_v29  ;;  %v2611_v29 = vld [vmem:[%s3241_s3 + $0xc8] sm:$0xff] }
 0x340   : > { %v2682_v31 = vpop.eup %2681 }
 0x341   : > { %v745_v33 = vmul.f32 %v2682_v31, %v2678_v17  ;;  %v2616_v17 = vld [vmem:[%s3241_s3 + $0xf0] sm:$0xff] }
 0x342   : > { %v2602_v31 = vld [vmem:[%s3245_s7 + $0x90] sm:$0xff] }
 0x343   : > { %v746_v34 = vpack.c.bf16 %v745_v33, %v744_v32  ;;  %v2601_v32 = vld [vmem:[%s3245_s7 + $0x88] sm:$0xff]  ;;  %v2600_v33 = vld [vmem:[%s3245_s7 + $0x80] sm:$0xff] }
 0x345   : > { %2032 = vmatmul.msk.bf16.vlgmr.msrb.gmra.mxu3 %vm723_vm8, %v746_v34 }
 0x346   : > { %1114 = vmatpush.bf16.msrb.mxu3 %v2583_v16  ;;  %v2666_v16 = vld [vmem:[%s3244_s6 + $0x3] ss:$0 sm:$0xff] }
 0x34a   : > { %1115 = vmatpush.bf16.msrb.mxu3 %v2582_v18 }
 0x355   : > { %848 = vmatmul.bf16.vlgmr.msra.gmra.mxu3 %v2945_v27 }
 0x356   : > { %1389 = vmatpush.bf16.msra.mxu3 %v2607_v20 }
 0x35a   : > { %1390 = vmatpush.bf16.msra.mxu3 %v2606_v22 }
 0x35e   : > { %1391 = vmatpush.bf16.msra.mxu3 %v2605_v25 }
 0x362   : > { %1392 = vmatpush.bf16.msra.mxu3 %v2604_v19 }
 0x366   : > { %1393 = vmatpush.bf16.msra.mxu3 %v2603_v28 }
 0x36a   : > { %1394 = vmatpush.bf16.msra.mxu3 %v2602_v31 }
 0x36e   : > { %1395 = vmatpush.bf16.msra.mxu3 %v2601_v32 }
 0x372   : > { %1396 = vmatpush.bf16.msra.mxu3 %v2600_v33  ;;  %v2633_v33 = vld [vmem:[%s3245_s7 + $0xf8] sm:$0xff] }
 0x3c8   : > { %v760_v37 = vpop.f32.mrf.mxu3 }
 0x3d0   : > { %v762_v38 = vpop.f32.mrf.mxu3 }
 0x3d1   : > { %v765_v39 = vpack.c.bf16 %v762_v38, %v760_v37  ;;  %v2624_v38 = vld [vmem:[%s3243_s5 + $0xf0] sm:$0xff] }
 0x3d3   : > { %2203 = vmatmul.msk.bf16.vlgmr.msra.gmra.mxu0 %vm700_vm7, %v765_v39 }
 0x3d8   : > { %v849_v40 = vpop.f32.mrf.mxu3 }
 0x3d9   : > { %v850_v43 = vadd.f32 %v2662_v41, %v849_v40  ;;  %v2623_v40 = vld [vmem:[%s3243_s5 + $0xe8] sm:$0xff] }
 0x3e0   : > { %v851_v42 = vpop.f32.mrf.mxu3 }
 0x3e1   : > { %v852_v44 = vadd.f32 %v2662_v41, %v851_v42  ;;  %v1230_v41 = vpop.f32.mrf.mxu1  ;;  %v2622_v42 = vld [vmem:[%s3243_s5 + $0xe0] sm:$0xff] }
 0x3e3   : > { %v1022_v45 = vpack.c.bf16 %v852_v44, %v850_v43  ;;  %v2663_v43 = vld [vmem:[%s3244_s6 + $0x2] ss:$0 sm:$0xff] }
 0x3e5   : > { %2180 = vmatmul.msk.bf16.vlgmr.msrb.gmra.mxu2 %vm700_vm7, %v1022_v45  ;;  %v2621_v45 = vld [vmem:[%s3243_s5 + $0xd8] sm:$0xff] }
 0x3e6   : > { %1305 = vmatpush.bf16.msrb.mxu2 %v2599_v52 }
 0x3ea   : > { %1306 = vmatpush.bf16.msrb.mxu2 %v2598_v53 }
 0x3ee   : > { %1307 = vmatpush.bf16.msrb.mxu2 %v2597_v54  ;;  %v2619_v54 = vld [vmem:[%s3243_s5 + $0xc8] sm:$0xff] }
 0x3f2   : > { %1308 = vmatpush.bf16.msrb.mxu2 %v2596_v3 }
 0x3f6   : > { %1309 = vmatpush.bf16.msrb.mxu2 %v2595_v4 }
 0x3fa   : > { %1310 = vmatpush.bf16.msrb.mxu2 %v2594_v5  ;;  %v2665_v5 = vld [vmem:[%s3246_s8 + $0x2] ss:$0 sm:$0xff] }
 0x3fe   : > { %1311 = vmatpush.bf16.msrb.mxu2 %v2593_v6 }
 0x402   : > { %1312 = vmatpush.bf16.msrb.mxu2 %v2592_v7 }
 0x468   : > { %v1039_v46 = vpop.f32.mrf.mxu2 }
 0x469   : > { %v1044_v47 = vmul.f32 0.17677669, %v1039_v46 }
 0x46b   : > { %v1046_v48 = vsel %vm723_vm8, %v1044_v47, -inf }
 0x46c   : > { %1047 = vmax.xlane.f32.xlu2 %v1046_v48 }
 0x470   : > { %v1041_v49 = vpop.f32.mrf.mxu2 }
 0x471   : > { %v1045_v50 = vmul.f32 0.17677669, %v1041_v49  ;;  %v1232_v49 = vpop.f32.mrf.mxu1 }
 0x473   : > { %v1049_v51 = vsel %vm723_vm8, %v1045_v50, -inf }
 0x474   : > { %1050 = vmax.xlane.f32.xlu0 %v1049_v51  ;;  %v2661_v51 = vld [vmem:[%s3242_s4 + $0x2] ss:$0 sm:$0xff] }
 0x475   : > { %v1233_v53 = vadd.f32 %v2661_v51, %v1232_v49 }
 0x4df   : > { %v1048_v55 = vpop.xlane.xlu2 %1047 }
 0x4e0   : > { %v1052_v56 = vsub.f32 %v1044_v47, %v1048_v55  ;;  %v1231_v55 = vadd.f32 %v2661_v51, %v1230_v41 }
 0x4e2   : > { %v1054_v57 = vmul.f32 1.442695, %v1052_v56  ;;  %v1403_v56 = vpack.c.bf16 %v1233_v53, %v1231_v55 }
 0x4e4   : > { %2683 = vpow2.f32 %v1054_v57  ;;  %v2618_v57 = vld [vmem:[%s3243_s5 + $0xc0] sm:$0xff] }
 0x4e7   : > { %v1051_v58 = vpop.xlane.xlu0 %1050 }
 0x4e8   : > { %v1053_v59 = vsub.f32 %v1045_v50, %v1051_v58  ;;  %v2620_v50 = vld [vmem:[%s3243_s5 + $0xd0] sm:$0xff]  ;;  %v3153_v58 = vpop.f32.mrf.mxu0 }
 0x4ea   : > { %v2684_v60 = vpop.eup %2683  ;;  %v1056_v61 = vmul.f32 1.442695, %v1053_v59 }
 0x4eb   : > { %v1058_v62 = vsel %vm723_vm8, %v2684_v60, 0.0 }
 0x4ec   : > { %2685 = vpow2.f32 %v1056_v61  ;;  %1059 = vadd.xlane.f32.xlu1 %v1058_v62  ;;  %v2609_v62 = vld [vmem:[%s3247_s9 + $0x28] sm:$0xff] }
 0x4ed   : > { %1495 = vmatpush.bf16.msrb.mxu1 %v2609_v62 }
 0x4f2   : > { %v2686_v63 = vpop.eup %2685 }
 0x4f3   : > { %v1061_v0 = vsel %vm723_vm8, %v2686_v63, 0.0 }
 0x4f4   : > { %1062 = vadd.xlane.f32.xlu2 %v1061_v0  ;;  %v2608_v0 = vld [vmem:[%s3247_s9 + $0x20] sm:$0xff] }
 0x4f5   : > { %1496 = vmatpush.bf16.msrb.mxu1 %v2608_v0 }
 0x55f   : > { %v1060_v8 = vpop.xlane.xlu1 %1059 }
 0x560   : > { %2687 = vrcp.f32 %v1060_v8 }
 0x566   : > { %v2688_v10 = vpop.eup %2687 }
 0x567   : > { %v1063_v9 = vpop.xlane.xlu2 %1062  ;;  %v1066_v12 = vmul.f32 %v2688_v10, %v2684_v60  ;;  %v1148_v60 = vpop.f32.mrf.mxu0 }
 0x568   : > { %2689 = vrcp.f32 %v1063_v9 }
 0x56e   : > { %v2690_v11 = vpop.eup %2689 }
 0x56f   : > { %v1067_v13 = vmul.f32 %v2690_v11, %v2686_v63 }
 0x571   : > { %v1068_v15 = vpack.c.bf16 %v1067_v13, %v1066_v12 }
 0x573   : > { %2181 = vmatmul.msk.bf16.vlgmr.msra.gmra.mxu2 %vm723_vm8, %v1068_v15 }
 0x574   : > { %1575 = vmatpush.bf16.msra.mxu2 %v2617_v14 }
 0x578   : > { %1576 = vmatpush.bf16.msra.mxu2 %v2616_v17 }
 0x57c   : > { %1577 = vmatpush.bf16.msra.mxu2 %v2615_v21 }
 0x580   : > { %1578 = vmatpush.bf16.msra.mxu2 %v2614_v24 }
 0x583   : > { %1313 = vmatmul.bf16.vlgmr.msrb.gmra.mxu2 %v2945_v27 }
 0x584   : > { %1579 = vmatpush.bf16.msra.mxu2 %v2613_v26 }
 0x588   : > { %1580 = vmatpush.bf16.msra.mxu2 %v2612_v23 }
 0x58c   : > { %1581 = vmatpush.bf16.msra.mxu2 %v2611_v29 }
 0x590   : > { %1582 = vmatpush.bf16.msra.mxu2 %v2610_v30 }
 0x593   : > { %1583 = vmatmul.bf16.vlgmr.msra.gmra.mxu2 %v2945_v27 }
 0x5f6   : > { %v1082_v34 = vpop.f32.mrf.mxu2 }
 0x5fe   : > { %v1084_v35 = vpop.f32.mrf.mxu2 }
 0x5ff   : > { %v1087_v37 = vpack.c.bf16 %v1084_v35, %v1082_v34  ;;  %v2632_v34 = vld [vmem:[%s3245_s7 + $0xf0] sm:$0xff]  ;;  %v2631_v35 = vld [vmem:[%s3245_s7 + $0xe8] sm:$0xff] }
 0x601   : > { %2194 = vmatmul.msk.bf16.vlgmr.msrb.gmra.mxu3 %vm700_vm7, %v1087_v37  ;;  %v2629_v37 = vld [vmem:[%s3245_s7 + $0xd8] sm:$0xff] }
 0x602   : > { %1659 = vmatpush.bf16.msrb.mxu3 %v2625_v36  ;;  %v2630_v36 = vld [vmem:[%s3245_s7 + $0xe0] sm:$0xff] }
 0x606   : > { %v1314_v39 = vpop.f32.mrf.mxu2  ;;  %1660 = vmatpush.bf16.msrb.mxu3 %v2624_v38  ;;  %v2628_v38 = vld [vmem:[%s3245_s7 + $0xd0] sm:$0xff] }
 0x607   : > { %v1315_v46 = vadd.f32 %v2663_v43, %v1314_v39  ;;  %v2627_v39 = vld [vmem:[%s3245_s7 + $0xc8] sm:$0xff] }
 0x60a   : > { %1661 = vmatpush.bf16.msrb.mxu3 %v2623_v40  ;;  %v2626_v40 = vld [vmem:[%s3245_s7 + $0xc0] sm:$0xff] }
 0x60e   : > { %v1316_v44 = vpop.f32.mrf.mxu2  ;;  %1662 = vmatpush.bf16.msrb.mxu3 %v2622_v42 }
 0x60f   : > { %v1317_v47 = vadd.f32 %v2663_v43, %v1316_v44 }
 0x611   : > { %v1404_v48 = vpack.c.bf16 %v1317_v47, %v1315_v46  ;;  %1397 = vmatmul.bf16.vlgmr.msra.gmra.mxu3 %v2945_v27 }
 0x612   : > { %1663 = vmatpush.bf16.msrb.mxu3 %v2621_v45 }
 0x613   : > { %v1409_v52 = vsel %vm700_vm7, %v1404_v48, 0 }
 0x614   : > { %1418 = vmatpush.bf16.xpose.msrb.mxu0 %v1409_v52 }
 0x616   : > { %1664 = vmatpush.bf16.msrb.mxu3 %v2620_v50  ;;  %v1584_v49 = vpop.f32.mrf.mxu2 }
 0x61a   : > { %1665 = vmatpush.bf16.msrb.mxu3 %v2619_v54  ;;  %v2664_v54 = vld [vmem:[%s3242_s4 + $0x3] ss:$0 sm:$0xff] }
 0x61b   : > { %2351 = vmatmul.msk.bf16.vlgmr.msrb.gmra.mxu0 %vm700_vm7, %v1403_v56  ;;  %v2667_v56 = vld [vmem:[%s3246_s8 + $0x3] ss:$0 sm:$0xff] }
 0x61e   : > { %1666 = vmatpush.bf16.msrb.mxu3 %v2618_v57  ;;  %v1586_v53 = vpop.f32.mrf.mxu2  ;;  %v1585_v57 = vadd.f32 %v2664_v54, %v1584_v49 }
 0x61f   : > { %v1587_v55 = vadd.f32 %v2664_v54, %v1586_v53 }
 0x621   : > { %1667 = vmatmul.bf16.vlgmr.msrb.gmra.mxu3 %v2945_v27 }
 0x684   : > { %v3155_v59 = vpop.f32.mrf.mxu3 }
 0x68c   : > { %v1119_v61 = vpop.f32.mrf.mxu3 }
 0x68d   : > { %v3160_v63 = vadd.f32 %v1148_v60, %v1119_v61 }
 0x694   : > { %v1398_v3 = vpop.f32.mrf.mxu3 }
 0x695   : > { %v1399_v9 = vadd.f32 %v2665_v5, %v1398_v3  ;;  %v1147_v3 = vadd.f32 %v3153_v58, %v3155_v59 }
 0x698   : > { %v1420_v4 = vpop.f32.mrf.mxu0 }
 0x699   : > { %v1425_v6 = vmul.f32 0.17677669, %v1420_v4 }
 0x69b   : > { %v1427_v7 = vsel %vm723_vm8, %v1425_v6, -inf }
 0x69c   : > { %v1400_v8 = vpop.f32.mrf.mxu3  ;;  %1428 = vmax.xlane.f32.xlu0 %v1427_v7 }
 0x69d   : > { %v1401_v10 = vadd.f32 %v2665_v5, %v1400_v8 }
 0x69f   : > { %v1450_v11 = vpack.c.bf16 %v1401_v10, %v1399_v9 }
 0x6a0   : > { %v1422_v12 = vpop.f32.mrf.mxu0 }
 0x6a1   : > { %v1426_v13 = vmul.f32 0.17677669, %v1422_v12  ;;  %1461 = vmatpush.bf16.msra.mxu0 %v1450_v11 }
 0x6a3   : > { %v1430_v14 = vsel %vm723_vm8, %v1426_v13, -inf }
 0x6a4   : > { %v1668_v15 = vpop.f32.mrf.mxu3  ;;  %1431 = vmax.xlane.f32.xlu1 %v1430_v14 }
 0x6a5   : > { %v1669_v18 = vadd.f32 %v2666_v16, %v1668_v15  ;;  %1743 = vmatpush.bf16.msrb.mxu0 %v2633_v33 }
 0x6a9   : > { %1744 = vmatpush.bf16.msrb.mxu0 %v2632_v34 }
 0x6ac   : > { %v1670_v17 = vpop.f32.mrf.mxu3 }
 0x6ad   : > { %v1671_v20 = vadd.f32 %v2666_v16, %v1670_v17  ;;  %1745 = vmatpush.bf16.msrb.mxu0 %v2631_v35 }
 0x6af   : > { %v1758_v21 = vpack.c.bf16 %v1671_v20, %v1669_v18 }
 0x6b1   : > { %v1763_v22 = vsel %vm700_vm7, %v1758_v21, 0  ;;  %1746 = vmatpush.bf16.msrb.mxu0 %v2630_v36 }
 0x6b2   : > { %1772 = vmatpush.bf16.xpose.msra.mxu1 %v1763_v22 }
 0x6b5   : > { %1747 = vmatpush.bf16.msrb.mxu0 %v2629_v37 }
 0x6b9   : > { %1748 = vmatpush.bf16.msrb.mxu0 %v2628_v38  ;;  %v2668_v38 = vld [vmem:[%s3248_s10] ss:$0 sm:$0xff] }
 0x6bd   : > { %1749 = vmatpush.bf16.msrb.mxu0 %v2627_v39 }
 0x6c1   : > { %1750 = vmatpush.bf16.msrb.mxu0 %v2626_v40 }
 0x70f   : > { %v1429_v24 = vpop.xlane.xlu0 %1428 }
 0x710   : > { %v1433_v25 = vsub.f32 %v1425_v6, %v1429_v24 }
 0x712   : > { %v1435_v26 = vmul.f32 1.442695, %v1433_v25 }
 0x714   : > { %2691 = vpow2.f32 %v1435_v26 }
 0x717   : > { %v1432_v19 = vpop.xlane.xlu1 %1431 }
 0x718   : > { %v1434_v23 = vsub.f32 %v1426_v13, %v1432_v19 }
 0x71a   : > { %v2692_v28 = vpop.eup %2691  ;;  %v1437_v29 = vmul.f32 1.442695, %v1434_v23 }
 0x71b   : > { %v1439_v30 = vsel %vm723_vm8, %v2692_v28, 0.0 }
 0x71c   : > { %2693 = vpow2.f32 %v1437_v29  ;;  %1440 = vadd.xlane.f32.xlu2 %v1439_v30  ;;  %v2635_v29 = vld [vmem:[%s3247_s9 + $0x38] sm:$0xff]  ;;  %v2634_v30 = vld [vmem:[%s3247_s9 + $0x30] sm:$0xff] }
 0x71d   : > { %1849 = vmatpush.bf16.msrb.mxu2 %v2635_v29 }
 0x721   : > { %1850 = vmatpush.bf16.msrb.mxu2 %v2634_v30 }
 0x722   : > { %v2694_v31 = vpop.eup %2693 }
 0x723   : > { %v1442_v32 = vsel %vm723_vm8, %v2694_v31, 0.0 }
 0x724   : > { %1443 = vadd.xlane.f32.xlu0 %v1442_v32 }
 0x78f   : > { %v1441_v41 = vpop.xlane.xlu2 %1440 }
 0x790   : > { %2695 = vrcp.f32 %v1441_v41 }
 0x796   : > { %v2696_v43 = vpop.eup %2695 }
 0x797   : > { %v1444_v42 = vpop.xlane.xlu0 %1443  ;;  %v1447_v45 = vmul.f32 %v2696_v43, %v2692_v28 }
 0x798   : > { %2697 = vrcp.f32 %v1444_v42 }
 0x79e   : > { %v2698_v44 = vpop.eup %2697 }
 0x79f   : > { %v1448_v46 = vmul.f32 %v2698_v44, %v2694_v31 }
 0x7a1   : > { %v1449_v47 = vpack.c.bf16 %v1448_v46, %v1447_v45 }
 0x7a3   : > { %2352 = vmatmul.msk.bf16.vlgmr.msra.gmra.mxu0 %vm723_vm8, %v1449_v47 }
 0x7b3   : > { %1751 = vmatmul.bf16.vlgmr.msrb.gmra.mxu0 %v2945_v27  ;;  %v1757_v27 = vpack.c.bf16 %v1587_v55, %v1585_v57 }
 0x820   : > { %v1463_v48 = vpop.f32.mrf.mxu0 }
 0x828   : > { %v1465_v50 = vpop.f32.mrf.mxu0 }
 0x829   : > { %v1468_v51 = vpack.c.bf16 %v1465_v50, %v1463_v48 }
 0x82b   : > { %2365 = vmatmul.msk.bf16.vlgmr.msrb.gmra.mxu1 %vm700_vm7, %v1468_v51 }
 0x830   : > { %v1752_v52 = vpop.f32.mrf.mxu0 }
 0x831   : > { %v1753_v61 = vadd.f32 %v2667_v56, %v1752_v52 }
 0x838   : > { %v1754_v60 = vpop.f32.mrf.mxu0 }
 0x839   : > { %v1755_v62 = vadd.f32 %v2667_v56, %v1754_v60 }
 0x83b   : > { %v1804_v0 = vpack.c.bf16 %v1755_v62, %v1753_v61  ;;  %2513 = vmatmul.msk.bf16.vlgmr.msra.gmra.mxu1 %vm700_vm7, %v1757_v27 }
 0x83d   : > { %1815 = vmatpush.bf16.msrb.mxu1 %v1804_v0 }
 0x8a8   : > { %v1498_v4 = vpop.f32.mrf.mxu1 }
 0x8a9   : > { %v1503_v5 = vadd.f32 %v1498_v4, %v1147_v3 }
 0x8b0   : > { %v1500_v6 = vpop.f32.mrf.mxu1 }
 0x8b1   : > { %v1504_v7 = vadd.f32 %v1500_v6, %v3160_v63 }
 0x8b8   : > { %v1774_v8 = vpop.f32.mrf.mxu1 }
 0x8b9   : > { %v1779_v9 = vmul.f32 0.17677669, %v1774_v8 }
 0x8bb   : > { %v1781_v10 = vsel %vm723_vm8, %v1779_v9, -inf }
 0x8bc   : > { %1782 = vmax.xlane.f32.xlu1 %v1781_v10 }
 0x8c0   : > { %v1776_v11 = vpop.f32.mrf.mxu1 }
 0x8c1   : > { %v1780_v12 = vmul.f32 0.17677669, %v1776_v11 }
 0x8c3   : > { %v1784_v13 = vsel %vm723_vm8, %v1780_v12, -inf }
 0x8c4   : > { %1785 = vmax.xlane.f32.xlu2 %v1784_v13 }
 0x92f   : > { %v1783_v14 = vpop.xlane.xlu1 %1782 }
 0x930   : > { %v1787_v15 = vsub.f32 %v1779_v9, %v1783_v14 }
 0x932   : > { %v1789_v16 = vmul.f32 1.442695, %v1787_v15 }
 0x934   : > { %2699 = vpow2.f32 %v1789_v16 }
 0x937   : > { %v1786_v58 = vpop.xlane.xlu2 %1785 }
 0x938   : > { %v1788_v59 = vsub.f32 %v1780_v12, %v1786_v58 }
 0x93a   : > { %v2700_v17 = vpop.eup %2699  ;;  %v1791_v18 = vmul.f32 1.442695, %v1788_v59 }
 0x93b   : > { %v1793_v63 = vsel %vm723_vm8, %v2700_v17, 0.0 }
 0x93c   : > { %2701 = vpow2.f32 %v1791_v18  ;;  %1794 = vadd.xlane.f32.xlu0 %v1793_v63 }
 0x942   : > { %v2702_v20 = vpop.eup %2701 }
 0x943   : > { %v1796_v21 = vsel %vm723_vm8, %v2702_v20, 0.0 }
 0x944   : > { %1797 = vadd.xlane.f32.xlu1 %v1796_v21 }
 0x9af   : > { %v1795_v22 = vpop.xlane.xlu0 %1794 }
 0x9b0   : > { %2703 = vrcp.f32 %v1795_v22 }
 0x9b6   : > { %v2704_v25 = vpop.eup %2703 }
 0x9b7   : > { %v1798_v24 = vpop.xlane.xlu1 %1797  ;;  %v1801_v19 = vmul.f32 %v2704_v25, %v2700_v17 }
 0x9b8   : > { %2705 = vrcp.f32 %v1798_v24 }
 0x9be   : > { %v2706_v26 = vpop.eup %2705 }
 0x9bf   : > { %v1802_v23 = vmul.f32 %v2706_v26, %v2702_v20 }
 0x9c1   : > { %v1803_v28 = vpack.c.bf16 %v1802_v23, %v1801_v19 }
 0x9c3   : > { %2514 = vmatmul.msk.bf16.vlgmr.msrb.gmra.mxu1 %vm723_vm8, %v1803_v28 }
 0xa40   : > { %v1817_v31 = vpop.f32.mrf.mxu1 }
 0xa48   : > { %v1819_v32 = vpop.f32.mrf.mxu1 }
 0xa49   : > { %v1822_v33 = vpack.c.bf16 %v1819_v32, %v1817_v31 }
 0xa4b   : > { %2527 = vmatmul.msk.bf16.vlgmr.msrb.gmra.mxu2 %vm700_vm7, %v1822_v33 }
 0xace   : > { %v1852_v34 = vpop.f32.mrf.mxu2 }
 0xacf   : > { %v1857_v35 = vadd.f32 %v1852_v34, %v1503_v5 }
 0xad1   : > { %v1859_v37 = vadd.f32 %v2792_v1, %v1857_v35 }
 0xad3   : > { %v1865_v41 = vadd.f32 %v2668_v38, %v1859_v37 }
 0xad6   : > { %v1854_v36 = vpop.f32.mrf.mxu2 }
 0xad7   : > { %v1858_v39 = vadd.f32 %v1854_v36, %v1504_v7 }
 0xad9   : > { %v1860_v40 = vadd.f32 %v2795_v2, %v1858_v39 }
 0xadb   : > { %v1866_v42 = vadd.f32 %v2668_v38, %v1860_v40 }
 0xadd   : > { %v2643_v43 = vpack.c.bf16 %v1866_v42, %v1865_v41 }
 0xadf   : > { %2644 = vst [vmem:[%s386_s23] sm:$0xff] %v2643_v43  }
 0xae0 PF: > { %s21_s17 = sadd.s32 1, %s2713_s17  }
 0xae1   : > { %p18_p4 = scmp.ge.s32.totalorder %s21_s17, 4  }
 0xae3   :  { %20 = sbr.rel (!%p18_p4) target bundleno = 1 (0x1), region = 115 }

// kernel: decoder_forward.21
= control target key start
LH: loop header
LB: loop body
LE: loop exit
PB: predicated region body
PF: predicated region fallthrough
CT: control target
= control target key end

     0   :  { %8 = vsyncpa [#allocation3], 0  ;;  %s850_s0 = inlined_call_operand.vmem [shape: bf16[64,128], index: 0, kind: input, shape index: {}]   ;;  %s851_s1 = inlined_call_operand.vmem [shape: bf16[128,256], index: 1, kind: input, shape index: {}]   ;;  %s852_s2 = inlined_call_operand.vmem [shape: f32[1,256], index: 2, kind: input, shape index: {}]   ;;  %s853_s3 = inlined_call_operand.hbm [shape: f32[64,256], index: 3, kind: output, shape index: {}]  }
   0x1   :  { %10 = vsyncpa [#allocation3 + $0x1], 0  ;;  %s663_s12 = smov 0   ;;  %s665_s13 = smov 0  }
   0x2   :  { %s667_s14 = smov 0   ;;  %s669_s15 = smov 0  }
   0x3 LB: > { %s684_s16 = sadd.s32 4294967295, %s639_s15   ;;  %s415_s17 = sadd.s32 4294967294, %s639_s15   ;;  %s639_s15 = sphi %s669_s15, %s859_s15   ;;  %s635_s14 = sphi %s667_s14, %s858_s14   ;;  %s631_s13 = sphi %s665_s13, %s857_s13   ;;  %s627_s12 = sphi %s663_s12, %s856_s12  }
   0x4   : > { %s688_s18 = sadd.s32 1, %s639_s15   ;;  %s91_s19 = sadd.s32 1, %s635_s14 }
   0x5   : > { %s88_s20 = ssub.s32 %s639_s15, %s688_s18  ;;  %p101_p0 = scmp.ne.s32.totalorder %s635_s14, %s631_s13 }
   0x6   : > { %p89_p1 = scmp.eq.s32.totalorder %s88_s20, 0  ;;  %p102_p2 = scmp.eq.s32.totalorder %s684_s16, 1 }
   0x7   : > { %p107_p3 = scmp.ne.s32.totalorder %s631_s13, %s627_s12  ;;  %p108_p4 = scmp.eq.s32.totalorder %s415_s17, 1 }
   0x8   : > { %s699_s21 = scalar_select %p89_p1, %s635_s14, %s91_s19  }
   0x9   : > { %p701_p5 = por %p102_p2, %p101_p0  ;;  %p705_p6 = por %p108_p4, %p107_p3 }
   0xa   : > { %p418_p7 = scmp.ge.s32.totalorder %s639_s15, 1  ;;  %p141_p8 = scmp.lt.s32.totalorder %s639_s15, 3 }
   0xc   : > { %p142_p9 = pnand %p418_p7, %p141_p8 }
   0xd   : > { %s420_s28 = sshll.u32 (!%p142_p9), %s684_s16, 2  ;;  %s519_s26 = sshll.u32 (!%p142_p9), %s684_s16, 6 }
   0xe   : > { %145 = sbr.rel (%p142_p9) target bundleno = 200 (0xc8), region = 32  ;;  %p166_p10 = scmp.lt.s32.totalorder (!%p142_p9), %s420_s28, 7 }
   0xf   : > { %s349_s30 = scalar_lea.hbm (!%p142_p9), %s853_s3, %s519_s26  ;;  %s597_s10 = scalar_lea.hbm (!%p142_p9), %s853_s3, 128 }
  0x13   : > { %v488_v0 = vld [vmem:[%s851_s1 + $0x70] sm:$0xf]  ;;  %v517_v1 = vld [vmem:[%s851_s1 + $0x74] sm:$0xf0]  ;;  %v516_v2 = vld [vmem:[%s851_s1 + $0x74] sm:$0xf] }
  0x14   : > { %v489_v3 = vor.u32 %v517_v1, %v488_v0  ;;  %v490_v4 = vld [vmem:[%s851_s1 + $0x78] sm:$0xf0]  ;;  %v480_v5 = vld [vmem:[%s851_s1 + $0x60] sm:$0xf]  ;;  %v515_v6 = vld [vmem:[%s851_s1 + $0x64] sm:$0xf0] }
  0x15   : > { %v493_v7 = vor.u32 %v516_v2, %v490_v4  ;;  %v514_v8 = vld [vmem:[%s851_s1 + $0x64] sm:$0xf]  ;;  %v482_v9 = vld [vmem:[%s851_s1 + $0x68] sm:$0xf0]  ;;  %v481_v10 = vor.u32 %v515_v6, %v480_v5  ;;  %v472_v12 = vld [vmem:[%s851_s1 + $0x50] sm:$0xf] }
  0x16   : > { %290 = vmatpush.bf16.msra.mxu0 %v489_v3  ;;  %520 = vmatpush.bf16.msra.mxu2 %v489_v3  ;;  %v485_v11 = vor.u32 %v514_v8, %v482_v9  ;;  %v513_v13 = vld [vmem:[%s851_s1 + $0x54] sm:$0xf0]  ;;  %v512_v14 = vld [vmem:[%s851_s1 + $0x54] sm:$0xf]  ;;  %v474_v15 = vld [vmem:[%s851_s1 + $0x58] sm:$0xf0] }
  0x17   : > { %309 = vmatpush.bf16.msra.mxu1 %v493_v7  ;;  %528 = vmatpush.bf16.msra.mxu3 %v493_v7  ;;  %v473_v16 = vor.u32 %v513_v13, %v472_v12  ;;  %v477_v17 = vor.u32 %v512_v14, %v474_v15  ;;  %v464_v18 = vld [vmem:[%s851_s1 + $0x40] sm:$0xf]  ;;  %v511_v19 = vld [vmem:[%s851_s1 + $0x44] sm:$0xf0]  ;;  %v510_v20 = vld [vmem:[%s851_s1 + $0x44] sm:$0xf] }
  0x18   : > { %v466_v21 = vld [vmem:[%s851_s1 + $0x48] sm:$0xf0]  ;;  %v465_v22 = vor.u32 %v511_v19, %v464_v18  ;;  %v456_v24 = vld [vmem:[%s851_s1 + $0x30] sm:$0xf]  ;;  %v509_v25 = vld [vmem:[%s851_s1 + $0x34] sm:$0xf0] }
  0x19   : > { %v469_v23 = vor.u32 %v510_v20, %v466_v21  ;;  %v508_v26 = vld [vmem:[%s851_s1 + $0x34] sm:$0xf]  ;;  %v458_v27 = vld [vmem:[%s851_s1 + $0x38] sm:$0xf0]  ;;  %v457_v28 = vor.u32 %v509_v25, %v456_v24  ;;  %v448_v30 = vld [vmem:[%s851_s1 + $0x20] sm:$0xf] }
  0x1a   : > { %291 = vmatpush.bf16.msra.mxu0 %v481_v10  ;;  %521 = vmatpush.bf16.msra.mxu2 %v481_v10  ;;  %v461_v29 = vor.u32 %v508_v26, %v458_v27  ;;  %v507_v31 = vld [vmem:[%s851_s1 + $0x24] sm:$0xf0]  ;;  %v506_v32 = vld [vmem:[%s851_s1 + $0x24] sm:$0xf]  ;;  %v450_v33 = vld [vmem:[%s851_s1 + $0x28] sm:$0xf0] }
  0x1b   : > { %310 = vmatpush.bf16.msra.mxu1 %v485_v11  ;;  %529 = vmatpush.bf16.msra.mxu3 %v485_v11  ;;  %v449_v34 = vor.u32 %v507_v31, %v448_v30  ;;  %v453_v35 = vor.u32 %v506_v32, %v450_v33  ;;  %v440_v36 = vld [vmem:[%s851_s1 + $0x10] sm:$0xf]  ;;  %v505_v37 = vld [vmem:[%s851_s1 + $0x14] sm:$0xf0]  ;;  %s861_s28 = smov (!%p166_p10, %s420_s28), 7 }
  0x1c   : > { %v504_v38 = vld [vmem:[%s851_s1 + $0x14] sm:$0xf]  ;;  %v442_v39 = vld [vmem:[%s851_s1 + $0x18] sm:$0xf0]  ;;  %v441_v40 = vor.u32 %v505_v37, %v440_v36  ;;  %v432_v42 = vld [vmem:[%s851_s1] sm:$0xf] }
  0x1d   : > { %v445_v41 = vor.u32 %v504_v38, %v442_v39  ;;  %v503_v43 = vld [vmem:[%s851_s1 + $0x4] sm:$0xf0]  ;;  %s421_s5 = sshll.u32 %s861_s28, 2  ;;  %v502_v44 = vld [vmem:[%s851_s1 + $0x4] sm:$0xf]  ;;  %s162_s28 = sand.u32 1, %s631_s13  }
  0x1e   : > { %292 = vmatpush.bf16.msra.mxu0 %v473_v16  ;;  %522 = vmatpush.bf16.msra.mxu2 %v473_v16  ;;  %v434_v45 = vld [vmem:[%s851_s1 + $0x8] sm:$0xf0]  ;;  %v433_v46 = vor.u32 %v503_v43, %v432_v42  ;;  %s169_s17 = scalar_lea.vmem %s850_s0, %s421_s5  ;;  %v192_v50 = vld [vmem:[%s852_s2] sm:$0x3]  ;;  %s419_s24 = sshll.u32 %s162_s28, 6 }
  0x1f   : > { %311 = vmatpush.bf16.msra.mxu1 %v477_v17  ;;  %530 = vmatpush.bf16.msra.mxu3 %v477_v17  ;;  %v437_v47 = vor.u32 %v502_v44, %v434_v45  ;;  %v500_v48 = vld [vmem:[%s169_s17] sm:$0xff]  ;;  %v501_v49 = vld [vmem:[%s169_s17 + $0x8] sm:$0xff]  ;;  %v194_v51 = vperm.slane %v192_v50, 0  ;;  %v195_v52 = vperm.slane %v192_v50, 1  ;;  %s164_s25 = scalar_lea.vmem [#allocation2], %s419_s24  ;;  %s352_s5 = sshll.u32 %s349_s30, 4  ;;  %s353_s5 = int_to_ptr.hbm [resolvable:$true] %s352_s5 }
  0x20   : > { %s350_s4 = sshll.u32 %s164_s25, 4  ;;  %s337_s16 = scalar_lea.sflag [#allocation3], %s162_s28  ;;  %s351_s4 = int_to_ptr.vmem [resolvable:$true] %s350_s4 }
  0x21   : > { %s591_s6 = sshra.s32 %s353_s5, 4  ;;  %s592_s6 = int_to_ptr.hbm [resolvable:$true] %s591_s6 }
  0x22   : > { %293 = vmatpush.bf16.msra.mxu0 %v465_v22  ;;  %523 = vmatpush.bf16.msra.mxu2 %v465_v22  ;;  %s593_s7 = scalar_lea.hbm %s592_s6, 64  ;;  %p598_p0 = scmp.lt.s32.totalorder %s592_s6, %s853_s3 }
  0x23   : > { %312 = vmatpush.bf16.msra.mxu1 %v469_v23  ;;  %531 = vmatpush.bf16.msra.mxu3 %v469_v23  ;;  %p594_p11 = scmp.ne.s32.totalorder %s592_s6, %s593_s7  ;;  %p599_p1 = scmp.lt.s32.totalorder %s597_s10, %s593_s7 }
  0x25   : > { %p595_p12 = pnand %p594_p11, %p701_p5  ;;  %p600_p2 = por %p599_p1, %p598_p0 }
  0x26   : > { %294 = vmatpush.bf16.msra.mxu0 %v457_v28  ;;  %524 = vmatpush.bf16.msra.mxu2 %v457_v28 }
  0x27   : > { %313 = vmatpush.bf16.msra.mxu1 %v461_v29  ;;  %532 = vmatpush.bf16.msra.mxu3 %v461_v29  ;;  %p596_p13 = pneg %p595_p12 }
  0x29   : > { %p601_p3 = pnand %p600_p2, %p596_p13 }
  0x2a   : > { %295 = vmatpush.bf16.msra.mxu0 %v449_v34  ;;  %525 = vmatpush.bf16.msra.mxu2 %v449_v34 }
  0x2b   : > { %314 = vmatpush.bf16.msra.mxu1 %v453_v35  ;;  %533 = vmatpush.bf16.msra.mxu3 %v453_v35 }
  0x2e   : > { %296 = vmatpush.bf16.msra.mxu0 %v441_v40  ;;  %526 = vmatpush.bf16.msra.mxu2 %v441_v40 }
  0x2f   : > { %315 = vmatpush.bf16.msra.mxu1 %v445_v41  ;;  %534 = vmatpush.bf16.msra.mxu3 %v445_v41 }
  0x32   : > { %297 = vmatpush.bf16.msra.mxu0 %v433_v46  ;;  %527 = vmatpush.bf16.msra.mxu2 %v433_v46 }
  0x33   : > { %316 = vmatpush.bf16.msra.mxu1 %v437_v47  ;;  %535 = vmatpush.bf16.msra.mxu3 %v437_v47 }
  0x35   : > { %298 = vmatmul.bf16.vlgmr.msra.gmra.mxu0 %v500_v48  ;;  %303 = vmatmul.bf16.vlgmr.msra.gmra.mxu2 %v501_v49 }
  0x36   : > { %317 = vmatmul.bf16.vlgmr.msra.gmra.mxu1 %v500_v48  ;;  %322 = vmatmul.bf16.vlgmr.msra.gmra.mxu3 %v501_v49 }
  0xb2   : > { %v299_v53 = vpop.f32.mrf.mxu0 }
  0xb3   : > { %v300_v54 = vadd.f32 %v299_v53, %v194_v51  ;;  %v318_v55 = vpop.f32.mrf.mxu1 }
  0xb4   : > { %v319_v56 = vadd.f32 %v318_v55, %v195_v52 }
  0xb5   : > { %328 = vst [vmem:[%s164_s25] sm:$0xff] %v300_v54 }
  0xb6   : > { %329 = vst [vmem:[%s164_s25 + $0x8] sm:$0xff] %v319_v56 }
  0xb8   : > { %v304_v57 = vpop.f32.mrf.mxu2 }
  0xb9   : > { %v305_v58 = vadd.f32 %v304_v57, %v194_v51  ;;  %v323_v59 = vpop.f32.mrf.mxu3 }
  0xba   : > { %v324_v60 = vadd.f32 %v323_v59, %v195_v52  ;;  %v301_v61 = vpop.f32.mrf.mxu0 }
  0xbb   : > { %332 = vst [vmem:[%s164_s25 + $0x20] sm:$0xff] %v305_v58  ;;  %v302_v62 = vadd.f32 %v301_v61, %v194_v51  ;;  %v320_v63 = vpop.f32.mrf.mxu1 }
  0xbc   : > { %333 = vst [vmem:[%s164_s25 + $0x28] sm:$0xff] %v324_v60  ;;  %v321_v0 = vadd.f32 %v320_v63, %v195_v52 }
  0xbd   : > { %330 = vst [vmem:[%s164_s25 + $0x10] sm:$0xff] %v302_v62 }
  0xbe   : > { %331 = vst [vmem:[%s164_s25 + $0x18] sm:$0xff] %v321_v0 }
  0xc0   : > { %v306_v1 = vpop.f32.mrf.mxu2 }
  0xc1   : > { %v307_v2 = vadd.f32 %v306_v1, %v194_v51  ;;  %v325_v3 = vpop.f32.mrf.mxu3 }
  0xc2   : > { %v326_v4 = vadd.f32 %v325_v3, %v195_v52 }
  0xc3   : > { %334 = vst [vmem:[%s164_s25 + $0x30] sm:$0xff] %v307_v2 }
  0xc4   : > { %335 = vst [vmem:[%s164_s25 + $0x38] sm:$0xff] %v326_v4 }
  0xc5   : > { %604 = shalt.err (!%p601_p3)
}
  0xc6   : > { %s641_s28 = smov 256   ;;  %s642_s19 = smov 16  }
  0xc7   : > { %536 = dma.vmem_to_hbm [thread:$0]  (%p701_p5), %s351_s4, 1024, %s353_s5, %s337_s16, %s641_s28, %s641_s28, %s642_s19  }
  0xc8 PF: > { %p542_p4 = scmp.ge.s32.totalorder %s639_s15, 2  ;;  %s367_s20 = sand.u32 1, %s627_s12  }
  0xc9   : > { %s368_s24 = scalar_lea.sflag [#allocation3], %s367_s20 }
  0xca   : > { %p539_p7 = pnand %p542_p4, %p705_p6 }
  0xcc   : > { %p540_p8 = pneg %p539_p7 }
  0xce   : > { %622 = dma.done.wait (%p540_p8), %s368_s24, 1024  }
  0xcf   : > { %624 = vsyncadd (%p540_p8), %s368_s24, 4294966272  ;;  %p13_p9 = scmp.ge.s32.totalorder %s688_s18, 4   ;;  %s856_s12 = smov %s631_s13 }
  0xd0   : > { %s857_s13 = smov %s635_s14  ;;  %s858_s14 = smov %s699_s21 }
  0xd1   : > { %s859_s15 = smov %s688_s18  ;;  %15 = sbr.rel (!%p13_p9) target bundleno = 3 (0x3), region = 67 }
  0xd6   :  { %374 = vsyncpa [#allocation3], 1 }
  0xd7   :  { %376 = vsyncpa [#allocation3 + $0x1], 1 }

</bundles_post_ra>
